<compile_context>
chip_gen: v7x
topology: tpu7x:2x2x1
jax: 0.10.0
libtpu: 0.0.40
codegen_flags: <defaults>
</compile_context>

<pallas_src>
import functools

import jax
import jax.numpy as jnp
from jax.experimental import pallas as pl
from jax.experimental.pallas import tpu as pltpu

LN_EPS = 1e-5   # torch.nn.LayerNorm default eps
LANE = 128      # TPU lane width; narrow output dims are padded to this


# ----------------------------- in-kernel helpers -----------------------------

def _erf(x):
    # Abramowitz & Stegun 7.1.26 rational approximation (|err| < 1.5e-7) — guaranteed
    # Mosaic lowering and fp32-tolerance parity with torch.nn.GELU() (exact erf).
    a1, a2, a3, a4, a5 = 0.254829592, -0.284496736, 1.421413741, -1.453152027, 1.061405429
    p = 0.3275911
    s = jnp.where(x >= 0, 1.0, -1.0)
    ax = jnp.abs(x)
    t = 1.0 / (1.0 + p * ax)
    poly = ((((a5 * t + a4) * t + a3) * t + a2) * t + a1) * t
    return s * (1.0 - poly * jnp.exp(-ax * ax))


def _gelu(x):
    return 0.5 * x * (1.0 + _erf(x * 0.7071067811865476))


def _layernorm(x, w, b):
    mu = jnp.mean(x, axis=-1, keepdims=True)
    var = jnp.mean(jnp.square(x - mu), axis=-1, keepdims=True)
    return (x - mu) * jax.lax.rsqrt(var + LN_EPS) * w + b


def _vit_block(x, li, vecs_ref, qkvw_ref, qkvb_ref, projw_ref,
               fc1w_ref, fc1b_ref, fc2w_ref, *, heads):
    """One timm-style ViT block (pre-norm MHSA + pre-norm MLP, both residual).

    x: (N, D) tokens of a single image.  `li` is a static block index into the
    stacked (2*depth, ...) weight tensors.  The 1/sqrt(head_dim) q-scale is
    already folded into the qkv weights/bias at pack time."""
    N, D = x.shape
    hd = D // heads
    vecs = vecs_ref[li]                                   # (8, D): ln1w,ln1b,ln2w,ln2b,projb,fc2b

    # --- multi-head self attention ---
    h = _layernorm(x, vecs[0:1, :], vecs[1:2, :])
    qkv = jnp.dot(h, qkvw_ref[li], preferred_element_type=jnp.float32) + qkvb_ref[li]  # (N, 3D)
    q = qkv[:, :D]                                        # pre-scaled
    k_t = qkv[:, D:2 * D].T                               # (D, N): one XLU transpose per block
    v = qkv[:, 2 * D:]

    outs = []
    for hi in range(heads):                               # static unroll over heads
        sl = slice(hi * hd, (hi + 1) * hd)
        s = jnp.dot(q[:, sl], k_t[sl, :], preferred_element_type=jnp.float32)  # (N, N)
        s = s - jnp.max(s, axis=-1, keepdims=True)
        p = jnp.exp(s)
        p = p * pl.reciprocal(jnp.sum(p, axis=-1, keepdims=True), approx=True)
        outs.append(jnp.dot(p, v[:, sl], preferred_element_type=jnp.float32))  # (N, hd)
    attn = jnp.concatenate(outs, axis=-1)                 # (N, D): one K=D proj matmul below
    x = x + jnp.dot(attn, projw_ref[li], preferred_element_type=jnp.float32) + vecs[4:5, :]

    # --- MLP ---
    h = _layernorm(x, vecs[2:3, :], vecs[3:4, :])
    h = jnp.dot(h, fc1w_ref[li], preferred_element_type=jnp.float32) + fc1b_ref[li]
    h = _gelu(h)
    h = jnp.dot(h, fc2w_ref[li], preferred_element_type=jnp.float32) + vecs[5:6, :]
    return x + h


# --------------------------------- fused kernel --------------------------------

def vae_vit_kernel(patches_ref, eps_ref,
                   patch_w_ref, enc_posb_ref,
                   bvec_ref, bqkvw_ref, bqkvb_ref, bprojw_ref,
                   bfc1w_ref, bfc1b_ref, bfc2w_ref,
                   misc_ref, h32w_ref, h32b_ref, muvarw_ref, muvarb_ref,
                   d2w_ref, dec_pos_ref, outw_ref, outb_ref,
                   y_ref, stats_ref, *, depth, heads, z_pad):
    """Whole forward for ONE image (grid axis = batch)."""
    N, D = enc_posb_ref.shape
    ZP = z_pad
    f32 = jnp.float32

    def block(xv, li):
        return _vit_block(xv, li, bvec_ref, bqkvw_ref, bqkvb_ref, bprojw_ref,
                          bfc1w_ref, bfc1b_ref, bfc2w_ref, heads=heads)

    # ---- Encoder: patch embed (bias folded into pos) then `depth` blocks ----
    x = jnp.dot(patches_ref[...], patch_w_ref[...], preferred_element_type=f32)
    x = x + enc_posb_ref[...]                              # (N, D)
    for li in range(depth):
        x = block(x, li)

    # ---- Encoder head: norm -> token mean -> fc/ReLU -> [mu | log_var] ----
    misc = misc_ref[...]                                   # (8, D)
    xn = _layernorm(x, misc[0:1, :], misc[1:2, :])
    pooled = jnp.mean(xn, axis=0, keepdims=True)           # (1, D)
    hz = jnp.maximum(
        jnp.dot(pooled, h32w_ref[0:D, :], preferred_element_type=f32) + h32b_ref[0:1, :], 0.0)
    stats = jnp.dot(hz, muvarw_ref[...], preferred_element_type=f32) + muvarb_ref[...]  # (1, 2*ZP)
    stats_ref[0] = stats                                   # lane-dense store; cols >= z_dim are 0
    mu = stats[:, :ZP]
    lv = stats[:, ZP:]

    # ---- Reparameterize + decoder embed ----
    # eps / mu / lv padded columns are all zero, so padded z columns stay zero and the
    # zero-padded dec_fc1 rows keep them from affecting the decoder.
    z = mu + eps_ref[0] * jnp.exp(0.5 * lv)                # (1, ZP)
    hz = jnp.maximum(
        jnp.dot(z, h32w_ref[D:, :], preferred_element_type=f32) + h32b_ref[1:2, :], 0.0)
    hz = jnp.maximum(
        jnp.dot(hz, d2w_ref[...], preferred_element_type=f32) + misc[4:5, :], 0.0)       # (1, D)
    x = hz + dec_pos_ref[...]                              # broadcast over tokens -> (N, D)

    # ---- Decoder blocks ----
    for li in range(depth, 2 * depth):
        x = block(x, li)

    # ---- Decoder head: norm -> out linear (lane-padded to 128) -> sigmoid ----
    xn = _layernorm(x, misc[2:3, :], misc[3:4, :])
    y = jnp.dot(xn, outw_ref[...], preferred_element_type=f32) + outb_ref[...]
    y_ref[...] = jax.nn.sigmoid(y)                         # (N, 128); cols >= P*P sliced outside


# ----------------------------- parameters & packing -----------------------------

def init_params(key, cfg):
    """PyTorch-like parameters (linear weights stored (in, out) so y = x @ W + b)."""
    C, P, D = cfg["in_channel"], cfg["patch_size"], cfg["dim"]
    nps = cfg["img_size"] // P
    N = nps * nps
    M, Z, depth = cfg["mlp_dim"], cfg["z_dim"], cfg["depth"]

    def dense(k, fin, fout, scale=0.02):
        kw, kb = jax.random.split(k)
        return (scale * jax.random.normal(kw, (fin, fout), jnp.float32),
                0.01 * jax.random.normal(kb, (1, fout), jnp.float32))

    def block(k):
        ks = jax.random.split(k, 4)
        qkvw, qkvb = dense(ks[0], D, 3 * D)
        projw, projb = dense(ks[1], D, D)
        fc1w, fc1b = dense(ks[2], D, M)
        fc2w, fc2b = dense(ks[3], M, D)
        return dict(ln1w=jnp.ones((D,), jnp.float32), ln1b=jnp.zeros((D,), jnp.float32),
                    ln2w=jnp.ones((D,), jnp.float32), ln2b=jnp.zeros((D,), jnp.float32),
                    qkvw=qkvw, qkvb=qkvb, projw=projw, projb=projb,
                    fc1w=fc1w, fc1b=fc1b, fc2w=fc2w, fc2b=fc2b)

    keys = iter(jax.random.split(key, 10 + 2 * depth))
    p = {}
    p["patch_w"], p["patch_b"] = dense(next(keys), C * P * P, D)
    p["enc_pos"] = 0.02 * jax.random.normal(next(keys), (N, D), jnp.float32)
    p["enc_blocks"] = [block(next(keys)) for _ in range(depth)]
    p["enc_norm_w"], p["enc_norm_b"] = jnp.ones((D,), jnp.float32), jnp.zeros((D,), jnp.float32)
    p["enc_fc_w"], p["enc_fc_b"] = dense(next(keys), D, 32)
    p["mu_w"], p["mu_b"] = dense(next(keys), 32, Z)
    p["var_w"], p["var_b"] = dense(next(keys), 32, Z)
    p["dec_fc1_w"], p["dec_fc1_b"] = dense(next(keys), Z, 32)
    p["dec_fc2_w"], p["dec_fc2_b"] = dense(next(keys), 32, D)
    p["dec_pos"] = 0.02 * jax.random.normal(next(keys), (N, D), jnp.float32)
    p["dec_blocks"] = [block(next(keys)) for _ in range(depth)]
    p["dec_norm_w"], p["dec_norm_b"] = jnp.ones((D,), jnp.float32), jnp.zeros((D,), jnp.float32)
    p["out_w"], p["out_b"] = dense(next(keys), D, P * P)
    return p


def pack_params(p, cfg):
    """One-time prep: stack / pad / fold weights into the kernel's packed layout."""
    C, P, D = cfg["in_channel"], cfg["patch_size"], cfg["dim"]
    M, Z, H = cfg["mlp_dim"], cfg["z_dim"], cfg["heads"]
    hd = D // H
    q_scale = hd ** -0.5
    PP = P * P
    ZP, KP = LANE, LANE
    K = C * P * P
    Kp = -(-K // 64) * 64                                  # patch contraction dim 49 -> 64

    blocks = list(p["enc_blocks"]) + list(p["dec_blocks"])
    zrow = jnp.zeros((D,), jnp.float32)

    def stack(fn):
        return jnp.stack([fn(b) for b in blocks])

    def fold_q(w):                                         # fold q-scale into qkv weight/bias
        return jnp.concatenate([w[:, :D] * q_scale, w[:, D:]], axis=1)

    packed = {}
    packed["patch_w"] = jnp.pad(p["patch_w"], ((0, Kp - K), (0, 0)))
    packed["enc_pos_b"] = p["enc_pos"] + p["patch_b"]      # fold patch-embed bias into pos
    packed["blk_vecs"] = stack(lambda b: jnp.stack(
        [b["ln1w"], b["ln1b"], b["ln2w"], b["ln2b"], b["projb"][0], b["fc2b"][0], zrow, zrow]))
    packed["blk_qkvw"] = stack(lambda b: fold_q(b["qkvw"]))
    packed["blk_qkvb"] = stack(lambda b: fold_q(b["qkvb"]))
    packed["blk_projw"] = stack(lambda b: b["projw"])
    packed["blk_fc1w"] = stack(lambda b: b["fc1w"])
    packed["blk_fc1b"] = stack(lambda b: b["fc1b"])
    packed["blk_fc2w"] = stack(lambda b: b["fc2w"])
    packed["misc_vecs"] = jnp.stack(
        [p["enc_norm_w"], p["enc_norm_b"], p["dec_norm_w"], p["dec_norm_b"],
         p["dec_fc2_b"][0], zrow, zrow, zrow])
    packed["head32_w"] = jnp.concatenate(
        [p["enc_fc_w"], jnp.pad(p["dec_fc1_w"], ((0, ZP - Z), (0, 0)))], axis=0)   # (D+ZP, 32)
    packed["head32_b"] = jnp.concatenate([p["enc_fc_b"], p["dec_fc1_b"]], axis=0)  # (2, 32)
    packed["muvar_w"] = jnp.concatenate(
        [jnp.pad(p["mu_w"], ((0, 0), (0, ZP - Z))),
         jnp.pad(p["var_w"], ((0, 0), (0, ZP - Z)))], axis=1)                      # (32, 2*ZP)
    packed["muvar_b"] = jnp.concatenate(
        [jnp.pad(p["mu_b"], ((0, 0), (0, ZP - Z))),
         jnp.pad(p["var_b"], ((0, 0), (0, ZP - Z)))], axis=1)                      # (1, 2*ZP)
    packed["d2_w"] = p["dec_fc2_w"]
    packed["dec_pos"] = p["dec_pos"]
    packed["out_w"] = jnp.pad(p["out_w"], ((0, 0), (0, KP - PP)))
    packed["out_b"] = jnp.pad(p["out_b"], ((0, 0), (0, KP - PP)))
    return packed


# ---------------------------------- forward ------------------------------------

def vae_vit_forward(packed, x_img, eps, cfg):
    B = x_img.shape[0]
    C, P, D, Z = cfg["in_channel"], cfg["patch_size"], cfg["dim"], cfg["z_dim"]
    depth, H = cfg["depth"], cfg["heads"]
    nps = cfg["img_size"] // P
    N = nps * nps
    T = B * N
    PP = P * P
    K = C * P * P
    ZP, KP = LANE, LANE
    Kp = packed["patch_w"].shape[0]

    # PatchEmbed Conv2d(kernel=P, stride=P) == per-patch linear on (C,P,P)-flattened pixels;
    # extraction + K padding is cheap per-call wrapper glue (the matmul lives in Pallas).
    patches = x_img.reshape(B, C, nps, P, nps, P)
    patches = patches.transpose(0, 2, 4, 1, 3, 5).reshape(T, K)
    patches = jnp.pad(patches, ((0, 0), (0, Kp - K)))

    eps_p = jnp.pad(eps, ((0, 0), (0, ZP - Z))).reshape(B, 1, ZP)

    weight_names = ("patch_w", "enc_pos_b", "blk_vecs", "blk_qkvw", "blk_qkvb",
                    "blk_projw", "blk_fc1w", "blk_fc1b", "blk_fc2w",
                    "misc_vecs", "head32_w", "head32_b", "muvar_w", "muvar_b",
                    "d2_w", "dec_pos", "out_w", "out_b")
    weights = tuple(packed[n] for n in weight_names)

    def const_spec(arr):
        zeros = (0,) * arr.ndim                 # constant block index -> DMA'd once, held
        return pl.BlockSpec(arr.shape, lambda b: zeros)

    in_specs = [pl.BlockSpec((N, Kp), lambda b: (b, 0)),          # per-image patch rows
                pl.BlockSpec((1, 1, ZP), lambda b: (b, 0, 0))]    # per-image eps
    in_specs += [const_spec(w) for w in weights]

    out_shapes = (jax.ShapeDtypeStruct((T, KP), jnp.float32),     # decoder patches (padded)
                  jax.ShapeDtypeStruct((B, 1, 2 * ZP), jnp.float32))  # [mu | log_var] (padded)
    out_specs = (pl.BlockSpec((N, KP), lambda b: (b, 0)),
                 pl.BlockSpec((1, 1, 2 * ZP), lambda b: (b, 0, 0)))

    kernel = functools.partial(vae_vit_kernel, depth=depth, heads=H, z_pad=ZP)

    y_pad, stats = pl.pallas_call(
        kernel,
        grid=(B,),
        out_shape=out_shapes,
        in_specs=in_specs,
        out_specs=out_specs,
        compiler_params=pltpu.CompilerParams(dimension_semantics=("parallel",)),
    )(patches, eps_p, *weights)

    mu = stats[:, 0, :Z]
    log_var = stats[:, 0, ZP:ZP + Z]

    # Reassemble patches into the NCHW image (matches the torch reshape/permute glue).
    y = y_pad[:, :PP].reshape(B, nps, nps, P, P, C)
    y = y.transpose(0, 5, 1, 3, 2, 4)
    x_hat = y.reshape(B, C, nps * P, nps * P)
    return x_hat, mu, log_var


# ----------------------------------- main --------------------------------------

if __name__ == "__main__":
    # Small but structurally faithful config: 28x28 single-channel image, 7x7 patches
    # -> 16 patches, ViT dim 64, 4 heads, 2 blocks per stack, z_dim 4, batch 2.
    cfg = dict(in_channel=1, img_size=28, patch_size=7, dim=64, depth=2, heads=4,
               mlp_dim=128, z_dim=4)

    key = jax.random.PRNGKey(0)
    kp, kx, ke = jax.random.split(key, 3)
    params = init_params(kp, cfg)
    packed = pack_params(params, cfg)   # one-time prep: hoisted out of the per-call path

    B = 2
    x = jax.random.normal(kx, (B, cfg["in_channel"], cfg["img_size"], cfg["img_size"]),
                          jnp.float32)
    # TODO(synk): torch.randn_like uses torch's RNG stream; here eps is a deterministic
    # JAX normal draw with identical N(0,1) semantics, passed in as an explicit input.
    eps = jax.random.normal(ke, (B, cfg["z_dim"]), jnp.float32)

    fwd = jax.jit(functools.partial(vae_vit_forward, cfg=cfg))
    x_hat, mu, log_var = fwd(packed, x, eps)
    jax.block_until_ready((x_hat, mu, log_var))

    assert x_hat.shape == (B, 1, 28, 28)
    assert mu.shape == (B, cfg["z_dim"]) and log_var.shape == (B, cfg["z_dim"])
    assert bool(jnp.all(jnp.isfinite(x_hat))) and bool(jnp.all((x_hat >= 0) & (x_hat <= 1)))
    print("KERNEL_OK")
</pallas_src>

<mosaic_0001>
module attributes {stable_mosaic.version = 11 : i64} {
  func.func @vae_vit_kernel(%arg0: i32, %arg1: memref<16x64xf32, #tpu.memory_space<vmem>>, %arg2: memref<1x1x128xf32, #tpu.memory_space<vmem>>, %arg3: memref<64x64xf32, #tpu.memory_space<vmem>>, %arg4: memref<16x64xf32, #tpu.memory_space<vmem>>, %arg5: memref<4x8x64xf32, #tpu.memory_space<vmem>>, %arg6: memref<4x64x192xf32, #tpu.memory_space<vmem>>, %arg7: memref<4x1x192xf32, #tpu.memory_space<vmem>>, %arg8: memref<4x64x64xf32, #tpu.memory_space<vmem>>, %arg9: memref<4x64x128xf32, #tpu.memory_space<vmem>>, %arg10: memref<4x1x128xf32, #tpu.memory_space<vmem>>, %arg11: memref<4x128x64xf32, #tpu.memory_space<vmem>>, %arg12: memref<8x64xf32, #tpu.memory_space<vmem>>, %arg13: memref<192x32xf32, #tpu.memory_space<vmem>>, %arg14: memref<2x32xf32, #tpu.memory_space<vmem>>, %arg15: memref<32x256xf32, #tpu.memory_space<vmem>>, %arg16: memref<1x256xf32, #tpu.memory_space<vmem>>, %arg17: memref<32x64xf32, #tpu.memory_space<vmem>>, %arg18: memref<16x64xf32, #tpu.memory_space<vmem>>, %arg19: memref<64x128xf32, #tpu.memory_space<vmem>>, %arg20: memref<1x128xf32, #tpu.memory_space<vmem>>, %arg21: memref<16x128xf32, #tpu.memory_space<vmem>>, %arg22: memref<1x1x256xf32, #tpu.memory_space<vmem>>) attributes {dimension_semantics = [#tpu.dimension_semantics<parallel>], iteration_bounds = array<i64: 2>, scalar_prefetch = 0 : i64, scratch_operands = 0 : i64, tpu.core_type = #tpu.core_type<tc>, window_params = [{transform_indices = @transform_0, window_bounds = array<i64: 16, 64>}, {transform_indices = @transform_1, window_bounds = array<i64: 1, 1, 128>}, {pipeline_mode = #tpu.pipeline_mode<synchronous>, transform_indices = @transform_2, window_bounds = array<i64: 64, 64>}, {pipeline_mode = #tpu.pipeline_mode<synchronous>, transform_indices = @transform_3, window_bounds = array<i64: 16, 64>}, {pipeline_mode = #tpu.pipeline_mode<synchronous>, transform_indices = @transform_4, window_bounds = array<i64: 4, 8, 64>}, {pipeline_mode = #tpu.pipeline_mode<synchronous>, transform_indices = @transform_5, window_bounds = array<i64: 4, 64, 192>}, {pipeline_mode = #tpu.pipeline_mode<synchronous>, transform_indices = @transform_6, window_bounds = array<i64: 4, 1, 192>}, {pipeline_mode = #tpu.pipeline_mode<synchronous>, transform_indices = @transform_7, window_bounds = array<i64: 4, 64, 64>}, {pipeline_mode = #tpu.pipeline_mode<synchronous>, transform_indices = @transform_8, window_bounds = array<i64: 4, 64, 128>}, {pipeline_mode = #tpu.pipeline_mode<synchronous>, transform_indices = @transform_9, window_bounds = array<i64: 4, 1, 128>}, {pipeline_mode = #tpu.pipeline_mode<synchronous>, transform_indices = @transform_10, window_bounds = array<i64: 4, 128, 64>}, {pipeline_mode = #tpu.pipeline_mode<synchronous>, transform_indices = @transform_11, window_bounds = array<i64: 8, 64>}, {pipeline_mode = #tpu.pipeline_mode<synchronous>, transform_indices = @transform_12, window_bounds = array<i64: 192, 32>}, {pipeline_mode = #tpu.pipeline_mode<synchronous>, transform_indices = @transform_13, window_bounds = array<i64: 2, 32>}, {pipeline_mode = #tpu.pipeline_mode<synchronous>, transform_indices = @transform_14, window_bounds = array<i64: 32, 256>}, {pipeline_mode = #tpu.pipeline_mode<synchronous>, transform_indices = @transform_15, window_bounds = array<i64: 1, 256>}, {pipeline_mode = #tpu.pipeline_mode<synchronous>, transform_indices = @transform_16, window_bounds = array<i64: 32, 64>}, {pipeline_mode = #tpu.pipeline_mode<synchronous>, transform_indices = @transform_17, window_bounds = array<i64: 16, 64>}, {pipeline_mode = #tpu.pipeline_mode<synchronous>, transform_indices = @transform_18, window_bounds = array<i64: 64, 128>}, {pipeline_mode = #tpu.pipeline_mode<synchronous>, transform_indices = @transform_19, window_bounds = array<i64: 1, 128>}, {transform_indices = @transform_20, window_bounds = array<i64: 16, 128>}, {transform_indices = @transform_21, window_bounds = array<i64: 1, 1, 256>}]} {
    %c0 = arith.constant 0 : index
    %c0_0 = arith.constant 0 : index
    %0 = vector.load %arg1[%c0, %c0_0] : memref<16x64xf32, #tpu.memory_space<vmem>>, vector<16x64xf32>
    %c0_1 = arith.constant 0 : index
    %c0_2 = arith.constant 0 : index
    %1 = vector.load %arg3[%c0_1, %c0_2] : memref<64x64xf32, #tpu.memory_space<vmem>>, vector<64x64xf32>
    %cst = arith.constant dense<0.000000e+00> : vector<16x64xf32>
    %2 = tpu.matmul %0, %1, %cst {dimension_numbers = #tpu.dot_dimension_numbers<[1], [0], [0], [1], [0, 0, 1, 1], [], []>} : vector<16x64xf32>, vector<64x64xf32>, vector<16x64xf32> -> vector<16x64xf32>
    %c0_3 = arith.constant 0 : index
    %c0_4 = arith.constant 0 : index
    %3 = vector.load %arg4[%c0_3, %c0_4] : memref<16x64xf32, #tpu.memory_space<vmem>>, vector<16x64xf32>
    %4 = arith.addf %2, %3 : vector<16x64xf32>
    %c0_5 = arith.constant 0 : index
    %c0_6 = arith.constant 0 : index
    %c0_7 = arith.constant 0 : index
    %5 = vector.load %arg5[%c0_5, %c0_6, %c0_7] : memref<4x8x64xf32, #tpu.memory_space<vmem>>, vector<1x8x64xf32>
    %6 = vector.shape_cast %5 : vector<1x8x64xf32> to vector<8x64xf32>
    %7 = vector.extract_strided_slice %6 {offsets = [0, 0], sizes = [1, 64], strides = [1, 1]} : vector<8x64xf32> to vector<1x64xf32>
    %8 = vector.extract_strided_slice %6 {offsets = [1, 0], sizes = [1, 64], strides = [1, 1]} : vector<8x64xf32> to vector<1x64xf32>
    %cst_8 = arith.constant dense<0.000000e+00> : vector<16xf32>
    %9 = vector.multi_reduction <add>, %4, %cst_8 [1] : vector<16x64xf32> to vector<16xf32>
    %10 = vector.shape_cast %9 : vector<16xf32> to vector<16x1xf32>
    %cst_9 = arith.constant 6.400000e+01 : f32
    %11 = vector.broadcast %cst_9 : f32 to vector<16x1xf32>
    %12 = arith.divf %10, %11 : vector<16x1xf32>
    %13 = vector.broadcast %12 : vector<16x1xf32> to vector<16x64xf32>
    %14 = arith.subf %4, %13 : vector<16x64xf32>
    %15 = arith.mulf %14, %14 : vector<16x64xf32>
    %cst_10 = arith.constant dense<0.000000e+00> : vector<16xf32>
    %16 = vector.multi_reduction <add>, %15, %cst_10 [1] : vector<16x64xf32> to vector<16xf32>
    %17 = vector.shape_cast %16 : vector<16xf32> to vector<16x1xf32>
    %cst_11 = arith.constant 6.400000e+01 : f32
    %18 = vector.broadcast %cst_11 : f32 to vector<16x1xf32>
    %19 = arith.divf %17, %18 : vector<16x1xf32>
    %20 = vector.broadcast %12 : vector<16x1xf32> to vector<16x64xf32>
    %21 = arith.subf %4, %20 : vector<16x64xf32>
    %cst_12 = arith.constant 9.99999974E-6 : f32
    %22 = vector.broadcast %cst_12 : f32 to vector<16x1xf32>
    %23 = arith.addf %19, %22 : vector<16x1xf32>
    %24 = math.rsqrt %23 : vector<16x1xf32>
    %25 = vector.broadcast %24 : vector<16x1xf32> to vector<16x64xf32>
    %26 = arith.mulf %21, %25 : vector<16x64xf32>
    %27 = vector.broadcast %7 : vector<1x64xf32> to vector<16x64xf32>
    %28 = arith.mulf %26, %27 : vector<16x64xf32>
    %29 = vector.broadcast %8 : vector<1x64xf32> to vector<16x64xf32>
    %30 = arith.addf %28, %29 : vector<16x64xf32>
    %c0_13 = arith.constant 0 : index
    %c0_14 = arith.constant 0 : index
    %c0_15 = arith.constant 0 : index
    %31 = vector.load %arg6[%c0_13, %c0_14, %c0_15] : memref<4x64x192xf32, #tpu.memory_space<vmem>>, vector<1x64x192xf32>
    %32 = vector.shape_cast %31 : vector<1x64x192xf32> to vector<64x192xf32>
    %cst_16 = arith.constant dense<0.000000e+00> : vector<16x192xf32>
    %33 = tpu.matmul %30, %32, %cst_16 {dimension_numbers = #tpu.dot_dimension_numbers<[1], [0], [0], [1], [0, 0, 1, 1], [], []>} : vector<16x64xf32>, vector<64x192xf32>, vector<16x192xf32> -> vector<16x192xf32>
    %c0_17 = arith.constant 0 : index
    %c0_18 = arith.constant 0 : index
    %c0_19 = arith.constant 0 : index
    %34 = vector.load %arg7[%c0_17, %c0_18, %c0_19] : memref<4x1x192xf32, #tpu.memory_space<vmem>>, vector<1x1x192xf32>
    %35 = vector.shape_cast %34 : vector<1x1x192xf32> to vector<1x192xf32>
    %36 = vector.broadcast %35 : vector<1x192xf32> to vector<16x192xf32>
    %37 = arith.addf %33, %36 : vector<16x192xf32>
    %38 = vector.extract_strided_slice %37 {offsets = [0, 0], sizes = [16, 64], strides = [1, 1]} : vector<16x192xf32> to vector<16x64xf32>
    %39 = vector.extract_strided_slice %37 {offsets = [0, 64], sizes = [16, 64], strides = [1, 1]} : vector<16x192xf32> to vector<16x64xf32>
    %40 = tpu.transpose %39, [1, 0] : vector<16x64xf32> -> vector<64x16xf32>
    %41 = vector.extract_strided_slice %37 {offsets = [0, 128], sizes = [16, 64], strides = [1, 1]} : vector<16x192xf32> to vector<16x64xf32>
    %42 = vector.extract_strided_slice %38 {offsets = [0, 0], sizes = [16, 16], strides = [1, 1]} : vector<16x64xf32> to vector<16x16xf32>
    %43 = vector.extract_strided_slice %40 {offsets = [0, 0], sizes = [16, 16], strides = [1, 1]} : vector<64x16xf32> to vector<16x16xf32>
    %cst_20 = arith.constant dense<0.000000e+00> : vector<16x16xf32>
    %44 = tpu.matmul %42, %43, %cst_20 {dimension_numbers = #tpu.dot_dimension_numbers<[1], [0], [0], [1], [0, 0, 1, 1], [], []>} : vector<16x16xf32>, vector<16x16xf32>, vector<16x16xf32> -> vector<16x16xf32>
    %cst_21 = arith.constant dense<0xFF800000> : vector<16xf32>
    %45 = vector.multi_reduction <maximumf>, %44, %cst_21 [1] : vector<16x16xf32> to vector<16xf32>
    %46 = vector.shape_cast %45 : vector<16xf32> to vector<16x1xf32>
    %47 = vector.broadcast %46 : vector<16x1xf32> to vector<16x16xf32>
    %48 = arith.subf %44, %47 : vector<16x16xf32>
    %49 = math.exp %48 : vector<16x16xf32>
    %cst_22 = arith.constant dense<0.000000e+00> : vector<16xf32>
    %50 = vector.multi_reduction <add>, %49, %cst_22 [1] : vector<16x16xf32> to vector<16xf32>
    %51 = vector.shape_cast %50 : vector<16xf32> to vector<16x1xf32>
    %52 = tpu.reciprocal %51 {approx = true} : vector<16x1xf32> -> vector<16x1xf32>
    %53 = vector.broadcast %52 : vector<16x1xf32> to vector<16x16xf32>
    %54 = arith.mulf %49, %53 : vector<16x16xf32>
    %55 = vector.extract_strided_slice %41 {offsets = [0, 0], sizes = [16, 16], strides = [1, 1]} : vector<16x64xf32> to vector<16x16xf32>
    %cst_23 = arith.constant dense<0.000000e+00> : vector<16x16xf32>
    %56 = tpu.matmul %54, %55, %cst_23 {dimension_numbers = #tpu.dot_dimension_numbers<[1], [0], [0], [1], [0, 0, 1, 1], [], []>} : vector<16x16xf32>, vector<16x16xf32>, vector<16x16xf32> -> vector<16x16xf32>
    %57 = vector.extract_strided_slice %38 {offsets = [0, 16], sizes = [16, 16], strides = [1, 1]} : vector<16x64xf32> to vector<16x16xf32>
    %58 = vector.extract_strided_slice %40 {offsets = [16, 0], sizes = [16, 16], strides = [1, 1]} : vector<64x16xf32> to vector<16x16xf32>
    %cst_24 = arith.constant dense<0.000000e+00> : vector<16x16xf32>
    %59 = tpu.matmul %57, %58, %cst_24 {dimension_numbers = #tpu.dot_dimension_numbers<[1], [0], [0], [1], [0, 0, 1, 1], [], []>} : vector<16x16xf32>, vector<16x16xf32>, vector<16x16xf32> -> vector<16x16xf32>
    %cst_25 = arith.constant dense<0xFF800000> : vector<16xf32>
    %60 = vector.multi_reduction <maximumf>, %59, %cst_25 [1] : vector<16x16xf32> to vector<16xf32>
    %61 = vector.shape_cast %60 : vector<16xf32> to vector<16x1xf32>
    %62 = vector.broadcast %61 : vector<16x1xf32> to vector<16x16xf32>
    %63 = arith.subf %59, %62 : vector<16x16xf32>
    %64 = math.exp %63 : vector<16x16xf32>
    %cst_26 = arith.constant dense<0.000000e+00> : vector<16xf32>
    %65 = vector.multi_reduction <add>, %64, %cst_26 [1] : vector<16x16xf32> to vector<16xf32>
    %66 = vector.shape_cast %65 : vector<16xf32> to vector<16x1xf32>
    %67 = tpu.reciprocal %66 {approx = true} : vector<16x1xf32> -> vector<16x1xf32>
    %68 = vector.broadcast %67 : vector<16x1xf32> to vector<16x16xf32>
    %69 = arith.mulf %64, %68 : vector<16x16xf32>
    %70 = vector.extract_strided_slice %41 {offsets = [0, 16], sizes = [16, 16], strides = [1, 1]} : vector<16x64xf32> to vector<16x16xf32>
    %cst_27 = arith.constant dense<0.000000e+00> : vector<16x16xf32>
    %71 = tpu.matmul %69, %70, %cst_27 {dimension_numbers = #tpu.dot_dimension_numbers<[1], [0], [0], [1], [0, 0, 1, 1], [], []>} : vector<16x16xf32>, vector<16x16xf32>, vector<16x16xf32> -> vector<16x16xf32>
    %72 = vector.extract_strided_slice %38 {offsets = [0, 32], sizes = [16, 16], strides = [1, 1]} : vector<16x64xf32> to vector<16x16xf32>
    %73 = vector.extract_strided_slice %40 {offsets = [32, 0], sizes = [16, 16], strides = [1, 1]} : vector<64x16xf32> to vector<16x16xf32>
    %cst_28 = arith.constant dense<0.000000e+00> : vector<16x16xf32>
    %74 = tpu.matmul %72, %73, %cst_28 {dimension_numbers = #tpu.dot_dimension_numbers<[1], [0], [0], [1], [0, 0, 1, 1], [], []>} : vector<16x16xf32>, vector<16x16xf32>, vector<16x16xf32> -> vector<16x16xf32>
    %cst_29 = arith.constant dense<0xFF800000> : vector<16xf32>
    %75 = vector.multi_reduction <maximumf>, %74, %cst_29 [1] : vector<16x16xf32> to vector<16xf32>
    %76 = vector.shape_cast %75 : vector<16xf32> to vector<16x1xf32>
    %77 = vector.broadcast %76 : vector<16x1xf32> to vector<16x16xf32>
    %78 = arith.subf %74, %77 : vector<16x16xf32>
    %79 = math.exp %78 : vector<16x16xf32>
    %cst_30 = arith.constant dense<0.000000e+00> : vector<16xf32>
    %80 = vector.multi_reduction <add>, %79, %cst_30 [1] : vector<16x16xf32> to vector<16xf32>
    %81 = vector.shape_cast %80 : vector<16xf32> to vector<16x1xf32>
    %82 = tpu.reciprocal %81 {approx = true} : vector<16x1xf32> -> vector<16x1xf32>
    %83 = vector.broadcast %82 : vector<16x1xf32> to vector<16x16xf32>
    %84 = arith.mulf %79, %83 : vector<16x16xf32>
    %85 = vector.extract_strided_slice %41 {offsets = [0, 32], sizes = [16, 16], strides = [1, 1]} : vector<16x64xf32> to vector<16x16xf32>
    %cst_31 = arith.constant dense<0.000000e+00> : vector<16x16xf32>
    %86 = tpu.matmul %84, %85, %cst_31 {dimension_numbers = #tpu.dot_dimension_numbers<[1], [0], [0], [1], [0, 0, 1, 1], [], []>} : vector<16x16xf32>, vector<16x16xf32>, vector<16x16xf32> -> vector<16x16xf32>
    %87 = vector.extract_strided_slice %38 {offsets = [0, 48], sizes = [16, 16], strides = [1, 1]} : vector<16x64xf32> to vector<16x16xf32>
    %88 = vector.extract_strided_slice %40 {offsets = [48, 0], sizes = [16, 16], strides = [1, 1]} : vector<64x16xf32> to vector<16x16xf32>
    %cst_32 = arith.constant dense<0.000000e+00> : vector<16x16xf32>
    %89 = tpu.matmul %87, %88, %cst_32 {dimension_numbers = #tpu.dot_dimension_numbers<[1], [0], [0], [1], [0, 0, 1, 1], [], []>} : vector<16x16xf32>, vector<16x16xf32>, vector<16x16xf32> -> vector<16x16xf32>
    %cst_33 = arith.constant dense<0xFF800000> : vector<16xf32>
    %90 = vector.multi_reduction <maximumf>, %89, %cst_33 [1] : vector<16x16xf32> to vector<16xf32>
    %91 = vector.shape_cast %90 : vector<16xf32> to vector<16x1xf32>
    %92 = vector.broadcast %91 : vector<16x1xf32> to vector<16x16xf32>
    %93 = arith.subf %89, %92 : vector<16x16xf32>
    %94 = math.exp %93 : vector<16x16xf32>
    %cst_34 = arith.constant dense<0.000000e+00> : vector<16xf32>
    %95 = vector.multi_reduction <add>, %94, %cst_34 [1] : vector<16x16xf32> to vector<16xf32>
    %96 = vector.shape_cast %95 : vector<16xf32> to vector<16x1xf32>
    %97 = tpu.reciprocal %96 {approx = true} : vector<16x1xf32> -> vector<16x1xf32>
    %98 = vector.broadcast %97 : vector<16x1xf32> to vector<16x16xf32>
    %99 = arith.mulf %94, %98 : vector<16x16xf32>
    %100 = vector.extract_strided_slice %41 {offsets = [0, 48], sizes = [16, 16], strides = [1, 1]} : vector<16x64xf32> to vector<16x16xf32>
    %cst_35 = arith.constant dense<0.000000e+00> : vector<16x16xf32>
    %101 = tpu.matmul %99, %100, %cst_35 {dimension_numbers = #tpu.dot_dimension_numbers<[1], [0], [0], [1], [0, 0, 1, 1], [], []>} : vector<16x16xf32>, vector<16x16xf32>, vector<16x16xf32> -> vector<16x16xf32>
    %102 = tpu.concatenate %56, %71, %86, %101 in 1 : vector<16x16xf32>, vector<16x16xf32>, vector<16x16xf32>, vector<16x16xf32> -> vector<16x64xf32>
    %c0_36 = arith.constant 0 : index
    %c0_37 = arith.constant 0 : index
    %c0_38 = arith.constant 0 : index
    %103 = vector.load %arg8[%c0_36, %c0_37, %c0_38] : memref<4x64x64xf32, #tpu.memory_space<vmem>>, vector<1x64x64xf32>
    %104 = vector.shape_cast %103 : vector<1x64x64xf32> to vector<64x64xf32>
    %cst_39 = arith.constant dense<0.000000e+00> : vector<16x64xf32>
    %105 = tpu.matmul %102, %104, %cst_39 {dimension_numbers = #tpu.dot_dimension_numbers<[1], [0], [0], [1], [0, 0, 1, 1], [], []>} : vector<16x64xf32>, vector<64x64xf32>, vector<16x64xf32> -> vector<16x64xf32>
    %106 = arith.addf %4, %105 : vector<16x64xf32>
    %107 = vector.extract_strided_slice %6 {offsets = [4, 0], sizes = [1, 64], strides = [1, 1]} : vector<8x64xf32> to vector<1x64xf32>
    %108 = vector.broadcast %107 : vector<1x64xf32> to vector<16x64xf32>
    %109 = arith.addf %106, %108 : vector<16x64xf32>
    %110 = vector.extract_strided_slice %6 {offsets = [2, 0], sizes = [1, 64], strides = [1, 1]} : vector<8x64xf32> to vector<1x64xf32>
    %111 = vector.extract_strided_slice %6 {offsets = [3, 0], sizes = [1, 64], strides = [1, 1]} : vector<8x64xf32> to vector<1x64xf32>
    %cst_40 = arith.constant dense<0.000000e+00> : vector<16xf32>
    %112 = vector.multi_reduction <add>, %109, %cst_40 [1] : vector<16x64xf32> to vector<16xf32>
    %113 = vector.shape_cast %112 : vector<16xf32> to vector<16x1xf32>
    %cst_41 = arith.constant 6.400000e+01 : f32
    %114 = vector.broadcast %cst_41 : f32 to vector<16x1xf32>
    %115 = arith.divf %113, %114 : vector<16x1xf32>
    %116 = vector.broadcast %115 : vector<16x1xf32> to vector<16x64xf32>
    %117 = arith.subf %109, %116 : vector<16x64xf32>
    %118 = arith.mulf %117, %117 : vector<16x64xf32>
    %cst_42 = arith.constant dense<0.000000e+00> : vector<16xf32>
    %119 = vector.multi_reduction <add>, %118, %cst_42 [1] : vector<16x64xf32> to vector<16xf32>
    %120 = vector.shape_cast %119 : vector<16xf32> to vector<16x1xf32>
    %cst_43 = arith.constant 6.400000e+01 : f32
    %121 = vector.broadcast %cst_43 : f32 to vector<16x1xf32>
    %122 = arith.divf %120, %121 : vector<16x1xf32>
    %123 = vector.broadcast %115 : vector<16x1xf32> to vector<16x64xf32>
    %124 = arith.subf %109, %123 : vector<16x64xf32>
    %cst_44 = arith.constant 9.99999974E-6 : f32
    %125 = vector.broadcast %cst_44 : f32 to vector<16x1xf32>
    %126 = arith.addf %122, %125 : vector<16x1xf32>
    %127 = math.rsqrt %126 : vector<16x1xf32>
    %128 = vector.broadcast %127 : vector<16x1xf32> to vector<16x64xf32>
    %129 = arith.mulf %124, %128 : vector<16x64xf32>
    %130 = vector.broadcast %110 : vector<1x64xf32> to vector<16x64xf32>
    %131 = arith.mulf %129, %130 : vector<16x64xf32>
    %132 = vector.broadcast %111 : vector<1x64xf32> to vector<16x64xf32>
    %133 = arith.addf %131, %132 : vector<16x64xf32>
    %c0_45 = arith.constant 0 : index
    %c0_46 = arith.constant 0 : index
    %c0_47 = arith.constant 0 : index
    %134 = vector.load %arg9[%c0_45, %c0_46, %c0_47] : memref<4x64x128xf32, #tpu.memory_space<vmem>>, vector<1x64x128xf32>
    %135 = vector.shape_cast %134 : vector<1x64x128xf32> to vector<64x128xf32>
    %cst_48 = arith.constant dense<0.000000e+00> : vector<16x128xf32>
    %136 = tpu.matmul %133, %135, %cst_48 {dimension_numbers = #tpu.dot_dimension_numbers<[1], [0], [0], [1], [0, 0, 1, 1], [], []>} : vector<16x64xf32>, vector<64x128xf32>, vector<16x128xf32> -> vector<16x128xf32>
    %c0_49 = arith.constant 0 : index
    %c0_50 = arith.constant 0 : index
    %c0_51 = arith.constant 0 : index
    %137 = vector.load %arg10[%c0_49, %c0_50, %c0_51] : memref<4x1x128xf32, #tpu.memory_space<vmem>>, vector<1x1x128xf32>
    %138 = vector.shape_cast %137 : vector<1x1x128xf32> to vector<1x128xf32>
    %139 = vector.broadcast %138 : vector<1x128xf32> to vector<16x128xf32>
    %140 = arith.addf %136, %139 : vector<16x128xf32>
    %cst_52 = arith.constant 5.000000e-01 : f32
    %141 = vector.broadcast %cst_52 : f32 to vector<16x128xf32>
    %142 = arith.mulf %141, %140 : vector<16x128xf32>
    %cst_53 = arith.constant 0.707106769 : f32
    %143 = vector.broadcast %cst_53 : f32 to vector<16x128xf32>
    %144 = arith.mulf %140, %143 : vector<16x128xf32>
    %cst_54 = arith.constant 0.000000e+00 : f32
    %145 = vector.broadcast %cst_54 : f32 to vector<16x128xf32>
    %146 = arith.cmpf oge, %144, %145 : vector<16x128xf32>
    %cst_55 = arith.constant 1.000000e+00 : f32
    %cst_56 = arith.constant -1.000000e+00 : f32
    %147 = vector.broadcast %cst_55 : f32 to vector<16x128xf32>
    %148 = vector.broadcast %cst_56 : f32 to vector<16x128xf32>
    %149 = arith.select %146, %147, %148 : vector<16x128xi1>, vector<16x128xf32>
    %150 = math.absf %144 : vector<16x128xf32>
    %cst_57 = arith.constant 0.327591091 : f32
    %151 = vector.broadcast %cst_57 : f32 to vector<16x128xf32>
    %152 = arith.mulf %151, %150 : vector<16x128xf32>
    %cst_58 = arith.constant 1.000000e+00 : f32
    %153 = vector.broadcast %cst_58 : f32 to vector<16x128xf32>
    %154 = arith.addf %153, %152 : vector<16x128xf32>
    %cst_59 = arith.constant 1.000000e+00 : f32
    %155 = vector.broadcast %cst_59 : f32 to vector<16x128xf32>
    %156 = arith.divf %155, %154 : vector<16x128xf32>
    %cst_60 = arith.constant 1.06140542 : f32
    %157 = vector.broadcast %cst_60 : f32 to vector<16x128xf32>
    %158 = arith.mulf %157, %156 : vector<16x128xf32>
    %cst_61 = arith.constant -1.45315206 : f32
    %159 = vector.broadcast %cst_61 : f32 to vector<16x128xf32>
    %160 = arith.addf %158, %159 : vector<16x128xf32>
    %161 = arith.mulf %160, %156 : vector<16x128xf32>
    %cst_62 = arith.constant 1.42141378 : f32
    %162 = vector.broadcast %cst_62 : f32 to vector<16x128xf32>
    %163 = arith.addf %161, %162 : vector<16x128xf32>
    %164 = arith.mulf %163, %156 : vector<16x128xf32>
    %cst_63 = arith.constant -0.284496725 : f32
    %165 = vector.broadcast %cst_63 : f32 to vector<16x128xf32>
    %166 = arith.addf %164, %165 : vector<16x128xf32>
    %167 = arith.mulf %166, %156 : vector<16x128xf32>
    %cst_64 = arith.constant 0.254829586 : f32
    %168 = vector.broadcast %cst_64 : f32 to vector<16x128xf32>
    %169 = arith.addf %167, %168 : vector<16x128xf32>
    %170 = arith.mulf %169, %156 : vector<16x128xf32>
    %cst_65 = arith.constant 0.000000e+00 : f32
    %171 = vector.broadcast %cst_65 : f32 to vector<16x128xf32>
    %172 = arith.subf %171, %150 : vector<16x128xf32>
    %173 = arith.mulf %172, %150 : vector<16x128xf32>
    %174 = math.exp %173 : vector<16x128xf32>
    %175 = arith.mulf %170, %174 : vector<16x128xf32>
    %cst_66 = arith.constant 1.000000e+00 : f32
    %176 = vector.broadcast %cst_66 : f32 to vector<16x128xf32>
    %177 = arith.subf %176, %175 : vector<16x128xf32>
    %178 = arith.mulf %149, %177 : vector<16x128xf32>
    %cst_67 = arith.constant 1.000000e+00 : f32
    %179 = vector.broadcast %cst_67 : f32 to vector<16x128xf32>
    %180 = arith.addf %179, %178 : vector<16x128xf32>
    %181 = arith.mulf %142, %180 : vector<16x128xf32>
    %c0_68 = arith.constant 0 : index
    %c0_69 = arith.constant 0 : index
    %c0_70 = arith.constant 0 : index
    %182 = vector.load %arg11[%c0_68, %c0_69, %c0_70] : memref<4x128x64xf32, #tpu.memory_space<vmem>>, vector<1x128x64xf32>
    %183 = vector.shape_cast %182 : vector<1x128x64xf32> to vector<128x64xf32>
    %cst_71 = arith.constant dense<0.000000e+00> : vector<16x64xf32>
    %184 = tpu.matmul %181, %183, %cst_71 {dimension_numbers = #tpu.dot_dimension_numbers<[1], [0], [0], [1], [0, 0, 1, 1], [], []>} : vector<16x128xf32>, vector<128x64xf32>, vector<16x64xf32> -> vector<16x64xf32>
    %185 = vector.extract_strided_slice %6 {offsets = [5, 0], sizes = [1, 64], strides = [1, 1]} : vector<8x64xf32> to vector<1x64xf32>
    %186 = vector.broadcast %185 : vector<1x64xf32> to vector<16x64xf32>
    %187 = arith.addf %184, %186 : vector<16x64xf32>
    %188 = arith.addf %109, %187 : vector<16x64xf32>
    %c1 = arith.constant 1 : index
    %c0_72 = arith.constant 0 : index
    %c0_73 = arith.constant 0 : index
    %189 = vector.load %arg5[%c1, %c0_72, %c0_73] : memref<4x8x64xf32, #tpu.memory_space<vmem>>, vector<1x8x64xf32>
    %190 = vector.shape_cast %189 : vector<1x8x64xf32> to vector<8x64xf32>
    %191 = vector.extract_strided_slice %190 {offsets = [0, 0], sizes = [1, 64], strides = [1, 1]} : vector<8x64xf32> to vector<1x64xf32>
    %192 = vector.extract_strided_slice %190 {offsets = [1, 0], sizes = [1, 64], strides = [1, 1]} : vector<8x64xf32> to vector<1x64xf32>
    %cst_74 = arith.constant dense<0.000000e+00> : vector<16xf32>
    %193 = vector.multi_reduction <add>, %188, %cst_74 [1] : vector<16x64xf32> to vector<16xf32>
    %194 = vector.shape_cast %193 : vector<16xf32> to vector<16x1xf32>
    %cst_75 = arith.constant 6.400000e+01 : f32
    %195 = vector.broadcast %cst_75 : f32 to vector<16x1xf32>
    %196 = arith.divf %194, %195 : vector<16x1xf32>
    %197 = vector.broadcast %196 : vector<16x1xf32> to vector<16x64xf32>
    %198 = arith.subf %188, %197 : vector<16x64xf32>
    %199 = arith.mulf %198, %198 : vector<16x64xf32>
    %cst_76 = arith.constant dense<0.000000e+00> : vector<16xf32>
    %200 = vector.multi_reduction <add>, %199, %cst_76 [1] : vector<16x64xf32> to vector<16xf32>
    %201 = vector.shape_cast %200 : vector<16xf32> to vector<16x1xf32>
    %cst_77 = arith.constant 6.400000e+01 : f32
    %202 = vector.broadcast %cst_77 : f32 to vector<16x1xf32>
    %203 = arith.divf %201, %202 : vector<16x1xf32>
    %204 = vector.broadcast %196 : vector<16x1xf32> to vector<16x64xf32>
    %205 = arith.subf %188, %204 : vector<16x64xf32>
    %cst_78 = arith.constant 9.99999974E-6 : f32
    %206 = vector.broadcast %cst_78 : f32 to vector<16x1xf32>
    %207 = arith.addf %203, %206 : vector<16x1xf32>
    %208 = math.rsqrt %207 : vector<16x1xf32>
    %209 = vector.broadcast %208 : vector<16x1xf32> to vector<16x64xf32>
    %210 = arith.mulf %205, %209 : vector<16x64xf32>
    %211 = vector.broadcast %191 : vector<1x64xf32> to vector<16x64xf32>
    %212 = arith.mulf %210, %211 : vector<16x64xf32>
    %213 = vector.broadcast %192 : vector<1x64xf32> to vector<16x64xf32>
    %214 = arith.addf %212, %213 : vector<16x64xf32>
    %c1_79 = arith.constant 1 : index
    %c0_80 = arith.constant 0 : index
    %c0_81 = arith.constant 0 : index
    %215 = vector.load %arg6[%c1_79, %c0_80, %c0_81] : memref<4x64x192xf32, #tpu.memory_space<vmem>>, vector<1x64x192xf32>
    %216 = vector.shape_cast %215 : vector<1x64x192xf32> to vector<64x192xf32>
    %cst_82 = arith.constant dense<0.000000e+00> : vector<16x192xf32>
    %217 = tpu.matmul %214, %216, %cst_82 {dimension_numbers = #tpu.dot_dimension_numbers<[1], [0], [0], [1], [0, 0, 1, 1], [], []>} : vector<16x64xf32>, vector<64x192xf32>, vector<16x192xf32> -> vector<16x192xf32>
    %c1_83 = arith.constant 1 : index
    %c0_84 = arith.constant 0 : index
    %c0_85 = arith.constant 0 : index
    %218 = vector.load %arg7[%c1_83, %c0_84, %c0_85] : memref<4x1x192xf32, #tpu.memory_space<vmem>>, vector<1x1x192xf32>
    %219 = vector.shape_cast %218 : vector<1x1x192xf32> to vector<1x192xf32>
    %220 = vector.broadcast %219 : vector<1x192xf32> to vector<16x192xf32>
    %221 = arith.addf %217, %220 : vector<16x192xf32>
    %222 = vector.extract_strided_slice %221 {offsets = [0, 0], sizes = [16, 64], strides = [1, 1]} : vector<16x192xf32> to vector<16x64xf32>
    %223 = vector.extract_strided_slice %221 {offsets = [0, 64], sizes = [16, 64], strides = [1, 1]} : vector<16x192xf32> to vector<16x64xf32>
    %224 = tpu.transpose %223, [1, 0] : vector<16x64xf32> -> vector<64x16xf32>
    %225 = vector.extract_strided_slice %221 {offsets = [0, 128], sizes = [16, 64], strides = [1, 1]} : vector<16x192xf32> to vector<16x64xf32>
    %226 = vector.extract_strided_slice %222 {offsets = [0, 0], sizes = [16, 16], strides = [1, 1]} : vector<16x64xf32> to vector<16x16xf32>
    %227 = vector.extract_strided_slice %224 {offsets = [0, 0], sizes = [16, 16], strides = [1, 1]} : vector<64x16xf32> to vector<16x16xf32>
    %cst_86 = arith.constant dense<0.000000e+00> : vector<16x16xf32>
    %228 = tpu.matmul %226, %227, %cst_86 {dimension_numbers = #tpu.dot_dimension_numbers<[1], [0], [0], [1], [0, 0, 1, 1], [], []>} : vector<16x16xf32>, vector<16x16xf32>, vector<16x16xf32> -> vector<16x16xf32>
    %cst_87 = arith.constant dense<0xFF800000> : vector<16xf32>
    %229 = vector.multi_reduction <maximumf>, %228, %cst_87 [1] : vector<16x16xf32> to vector<16xf32>
    %230 = vector.shape_cast %229 : vector<16xf32> to vector<16x1xf32>
    %231 = vector.broadcast %230 : vector<16x1xf32> to vector<16x16xf32>
    %232 = arith.subf %228, %231 : vector<16x16xf32>
    %233 = math.exp %232 : vector<16x16xf32>
    %cst_88 = arith.constant dense<0.000000e+00> : vector<16xf32>
    %234 = vector.multi_reduction <add>, %233, %cst_88 [1] : vector<16x16xf32> to vector<16xf32>
    %235 = vector.shape_cast %234 : vector<16xf32> to vector<16x1xf32>
    %236 = tpu.reciprocal %235 {approx = true} : vector<16x1xf32> -> vector<16x1xf32>
    %237 = vector.broadcast %236 : vector<16x1xf32> to vector<16x16xf32>
    %238 = arith.mulf %233, %237 : vector<16x16xf32>
    %239 = vector.extract_strided_slice %225 {offsets = [0, 0], sizes = [16, 16], strides = [1, 1]} : vector<16x64xf32> to vector<16x16xf32>
    %cst_89 = arith.constant dense<0.000000e+00> : vector<16x16xf32>
    %240 = tpu.matmul %238, %239, %cst_89 {dimension_numbers = #tpu.dot_dimension_numbers<[1], [0], [0], [1], [0, 0, 1, 1], [], []>} : vector<16x16xf32>, vector<16x16xf32>, vector<16x16xf32> -> vector<16x16xf32>
    %241 = vector.extract_strided_slice %222 {offsets = [0, 16], sizes = [16, 16], strides = [1, 1]} : vector<16x64xf32> to vector<16x16xf32>
    %242 = vector.extract_strided_slice %224 {offsets = [16, 0], sizes = [16, 16], strides = [1, 1]} : vector<64x16xf32> to vector<16x16xf32>
    %cst_90 = arith.constant dense<0.000000e+00> : vector<16x16xf32>
    %243 = tpu.matmul %241, %242, %cst_90 {dimension_numbers = #tpu.dot_dimension_numbers<[1], [0], [0], [1], [0, 0, 1, 1], [], []>} : vector<16x16xf32>, vector<16x16xf32>, vector<16x16xf32> -> vector<16x16xf32>
    %cst_91 = arith.constant dense<0xFF800000> : vector<16xf32>
    %244 = vector.multi_reduction <maximumf>, %243, %cst_91 [1] : vector<16x16xf32> to vector<16xf32>
    %245 = vector.shape_cast %244 : vector<16xf32> to vector<16x1xf32>
    %246 = vector.broadcast %245 : vector<16x1xf32> to vector<16x16xf32>
    %247 = arith.subf %243, %246 : vector<16x16xf32>
    %248 = math.exp %247 : vector<16x16xf32>
    %cst_92 = arith.constant dense<0.000000e+00> : vector<16xf32>
    %249 = vector.multi_reduction <add>, %248, %cst_92 [1] : vector<16x16xf32> to vector<16xf32>
    %250 = vector.shape_cast %249 : vector<16xf32> to vector<16x1xf32>
    %251 = tpu.reciprocal %250 {approx = true} : vector<16x1xf32> -> vector<16x1xf32>
    %252 = vector.broadcast %251 : vector<16x1xf32> to vector<16x16xf32>
    %253 = arith.mulf %248, %252 : vector<16x16xf32>
    %254 = vector.extract_strided_slice %225 {offsets = [0, 16], sizes = [16, 16], strides = [1, 1]} : vector<16x64xf32> to vector<16x16xf32>
    %cst_93 = arith.constant dense<0.000000e+00> : vector<16x16xf32>
    %255 = tpu.matmul %253, %254, %cst_93 {dimension_numbers = #tpu.dot_dimension_numbers<[1], [0], [0], [1], [0, 0, 1, 1], [], []>} : vector<16x16xf32>, vector<16x16xf32>, vector<16x16xf32> -> vector<16x16xf32>
    %256 = vector.extract_strided_slice %222 {offsets = [0, 32], sizes = [16, 16], strides = [1, 1]} : vector<16x64xf32> to vector<16x16xf32>
    %257 = vector.extract_strided_slice %224 {offsets = [32, 0], sizes = [16, 16], strides = [1, 1]} : vector<64x16xf32> to vector<16x16xf32>
    %cst_94 = arith.constant dense<0.000000e+00> : vector<16x16xf32>
    %258 = tpu.matmul %256, %257, %cst_94 {dimension_numbers = #tpu.dot_dimension_numbers<[1], [0], [0], [1], [0, 0, 1, 1], [], []>} : vector<16x16xf32>, vector<16x16xf32>, vector<16x16xf32> -> vector<16x16xf32>
    %cst_95 = arith.constant dense<0xFF800000> : vector<16xf32>
    %259 = vector.multi_reduction <maximumf>, %258, %cst_95 [1] : vector<16x16xf32> to vector<16xf32>
    %260 = vector.shape_cast %259 : vector<16xf32> to vector<16x1xf32>
    %261 = vector.broadcast %260 : vector<16x1xf32> to vector<16x16xf32>
    %262 = arith.subf %258, %261 : vector<16x16xf32>
    %263 = math.exp %262 : vector<16x16xf32>
    %cst_96 = arith.constant dense<0.000000e+00> : vector<16xf32>
    %264 = vector.multi_reduction <add>, %263, %cst_96 [1] : vector<16x16xf32> to vector<16xf32>
    %265 = vector.shape_cast %264 : vector<16xf32> to vector<16x1xf32>
    %266 = tpu.reciprocal %265 {approx = true} : vector<16x1xf32> -> vector<16x1xf32>
    %267 = vector.broadcast %266 : vector<16x1xf32> to vector<16x16xf32>
    %268 = arith.mulf %263, %267 : vector<16x16xf32>
    %269 = vector.extract_strided_slice %225 {offsets = [0, 32], sizes = [16, 16], strides = [1, 1]} : vector<16x64xf32> to vector<16x16xf32>
    %cst_97 = arith.constant dense<0.000000e+00> : vector<16x16xf32>
    %270 = tpu.matmul %268, %269, %cst_97 {dimension_numbers = #tpu.dot_dimension_numbers<[1], [0], [0], [1], [0, 0, 1, 1], [], []>} : vector<16x16xf32>, vector<16x16xf32>, vector<16x16xf32> -> vector<16x16xf32>
    %271 = vector.extract_strided_slice %222 {offsets = [0, 48], sizes = [16, 16], strides = [1, 1]} : vector<16x64xf32> to vector<16x16xf32>
    %272 = vector.extract_strided_slice %224 {offsets = [48, 0], sizes = [16, 16], strides = [1, 1]} : vector<64x16xf32> to vector<16x16xf32>
    %cst_98 = arith.constant dense<0.000000e+00> : vector<16x16xf32>
    %273 = tpu.matmul %271, %272, %cst_98 {dimension_numbers = #tpu.dot_dimension_numbers<[1], [0], [0], [1], [0, 0, 1, 1], [], []>} : vector<16x16xf32>, vector<16x16xf32>, vector<16x16xf32> -> vector<16x16xf32>
    %cst_99 = arith.constant dense<0xFF800000> : vector<16xf32>
    %274 = vector.multi_reduction <maximumf>, %273, %cst_99 [1] : vector<16x16xf32> to vector<16xf32>
    %275 = vector.shape_cast %274 : vector<16xf32> to vector<16x1xf32>
    %276 = vector.broadcast %275 : vector<16x1xf32> to vector<16x16xf32>
    %277 = arith.subf %273, %276 : vector<16x16xf32>
    %278 = math.exp %277 : vector<16x16xf32>
    %cst_100 = arith.constant dense<0.000000e+00> : vector<16xf32>
    %279 = vector.multi_reduction <add>, %278, %cst_100 [1] : vector<16x16xf32> to vector<16xf32>
    %280 = vector.shape_cast %279 : vector<16xf32> to vector<16x1xf32>
    %281 = tpu.reciprocal %280 {approx = true} : vector<16x1xf32> -> vector<16x1xf32>
    %282 = vector.broadcast %281 : vector<16x1xf32> to vector<16x16xf32>
    %283 = arith.mulf %278, %282 : vector<16x16xf32>
    %284 = vector.extract_strided_slice %225 {offsets = [0, 48], sizes = [16, 16], strides = [1, 1]} : vector<16x64xf32> to vector<16x16xf32>
    %cst_101 = arith.constant dense<0.000000e+00> : vector<16x16xf32>
    %285 = tpu.matmul %283, %284, %cst_101 {dimension_numbers = #tpu.dot_dimension_numbers<[1], [0], [0], [1], [0, 0, 1, 1], [], []>} : vector<16x16xf32>, vector<16x16xf32>, vector<16x16xf32> -> vector<16x16xf32>
    %286 = tpu.concatenate %240, %255, %270, %285 in 1 : vector<16x16xf32>, vector<16x16xf32>, vector<16x16xf32>, vector<16x16xf32> -> vector<16x64xf32>
    %c1_102 = arith.constant 1 : index
    %c0_103 = arith.constant 0 : index
    %c0_104 = arith.constant 0 : index
    %287 = vector.load %arg8[%c1_102, %c0_103, %c0_104] : memref<4x64x64xf32, #tpu.memory_space<vmem>>, vector<1x64x64xf32>
    %288 = vector.shape_cast %287 : vector<1x64x64xf32> to vector<64x64xf32>
    %cst_105 = arith.constant dense<0.000000e+00> : vector<16x64xf32>
    %289 = tpu.matmul %286, %288, %cst_105 {dimension_numbers = #tpu.dot_dimension_numbers<[1], [0], [0], [1], [0, 0, 1, 1], [], []>} : vector<16x64xf32>, vector<64x64xf32>, vector<16x64xf32> -> vector<16x64xf32>
    %290 = arith.addf %188, %289 : vector<16x64xf32>
    %291 = vector.extract_strided_slice %190 {offsets = [4, 0], sizes = [1, 64], strides = [1, 1]} : vector<8x64xf32> to vector<1x64xf32>
    %292 = vector.broadcast %291 : vector<1x64xf32> to vector<16x64xf32>
    %293 = arith.addf %290, %292 : vector<16x64xf32>
    %294 = vector.extract_strided_slice %190 {offsets = [2, 0], sizes = [1, 64], strides = [1, 1]} : vector<8x64xf32> to vector<1x64xf32>
    %295 = vector.extract_strided_slice %190 {offsets = [3, 0], sizes = [1, 64], strides = [1, 1]} : vector<8x64xf32> to vector<1x64xf32>
    %cst_106 = arith.constant dense<0.000000e+00> : vector<16xf32>
    %296 = vector.multi_reduction <add>, %293, %cst_106 [1] : vector<16x64xf32> to vector<16xf32>
    %297 = vector.shape_cast %296 : vector<16xf32> to vector<16x1xf32>
    %cst_107 = arith.constant 6.400000e+01 : f32
    %298 = vector.broadcast %cst_107 : f32 to vector<16x1xf32>
    %299 = arith.divf %297, %298 : vector<16x1xf32>
    %300 = vector.broadcast %299 : vector<16x1xf32> to vector<16x64xf32>
    %301 = arith.subf %293, %300 : vector<16x64xf32>
    %302 = arith.mulf %301, %301 : vector<16x64xf32>
    %cst_108 = arith.constant dense<0.000000e+00> : vector<16xf32>
    %303 = vector.multi_reduction <add>, %302, %cst_108 [1] : vector<16x64xf32> to vector<16xf32>
    %304 = vector.shape_cast %303 : vector<16xf32> to vector<16x1xf32>
    %cst_109 = arith.constant 6.400000e+01 : f32
    %305 = vector.broadcast %cst_109 : f32 to vector<16x1xf32>
    %306 = arith.divf %304, %305 : vector<16x1xf32>
    %307 = vector.broadcast %299 : vector<16x1xf32> to vector<16x64xf32>
    %308 = arith.subf %293, %307 : vector<16x64xf32>
    %cst_110 = arith.constant 9.99999974E-6 : f32
    %309 = vector.broadcast %cst_110 : f32 to vector<16x1xf32>
    %310 = arith.addf %306, %309 : vector<16x1xf32>
    %311 = math.rsqrt %310 : vector<16x1xf32>
    %312 = vector.broadcast %311 : vector<16x1xf32> to vector<16x64xf32>
    %313 = arith.mulf %308, %312 : vector<16x64xf32>
    %314 = vector.broadcast %294 : vector<1x64xf32> to vector<16x64xf32>
    %315 = arith.mulf %313, %314 : vector<16x64xf32>
    %316 = vector.broadcast %295 : vector<1x64xf32> to vector<16x64xf32>
    %317 = arith.addf %315, %316 : vector<16x64xf32>
    %c1_111 = arith.constant 1 : index
    %c0_112 = arith.constant 0 : index
    %c0_113 = arith.constant 0 : index
    %318 = vector.load %arg9[%c1_111, %c0_112, %c0_113] : memref<4x64x128xf32, #tpu.memory_space<vmem>>, vector<1x64x128xf32>
    %319 = vector.shape_cast %318 : vector<1x64x128xf32> to vector<64x128xf32>
    %cst_114 = arith.constant dense<0.000000e+00> : vector<16x128xf32>
    %320 = tpu.matmul %317, %319, %cst_114 {dimension_numbers = #tpu.dot_dimension_numbers<[1], [0], [0], [1], [0, 0, 1, 1], [], []>} : vector<16x64xf32>, vector<64x128xf32>, vector<16x128xf32> -> vector<16x128xf32>
    %c1_115 = arith.constant 1 : index
    %c0_116 = arith.constant 0 : index
    %c0_117 = arith.constant 0 : index
    %321 = vector.load %arg10[%c1_115, %c0_116, %c0_117] : memref<4x1x128xf32, #tpu.memory_space<vmem>>, vector<1x1x128xf32>
    %322 = vector.shape_cast %321 : vector<1x1x128xf32> to vector<1x128xf32>
    %323 = vector.broadcast %322 : vector<1x128xf32> to vector<16x128xf32>
    %324 = arith.addf %320, %323 : vector<16x128xf32>
    %cst_118 = arith.constant 5.000000e-01 : f32
    %325 = vector.broadcast %cst_118 : f32 to vector<16x128xf32>
    %326 = arith.mulf %325, %324 : vector<16x128xf32>
    %cst_119 = arith.constant 0.707106769 : f32
    %327 = vector.broadcast %cst_119 : f32 to vector<16x128xf32>
    %328 = arith.mulf %324, %327 : vector<16x128xf32>
    %cst_120 = arith.constant 0.000000e+00 : f32
    %329 = vector.broadcast %cst_120 : f32 to vector<16x128xf32>
    %330 = arith.cmpf oge, %328, %329 : vector<16x128xf32>
    %cst_121 = arith.constant 1.000000e+00 : f32
    %cst_122 = arith.constant -1.000000e+00 : f32
    %331 = vector.broadcast %cst_121 : f32 to vector<16x128xf32>
    %332 = vector.broadcast %cst_122 : f32 to vector<16x128xf32>
    %333 = arith.select %330, %331, %332 : vector<16x128xi1>, vector<16x128xf32>
    %334 = math.absf %328 : vector<16x128xf32>
    %cst_123 = arith.constant 0.327591091 : f32
    %335 = vector.broadcast %cst_123 : f32 to vector<16x128xf32>
    %336 = arith.mulf %335, %334 : vector<16x128xf32>
    %cst_124 = arith.constant 1.000000e+00 : f32
    %337 = vector.broadcast %cst_124 : f32 to vector<16x128xf32>
    %338 = arith.addf %337, %336 : vector<16x128xf32>
    %cst_125 = arith.constant 1.000000e+00 : f32
    %339 = vector.broadcast %cst_125 : f32 to vector<16x128xf32>
    %340 = arith.divf %339, %338 : vector<16x128xf32>
    %cst_126 = arith.constant 1.06140542 : f32
    %341 = vector.broadcast %cst_126 : f32 to vector<16x128xf32>
    %342 = arith.mulf %341, %340 : vector<16x128xf32>
    %cst_127 = arith.constant -1.45315206 : f32
    %343 = vector.broadcast %cst_127 : f32 to vector<16x128xf32>
    %344 = arith.addf %342, %343 : vector<16x128xf32>
    %345 = arith.mulf %344, %340 : vector<16x128xf32>
    %cst_128 = arith.constant 1.42141378 : f32
    %346 = vector.broadcast %cst_128 : f32 to vector<16x128xf32>
    %347 = arith.addf %345, %346 : vector<16x128xf32>
    %348 = arith.mulf %347, %340 : vector<16x128xf32>
    %cst_129 = arith.constant -0.284496725 : f32
    %349 = vector.broadcast %cst_129 : f32 to vector<16x128xf32>
    %350 = arith.addf %348, %349 : vector<16x128xf32>
    %351 = arith.mulf %350, %340 : vector<16x128xf32>
    %cst_130 = arith.constant 0.254829586 : f32
    %352 = vector.broadcast %cst_130 : f32 to vector<16x128xf32>
    %353 = arith.addf %351, %352 : vector<16x128xf32>
    %354 = arith.mulf %353, %340 : vector<16x128xf32>
    %cst_131 = arith.constant 0.000000e+00 : f32
    %355 = vector.broadcast %cst_131 : f32 to vector<16x128xf32>
    %356 = arith.subf %355, %334 : vector<16x128xf32>
    %357 = arith.mulf %356, %334 : vector<16x128xf32>
    %358 = math.exp %357 : vector<16x128xf32>
    %359 = arith.mulf %354, %358 : vector<16x128xf32>
    %cst_132 = arith.constant 1.000000e+00 : f32
    %360 = vector.broadcast %cst_132 : f32 to vector<16x128xf32>
    %361 = arith.subf %360, %359 : vector<16x128xf32>
    %362 = arith.mulf %333, %361 : vector<16x128xf32>
    %cst_133 = arith.constant 1.000000e+00 : f32
    %363 = vector.broadcast %cst_133 : f32 to vector<16x128xf32>
    %364 = arith.addf %363, %362 : vector<16x128xf32>
    %365 = arith.mulf %326, %364 : vector<16x128xf32>
    %c1_134 = arith.constant 1 : index
    %c0_135 = arith.constant 0 : index
    %c0_136 = arith.constant 0 : index
    %366 = vector.load %arg11[%c1_134, %c0_135, %c0_136] : memref<4x128x64xf32, #tpu.memory_space<vmem>>, vector<1x128x64xf32>
    %367 = vector.shape_cast %366 : vector<1x128x64xf32> to vector<128x64xf32>
    %cst_137 = arith.constant dense<0.000000e+00> : vector<16x64xf32>
    %368 = tpu.matmul %365, %367, %cst_137 {dimension_numbers = #tpu.dot_dimension_numbers<[1], [0], [0], [1], [0, 0, 1, 1], [], []>} : vector<16x128xf32>, vector<128x64xf32>, vector<16x64xf32> -> vector<16x64xf32>
    %369 = vector.extract_strided_slice %190 {offsets = [5, 0], sizes = [1, 64], strides = [1, 1]} : vector<8x64xf32> to vector<1x64xf32>
    %370 = vector.broadcast %369 : vector<1x64xf32> to vector<16x64xf32>
    %371 = arith.addf %368, %370 : vector<16x64xf32>
    %372 = arith.addf %293, %371 : vector<16x64xf32>
    %c0_138 = arith.constant 0 : index
    %c0_139 = arith.constant 0 : index
    %373 = vector.load %arg12[%c0_138, %c0_139] : memref<8x64xf32, #tpu.memory_space<vmem>>, vector<8x64xf32>
    %374 = vector.extract_strided_slice %373 {offsets = [0, 0], sizes = [1, 64], strides = [1, 1]} : vector<8x64xf32> to vector<1x64xf32>
    %375 = vector.extract_strided_slice %373 {offsets = [1, 0], sizes = [1, 64], strides = [1, 1]} : vector<8x64xf32> to vector<1x64xf32>
    %cst_140 = arith.constant dense<0.000000e+00> : vector<16xf32>
    %376 = vector.multi_reduction <add>, %372, %cst_140 [1] : vector<16x64xf32> to vector<16xf32>
    %377 = vector.shape_cast %376 : vector<16xf32> to vector<16x1xf32>
    %cst_141 = arith.constant 6.400000e+01 : f32
    %378 = vector.broadcast %cst_141 : f32 to vector<16x1xf32>
    %379 = arith.divf %377, %378 : vector<16x1xf32>
    %380 = vector.broadcast %379 : vector<16x1xf32> to vector<16x64xf32>
    %381 = arith.subf %372, %380 : vector<16x64xf32>
    %382 = arith.mulf %381, %381 : vector<16x64xf32>
    %cst_142 = arith.constant dense<0.000000e+00> : vector<16xf32>
    %383 = vector.multi_reduction <add>, %382, %cst_142 [1] : vector<16x64xf32> to vector<16xf32>
    %384 = vector.shape_cast %383 : vector<16xf32> to vector<16x1xf32>
    %cst_143 = arith.constant 6.400000e+01 : f32
    %385 = vector.broadcast %cst_143 : f32 to vector<16x1xf32>
    %386 = arith.divf %384, %385 : vector<16x1xf32>
    %387 = vector.broadcast %379 : vector<16x1xf32> to vector<16x64xf32>
    %388 = arith.subf %372, %387 : vector<16x64xf32>
    %cst_144 = arith.constant 9.99999974E-6 : f32
    %389 = vector.broadcast %cst_144 : f32 to vector<16x1xf32>
    %390 = arith.addf %386, %389 : vector<16x1xf32>
    %391 = math.rsqrt %390 : vector<16x1xf32>
    %392 = vector.broadcast %391 : vector<16x1xf32> to vector<16x64xf32>
    %393 = arith.mulf %388, %392 : vector<16x64xf32>
    %394 = vector.broadcast %374 : vector<1x64xf32> to vector<16x64xf32>
    %395 = arith.mulf %393, %394 : vector<16x64xf32>
    %396 = vector.broadcast %375 : vector<1x64xf32> to vector<16x64xf32>
    %397 = arith.addf %395, %396 : vector<16x64xf32>
    %cst_145 = arith.constant dense<0.000000e+00> : vector<64xf32>
    %398 = vector.multi_reduction <add>, %397, %cst_145 [0] : vector<16x64xf32> to vector<64xf32>
    %399 = vector.shape_cast %398 : vector<64xf32> to vector<1x64xf32>
    %cst_146 = arith.constant 1.600000e+01 : f32
    %400 = vector.broadcast %cst_146 : f32 to vector<1x64xf32>
    %401 = arith.divf %399, %400 : vector<1x64xf32>
    %c0_147 = arith.constant 0 : index
    %c0_148 = arith.constant 0 : index
    %402 = vector.load %arg13[%c0_147, %c0_148] : memref<192x32xf32, #tpu.memory_space<vmem>>, vector<64x32xf32>
    %cst_149 = arith.constant dense<0.000000e+00> : vector<1x32xf32>
    %403 = tpu.matmul %401, %402, %cst_149 {dimension_numbers = #tpu.dot_dimension_numbers<[1], [0], [0], [1], [0, 0, 1, 1], [], []>} : vector<1x64xf32>, vector<64x32xf32>, vector<1x32xf32> -> vector<1x32xf32>
    %c0_150 = arith.constant 0 : index
    %c0_151 = arith.constant 0 : index
    %404 = vector.load %arg14[%c0_150, %c0_151] : memref<2x32xf32, #tpu.memory_space<vmem>>, vector<1x32xf32>
    %405 = arith.addf %403, %404 : vector<1x32xf32>
    %cst_152 = arith.constant 0.000000e+00 : f32
    %406 = vector.broadcast %cst_152 : f32 to vector<1x32xf32>
    %407 = arith.maximumf %405, %406 : vector<1x32xf32>
    %c0_153 = arith.constant 0 : index
    %c0_154 = arith.constant 0 : index
    %408 = vector.load %arg15[%c0_153, %c0_154] : memref<32x256xf32, #tpu.memory_space<vmem>>, vector<32x256xf32>
    %cst_155 = arith.constant dense<0.000000e+00> : vector<1x256xf32>
    %409 = tpu.matmul %407, %408, %cst_155 {dimension_numbers = #tpu.dot_dimension_numbers<[1], [0], [0], [1], [0, 0, 1, 1], [], []>} : vector<1x32xf32>, vector<32x256xf32>, vector<1x256xf32> -> vector<1x256xf32>
    %c0_156 = arith.constant 0 : index
    %c0_157 = arith.constant 0 : index
    %410 = vector.load %arg16[%c0_156, %c0_157] : memref<1x256xf32, #tpu.memory_space<vmem>>, vector<1x256xf32>
    %411 = arith.addf %409, %410 : vector<1x256xf32>
    %c0_158 = arith.constant 0 : index
    %c0_159 = arith.constant 0 : index
    %c0_160 = arith.constant 0 : index
    %412 = vector.load %arg22[%c0_158, %c0_159, %c0_160] : memref<1x1x256xf32, #tpu.memory_space<vmem>>, vector<1x1x256xf32>
    %413 = vector.shape_cast %412 : vector<1x1x256xf32> to vector<1x256xf32>
    %414 = vector.shape_cast %411 : vector<1x256xf32> to vector<1x1x256xf32>
    tpu.vector_store %arg22[%c0_158, %c0_159, %c0_160], %414 {strides = array<i32>} : memref<1x1x256xf32, #tpu.memory_space<vmem>>, vector<1x1x256xf32>,
    %415 = vector.extract_strided_slice %411 {offsets = [0, 0], sizes = [1, 128], strides = [1, 1]} : vector<1x256xf32> to vector<1x128xf32>
    %416 = vector.extract_strided_slice %411 {offsets = [0, 128], sizes = [1, 128], strides = [1, 1]} : vector<1x256xf32> to vector<1x128xf32>
    %c0_161 = arith.constant 0 : index
    %c0_162 = arith.constant 0 : index
    %c0_163 = arith.constant 0 : index
    %417 = vector.load %arg2[%c0_161, %c0_162, %c0_163] : memref<1x1x128xf32, #tpu.memory_space<vmem>>, vector<1x1x128xf32>
    %418 = vector.shape_cast %417 : vector<1x1x128xf32> to vector<1x128xf32>
    %cst_164 = arith.constant 5.000000e-01 : f32
    %419 = vector.broadcast %cst_164 : f32 to vector<1x128xf32>
    %420 = arith.mulf %419, %416 : vector<1x128xf32>
    %421 = math.exp %420 : vector<1x128xf32>
    %422 = arith.mulf %418, %421 : vector<1x128xf32>
    %423 = arith.addf %415, %422 : vector<1x128xf32>
    %c64 = arith.constant 64 : index
    %c0_165 = arith.constant 0 : index
    %424 = vector.load %arg13[%c64, %c0_165] : memref<192x32xf32, #tpu.memory_space<vmem>>, vector<128x32xf32>
    %cst_166 = arith.constant dense<0.000000e+00> : vector<1x32xf32>
    %425 = tpu.matmul %423, %424, %cst_166 {dimension_numbers = #tpu.dot_dimension_numbers<[1], [0], [0], [1], [0, 0, 1, 1], [], []>} : vector<1x128xf32>, vector<128x32xf32>, vector<1x32xf32> -> vector<1x32xf32>
    %c1_167 = arith.constant 1 : index
    %c0_168 = arith.constant 0 : index
    %426 = vector.load %arg14[%c1_167, %c0_168] : memref<2x32xf32, #tpu.memory_space<vmem>>, vector<1x32xf32>
    %427 = arith.addf %425, %426 : vector<1x32xf32>
    %cst_169 = arith.constant 0.000000e+00 : f32
    %428 = vector.broadcast %cst_169 : f32 to vector<1x32xf32>
    %429 = arith.maximumf %427, %428 : vector<1x32xf32>
    %c0_170 = arith.constant 0 : index
    %c0_171 = arith.constant 0 : index
    %430 = vector.load %arg17[%c0_170, %c0_171] : memref<32x64xf32, #tpu.memory_space<vmem>>, vector<32x64xf32>
    %cst_172 = arith.constant dense<0.000000e+00> : vector<1x64xf32>
    %431 = tpu.matmul %429, %430, %cst_172 {dimension_numbers = #tpu.dot_dimension_numbers<[1], [0], [0], [1], [0, 0, 1, 1], [], []>} : vector<1x32xf32>, vector<32x64xf32>, vector<1x64xf32> -> vector<1x64xf32>
    %432 = vector.extract_strided_slice %373 {offsets = [4, 0], sizes = [1, 64], strides = [1, 1]} : vector<8x64xf32> to vector<1x64xf32>
    %433 = arith.addf %431, %432 : vector<1x64xf32>
    %cst_173 = arith.constant 0.000000e+00 : f32
    %434 = vector.broadcast %cst_173 : f32 to vector<1x64xf32>
    %435 = arith.maximumf %433, %434 : vector<1x64xf32>
    %c0_174 = arith.constant 0 : index
    %c0_175 = arith.constant 0 : index
    %436 = vector.load %arg18[%c0_174, %c0_175] : memref<16x64xf32, #tpu.memory_space<vmem>>, vector<16x64xf32>
    %437 = vector.broadcast %435 : vector<1x64xf32> to vector<16x64xf32>
    %438 = arith.addf %437, %436 : vector<16x64xf32>
    %c2 = arith.constant 2 : index
    %c0_176 = arith.constant 0 : index
    %c0_177 = arith.constant 0 : index
    %439 = vector.load %arg5[%c2, %c0_176, %c0_177] : memref<4x8x64xf32, #tpu.memory_space<vmem>>, vector<1x8x64xf32>
    %440 = vector.shape_cast %439 : vector<1x8x64xf32> to vector<8x64xf32>
    %441 = vector.extract_strided_slice %440 {offsets = [0, 0], sizes = [1, 64], strides = [1, 1]} : vector<8x64xf32> to vector<1x64xf32>
    %442 = vector.extract_strided_slice %440 {offsets = [1, 0], sizes = [1, 64], strides = [1, 1]} : vector<8x64xf32> to vector<1x64xf32>
    %cst_178 = arith.constant dense<0.000000e+00> : vector<16xf32>
    %443 = vector.multi_reduction <add>, %438, %cst_178 [1] : vector<16x64xf32> to vector<16xf32>
    %444 = vector.shape_cast %443 : vector<16xf32> to vector<16x1xf32>
    %cst_179 = arith.constant 6.400000e+01 : f32
    %445 = vector.broadcast %cst_179 : f32 to vector<16x1xf32>
    %446 = arith.divf %444, %445 : vector<16x1xf32>
    %447 = vector.broadcast %446 : vector<16x1xf32> to vector<16x64xf32>
    %448 = arith.subf %438, %447 : vector<16x64xf32>
    %449 = arith.mulf %448, %448 : vector<16x64xf32>
    %cst_180 = arith.constant dense<0.000000e+00> : vector<16xf32>
    %450 = vector.multi_reduction <add>, %449, %cst_180 [1] : vector<16x64xf32> to vector<16xf32>
    %451 = vector.shape_cast %450 : vector<16xf32> to vector<16x1xf32>
    %cst_181 = arith.constant 6.400000e+01 : f32
    %452 = vector.broadcast %cst_181 : f32 to vector<16x1xf32>
    %453 = arith.divf %451, %452 : vector<16x1xf32>
    %454 = vector.broadcast %446 : vector<16x1xf32> to vector<16x64xf32>
    %455 = arith.subf %438, %454 : vector<16x64xf32>
    %cst_182 = arith.constant 9.99999974E-6 : f32
    %456 = vector.broadcast %cst_182 : f32 to vector<16x1xf32>
    %457 = arith.addf %453, %456 : vector<16x1xf32>
    %458 = math.rsqrt %457 : vector<16x1xf32>
    %459 = vector.broadcast %458 : vector<16x1xf32> to vector<16x64xf32>
    %460 = arith.mulf %455, %459 : vector<16x64xf32>
    %461 = vector.broadcast %441 : vector<1x64xf32> to vector<16x64xf32>
    %462 = arith.mulf %460, %461 : vector<16x64xf32>
    %463 = vector.broadcast %442 : vector<1x64xf32> to vector<16x64xf32>
    %464 = arith.addf %462, %463 : vector<16x64xf32>
    %c2_183 = arith.constant 2 : index
    %c0_184 = arith.constant 0 : index
    %c0_185 = arith.constant 0 : index
    %465 = vector.load %arg6[%c2_183, %c0_184, %c0_185] : memref<4x64x192xf32, #tpu.memory_space<vmem>>, vector<1x64x192xf32>
    %466 = vector.shape_cast %465 : vector<1x64x192xf32> to vector<64x192xf32>
    %cst_186 = arith.constant dense<0.000000e+00> : vector<16x192xf32>
    %467 = tpu.matmul %464, %466, %cst_186 {dimension_numbers = #tpu.dot_dimension_numbers<[1], [0], [0], [1], [0, 0, 1, 1], [], []>} : vector<16x64xf32>, vector<64x192xf32>, vector<16x192xf32> -> vector<16x192xf32>
    %c2_187 = arith.constant 2 : index
    %c0_188 = arith.constant 0 : index
    %c0_189 = arith.constant 0 : index
    %468 = vector.load %arg7[%c2_187, %c0_188, %c0_189] : memref<4x1x192xf32, #tpu.memory_space<vmem>>, vector<1x1x192xf32>
    %469 = vector.shape_cast %468 : vector<1x1x192xf32> to vector<1x192xf32>
    %470 = vector.broadcast %469 : vector<1x192xf32> to vector<16x192xf32>
    %471 = arith.addf %467, %470 : vector<16x192xf32>
    %472 = vector.extract_strided_slice %471 {offsets = [0, 0], sizes = [16, 64], strides = [1, 1]} : vector<16x192xf32> to vector<16x64xf32>
    %473 = vector.extract_strided_slice %471 {offsets = [0, 64], sizes = [16, 64], strides = [1, 1]} : vector<16x192xf32> to vector<16x64xf32>
    %474 = tpu.transpose %473, [1, 0] : vector<16x64xf32> -> vector<64x16xf32>
    %475 = vector.extract_strided_slice %471 {offsets = [0, 128], sizes = [16, 64], strides = [1, 1]} : vector<16x192xf32> to vector<16x64xf32>
    %476 = vector.extract_strided_slice %472 {offsets = [0, 0], sizes = [16, 16], strides = [1, 1]} : vector<16x64xf32> to vector<16x16xf32>
    %477 = vector.extract_strided_slice %474 {offsets = [0, 0], sizes = [16, 16], strides = [1, 1]} : vector<64x16xf32> to vector<16x16xf32>
    %cst_190 = arith.constant dense<0.000000e+00> : vector<16x16xf32>
    %478 = tpu.matmul %476, %477, %cst_190 {dimension_numbers = #tpu.dot_dimension_numbers<[1], [0], [0], [1], [0, 0, 1, 1], [], []>} : vector<16x16xf32>, vector<16x16xf32>, vector<16x16xf32> -> vector<16x16xf32>
    %cst_191 = arith.constant dense<0xFF800000> : vector<16xf32>
    %479 = vector.multi_reduction <maximumf>, %478, %cst_191 [1] : vector<16x16xf32> to vector<16xf32>
    %480 = vector.shape_cast %479 : vector<16xf32> to vector<16x1xf32>
    %481 = vector.broadcast %480 : vector<16x1xf32> to vector<16x16xf32>
    %482 = arith.subf %478, %481 : vector<16x16xf32>
    %483 = math.exp %482 : vector<16x16xf32>
    %cst_192 = arith.constant dense<0.000000e+00> : vector<16xf32>
    %484 = vector.multi_reduction <add>, %483, %cst_192 [1] : vector<16x16xf32> to vector<16xf32>
    %485 = vector.shape_cast %484 : vector<16xf32> to vector<16x1xf32>
    %486 = tpu.reciprocal %485 {approx = true} : vector<16x1xf32> -> vector<16x1xf32>
    %487 = vector.broadcast %486 : vector<16x1xf32> to vector<16x16xf32>
    %488 = arith.mulf %483, %487 : vector<16x16xf32>
    %489 = vector.extract_strided_slice %475 {offsets = [0, 0], sizes = [16, 16], strides = [1, 1]} : vector<16x64xf32> to vector<16x16xf32>
    %cst_193 = arith.constant dense<0.000000e+00> : vector<16x16xf32>
    %490 = tpu.matmul %488, %489, %cst_193 {dimension_numbers = #tpu.dot_dimension_numbers<[1], [0], [0], [1], [0, 0, 1, 1], [], []>} : vector<16x16xf32>, vector<16x16xf32>, vector<16x16xf32> -> vector<16x16xf32>
    %491 = vector.extract_strided_slice %472 {offsets = [0, 16], sizes = [16, 16], strides = [1, 1]} : vector<16x64xf32> to vector<16x16xf32>
    %492 = vector.extract_strided_slice %474 {offsets = [16, 0], sizes = [16, 16], strides = [1, 1]} : vector<64x16xf32> to vector<16x16xf32>
    %cst_194 = arith.constant dense<0.000000e+00> : vector<16x16xf32>
    %493 = tpu.matmul %491, %492, %cst_194 {dimension_numbers = #tpu.dot_dimension_numbers<[1], [0], [0], [1], [0, 0, 1, 1], [], []>} : vector<16x16xf32>, vector<16x16xf32>, vector<16x16xf32> -> vector<16x16xf32>
    %cst_195 = arith.constant dense<0xFF800000> : vector<16xf32>
    %494 = vector.multi_reduction <maximumf>, %493, %cst_195 [1] : vector<16x16xf32> to vector<16xf32>
    %495 = vector.shape_cast %494 : vector<16xf32> to vector<16x1xf32>
    %496 = vector.broadcast %495 : vector<16x1xf32> to vector<16x16xf32>
    %497 = arith.subf %493, %496 : vector<16x16xf32>
    %498 = math.exp %497 : vector<16x16xf32>
    %cst_196 = arith.constant dense<0.000000e+00> : vector<16xf32>
    %499 = vector.multi_reduction <add>, %498, %cst_196 [1] : vector<16x16xf32> to vector<16xf32>
    %500 = vector.shape_cast %499 : vector<16xf32> to vector<16x1xf32>
    %501 = tpu.reciprocal %500 {approx = true} : vector<16x1xf32> -> vector<16x1xf32>
    %502 = vector.broadcast %501 : vector<16x1xf32> to vector<16x16xf32>
    %503 = arith.mulf %498, %502 : vector<16x16xf32>
    %504 = vector.extract_strided_slice %475 {offsets = [0, 16], sizes = [16, 16], strides = [1, 1]} : vector<16x64xf32> to vector<16x16xf32>
    %cst_197 = arith.constant dense<0.000000e+00> : vector<16x16xf32>
    %505 = tpu.matmul %503, %504, %cst_197 {dimension_numbers = #tpu.dot_dimension_numbers<[1], [0], [0], [1], [0, 0, 1, 1], [], []>} : vector<16x16xf32>, vector<16x16xf32>, vector<16x16xf32> -> vector<16x16xf32>
    %506 = vector.extract_strided_slice %472 {offsets = [0, 32], sizes = [16, 16], strides = [1, 1]} : vector<16x64xf32> to vector<16x16xf32>
    %507 = vector.extract_strided_slice %474 {offsets = [32, 0], sizes = [16, 16], strides = [1, 1]} : vector<64x16xf32> to vector<16x16xf32>
    %cst_198 = arith.constant dense<0.000000e+00> : vector<16x16xf32>
    %508 = tpu.matmul %506, %507, %cst_198 {dimension_numbers = #tpu.dot_dimension_numbers<[1], [0], [0], [1], [0, 0, 1, 1], [], []>} : vector<16x16xf32>, vector<16x16xf32>, vector<16x16xf32> -> vector<16x16xf32>
    %cst_199 = arith.constant dense<0xFF800000> : vector<16xf32>
    %509 = vector.multi_reduction <maximumf>, %508, %cst_199 [1] : vector<16x16xf32> to vector<16xf32>
    %510 = vector.shape_cast %509 : vector<16xf32> to vector<16x1xf32>
    %511 = vector.broadcast %510 : vector<16x1xf32> to vector<16x16xf32>
    %512 = arith.subf %508, %511 : vector<16x16xf32>
    %513 = math.exp %512 : vector<16x16xf32>
    %cst_200 = arith.constant dense<0.000000e+00> : vector<16xf32>
    %514 = vector.multi_reduction <add>, %513, %cst_200 [1] : vector<16x16xf32> to vector<16xf32>
    %515 = vector.shape_cast %514 : vector<16xf32> to vector<16x1xf32>
    %516 = tpu.reciprocal %515 {approx = true} : vector<16x1xf32> -> vector<16x1xf32>
    %517 = vector.broadcast %516 : vector<16x1xf32> to vector<16x16xf32>
    %518 = arith.mulf %513, %517 : vector<16x16xf32>
    %519 = vector.extract_strided_slice %475 {offsets = [0, 32], sizes = [16, 16], strides = [1, 1]} : vector<16x64xf32> to vector<16x16xf32>
    %cst_201 = arith.constant dense<0.000000e+00> : vector<16x16xf32>
    %520 = tpu.matmul %518, %519, %cst_201 {dimension_numbers = #tpu.dot_dimension_numbers<[1], [0], [0], [1], [0, 0, 1, 1], [], []>} : vector<16x16xf32>, vector<16x16xf32>, vector<16x16xf32> -> vector<16x16xf32>
    %521 = vector.extract_strided_slice %472 {offsets = [0, 48], sizes = [16, 16], strides = [1, 1]} : vector<16x64xf32> to vector<16x16xf32>
    %522 = vector.extract_strided_slice %474 {offsets = [48, 0], sizes = [16, 16], strides = [1, 1]} : vector<64x16xf32> to vector<16x16xf32>
    %cst_202 = arith.constant dense<0.000000e+00> : vector<16x16xf32>
    %523 = tpu.matmul %521, %522, %cst_202 {dimension_numbers = #tpu.dot_dimension_numbers<[1], [0], [0], [1], [0, 0, 1, 1], [], []>} : vector<16x16xf32>, vector<16x16xf32>, vector<16x16xf32> -> vector<16x16xf32>
    %cst_203 = arith.constant dense<0xFF800000> : vector<16xf32>
    %524 = vector.multi_reduction <maximumf>, %523, %cst_203 [1] : vector<16x16xf32> to vector<16xf32>
    %525 = vector.shape_cast %524 : vector<16xf32> to vector<16x1xf32>
    %526 = vector.broadcast %525 : vector<16x1xf32> to vector<16x16xf32>
    %527 = arith.subf %523, %526 : vector<16x16xf32>
    %528 = math.exp %527 : vector<16x16xf32>
    %cst_204 = arith.constant dense<0.000000e+00> : vector<16xf32>
    %529 = vector.multi_reduction <add>, %528, %cst_204 [1] : vector<16x16xf32> to vector<16xf32>
    %530 = vector.shape_cast %529 : vector<16xf32> to vector<16x1xf32>
    %531 = tpu.reciprocal %530 {approx = true} : vector<16x1xf32> -> vector<16x1xf32>
    %532 = vector.broadcast %531 : vector<16x1xf32> to vector<16x16xf32>
    %533 = arith.mulf %528, %532 : vector<16x16xf32>
    %534 = vector.extract_strided_slice %475 {offsets = [0, 48], sizes = [16, 16], strides = [1, 1]} : vector<16x64xf32> to vector<16x16xf32>
    %cst_205 = arith.constant dense<0.000000e+00> : vector<16x16xf32>
    %535 = tpu.matmul %533, %534, %cst_205 {dimension_numbers = #tpu.dot_dimension_numbers<[1], [0], [0], [1], [0, 0, 1, 1], [], []>} : vector<16x16xf32>, vector<16x16xf32>, vector<16x16xf32> -> vector<16x16xf32>
    %536 = tpu.concatenate %490, %505, %520, %535 in 1 : vector<16x16xf32>, vector<16x16xf32>, vector<16x16xf32>, vector<16x16xf32> -> vector<16x64xf32>
    %c2_206 = arith.constant 2 : index
    %c0_207 = arith.constant 0 : index
    %c0_208 = arith.constant 0 : index
    %537 = vector.load %arg8[%c2_206, %c0_207, %c0_208] : memref<4x64x64xf32, #tpu.memory_space<vmem>>, vector<1x64x64xf32>
    %538 = vector.shape_cast %537 : vector<1x64x64xf32> to vector<64x64xf32>
    %cst_209 = arith.constant dense<0.000000e+00> : vector<16x64xf32>
    %539 = tpu.matmul %536, %538, %cst_209 {dimension_numbers = #tpu.dot_dimension_numbers<[1], [0], [0], [1], [0, 0, 1, 1], [], []>} : vector<16x64xf32>, vector<64x64xf32>, vector<16x64xf32> -> vector<16x64xf32>
    %540 = arith.addf %438, %539 : vector<16x64xf32>
    %541 = vector.extract_strided_slice %440 {offsets = [4, 0], sizes = [1, 64], strides = [1, 1]} : vector<8x64xf32> to vector<1x64xf32>
    %542 = vector.broadcast %541 : vector<1x64xf32> to vector<16x64xf32>
    %543 = arith.addf %540, %542 : vector<16x64xf32>
    %544 = vector.extract_strided_slice %440 {offsets = [2, 0], sizes = [1, 64], strides = [1, 1]} : vector<8x64xf32> to vector<1x64xf32>
    %545 = vector.extract_strided_slice %440 {offsets = [3, 0], sizes = [1, 64], strides = [1, 1]} : vector<8x64xf32> to vector<1x64xf32>
    %cst_210 = arith.constant dense<0.000000e+00> : vector<16xf32>
    %546 = vector.multi_reduction <add>, %543, %cst_210 [1] : vector<16x64xf32> to vector<16xf32>
    %547 = vector.shape_cast %546 : vector<16xf32> to vector<16x1xf32>
    %cst_211 = arith.constant 6.400000e+01 : f32
    %548 = vector.broadcast %cst_211 : f32 to vector<16x1xf32>
    %549 = arith.divf %547, %548 : vector<16x1xf32>
    %550 = vector.broadcast %549 : vector<16x1xf32> to vector<16x64xf32>
    %551 = arith.subf %543, %550 : vector<16x64xf32>
    %552 = arith.mulf %551, %551 : vector<16x64xf32>
    %cst_212 = arith.constant dense<0.000000e+00> : vector<16xf32>
    %553 = vector.multi_reduction <add>, %552, %cst_212 [1] : vector<16x64xf32> to vector<16xf32>
    %554 = vector.shape_cast %553 : vector<16xf32> to vector<16x1xf32>
    %cst_213 = arith.constant 6.400000e+01 : f32
    %555 = vector.broadcast %cst_213 : f32 to vector<16x1xf32>
    %556 = arith.divf %554, %555 : vector<16x1xf32>
    %557 = vector.broadcast %549 : vector<16x1xf32> to vector<16x64xf32>
    %558 = arith.subf %543, %557 : vector<16x64xf32>
    %cst_214 = arith.constant 9.99999974E-6 : f32
    %559 = vector.broadcast %cst_214 : f32 to vector<16x1xf32>
    %560 = arith.addf %556, %559 : vector<16x1xf32>
    %561 = math.rsqrt %560 : vector<16x1xf32>
    %562 = vector.broadcast %561 : vector<16x1xf32> to vector<16x64xf32>
    %563 = arith.mulf %558, %562 : vector<16x64xf32>
    %564 = vector.broadcast %544 : vector<1x64xf32> to vector<16x64xf32>
    %565 = arith.mulf %563, %564 : vector<16x64xf32>
    %566 = vector.broadcast %545 : vector<1x64xf32> to vector<16x64xf32>
    %567 = arith.addf %565, %566 : vector<16x64xf32>
    %c2_215 = arith.constant 2 : index
    %c0_216 = arith.constant 0 : index
    %c0_217 = arith.constant 0 : index
    %568 = vector.load %arg9[%c2_215, %c0_216, %c0_217] : memref<4x64x128xf32, #tpu.memory_space<vmem>>, vector<1x64x128xf32>
    %569 = vector.shape_cast %568 : vector<1x64x128xf32> to vector<64x128xf32>
    %cst_218 = arith.constant dense<0.000000e+00> : vector<16x128xf32>
    %570 = tpu.matmul %567, %569, %cst_218 {dimension_numbers = #tpu.dot_dimension_numbers<[1], [0], [0], [1], [0, 0, 1, 1], [], []>} : vector<16x64xf32>, vector<64x128xf32>, vector<16x128xf32> -> vector<16x128xf32>
    %c2_219 = arith.constant 2 : index
    %c0_220 = arith.constant 0 : index
    %c0_221 = arith.constant 0 : index
    %571 = vector.load %arg10[%c2_219, %c0_220, %c0_221] : memref<4x1x128xf32, #tpu.memory_space<vmem>>, vector<1x1x128xf32>
    %572 = vector.shape_cast %571 : vector<1x1x128xf32> to vector<1x128xf32>
    %573 = vector.broadcast %572 : vector<1x128xf32> to vector<16x128xf32>
    %574 = arith.addf %570, %573 : vector<16x128xf32>
    %cst_222 = arith.constant 5.000000e-01 : f32
    %575 = vector.broadcast %cst_222 : f32 to vector<16x128xf32>
    %576 = arith.mulf %575, %574 : vector<16x128xf32>
    %cst_223 = arith.constant 0.707106769 : f32
    %577 = vector.broadcast %cst_223 : f32 to vector<16x128xf32>
    %578 = arith.mulf %574, %577 : vector<16x128xf32>
    %cst_224 = arith.constant 0.000000e+00 : f32
    %579 = vector.broadcast %cst_224 : f32 to vector<16x128xf32>
    %580 = arith.cmpf oge, %578, %579 : vector<16x128xf32>
    %cst_225 = arith.constant 1.000000e+00 : f32
    %cst_226 = arith.constant -1.000000e+00 : f32
    %581 = vector.broadcast %cst_225 : f32 to vector<16x128xf32>
    %582 = vector.broadcast %cst_226 : f32 to vector<16x128xf32>
    %583 = arith.select %580, %581, %582 : vector<16x128xi1>, vector<16x128xf32>
    %584 = math.absf %578 : vector<16x128xf32>
    %cst_227 = arith.constant 0.327591091 : f32
    %585 = vector.broadcast %cst_227 : f32 to vector<16x128xf32>
    %586 = arith.mulf %585, %584 : vector<16x128xf32>
    %cst_228 = arith.constant 1.000000e+00 : f32
    %587 = vector.broadcast %cst_228 : f32 to vector<16x128xf32>
    %588 = arith.addf %587, %586 : vector<16x128xf32>
    %cst_229 = arith.constant 1.000000e+00 : f32
    %589 = vector.broadcast %cst_229 : f32 to vector<16x128xf32>
    %590 = arith.divf %589, %588 : vector<16x128xf32>
    %cst_230 = arith.constant 1.06140542 : f32
    %591 = vector.broadcast %cst_230 : f32 to vector<16x128xf32>
    %592 = arith.mulf %591, %590 : vector<16x128xf32>
    %cst_231 = arith.constant -1.45315206 : f32
    %593 = vector.broadcast %cst_231 : f32 to vector<16x128xf32>
    %594 = arith.addf %592, %593 : vector<16x128xf32>
    %595 = arith.mulf %594, %590 : vector<16x128xf32>
    %cst_232 = arith.constant 1.42141378 : f32
    %596 = vector.broadcast %cst_232 : f32 to vector<16x128xf32>
    %597 = arith.addf %595, %596 : vector<16x128xf32>
    %598 = arith.mulf %597, %590 : vector<16x128xf32>
    %cst_233 = arith.constant -0.284496725 : f32
    %599 = vector.broadcast %cst_233 : f32 to vector<16x128xf32>
    %600 = arith.addf %598, %599 : vector<16x128xf32>
    %601 = arith.mulf %600, %590 : vector<16x128xf32>
    %cst_234 = arith.constant 0.254829586 : f32
    %602 = vector.broadcast %cst_234 : f32 to vector<16x128xf32>
    %603 = arith.addf %601, %602 : vector<16x128xf32>
    %604 = arith.mulf %603, %590 : vector<16x128xf32>
    %cst_235 = arith.constant 0.000000e+00 : f32
    %605 = vector.broadcast %cst_235 : f32 to vector<16x128xf32>
    %606 = arith.subf %605, %584 : vector<16x128xf32>
    %607 = arith.mulf %606, %584 : vector<16x128xf32>
    %608 = math.exp %607 : vector<16x128xf32>
    %609 = arith.mulf %604, %608 : vector<16x128xf32>
    %cst_236 = arith.constant 1.000000e+00 : f32
    %610 = vector.broadcast %cst_236 : f32 to vector<16x128xf32>
    %611 = arith.subf %610, %609 : vector<16x128xf32>
    %612 = arith.mulf %583, %611 : vector<16x128xf32>
    %cst_237 = arith.constant 1.000000e+00 : f32
    %613 = vector.broadcast %cst_237 : f32 to vector<16x128xf32>
    %614 = arith.addf %613, %612 : vector<16x128xf32>
    %615 = arith.mulf %576, %614 : vector<16x128xf32>
    %c2_238 = arith.constant 2 : index
    %c0_239 = arith.constant 0 : index
    %c0_240 = arith.constant 0 : index
    %616 = vector.load %arg11[%c2_238, %c0_239, %c0_240] : memref<4x128x64xf32, #tpu.memory_space<vmem>>, vector<1x128x64xf32>
    %617 = vector.shape_cast %616 : vector<1x128x64xf32> to vector<128x64xf32>
    %cst_241 = arith.constant dense<0.000000e+00> : vector<16x64xf32>
    %618 = tpu.matmul %615, %617, %cst_241 {dimension_numbers = #tpu.dot_dimension_numbers<[1], [0], [0], [1], [0, 0, 1, 1], [], []>} : vector<16x128xf32>, vector<128x64xf32>, vector<16x64xf32> -> vector<16x64xf32>
    %619 = vector.extract_strided_slice %440 {offsets = [5, 0], sizes = [1, 64], strides = [1, 1]} : vector<8x64xf32> to vector<1x64xf32>
    %620 = vector.broadcast %619 : vector<1x64xf32> to vector<16x64xf32>
    %621 = arith.addf %618, %620 : vector<16x64xf32>
    %622 = arith.addf %543, %621 : vector<16x64xf32>
    %c3 = arith.constant 3 : index
    %c0_242 = arith.constant 0 : index
    %c0_243 = arith.constant 0 : index
    %623 = vector.load %arg5[%c3, %c0_242, %c0_243] : memref<4x8x64xf32, #tpu.memory_space<vmem>>, vector<1x8x64xf32>
    %624 = vector.shape_cast %623 : vector<1x8x64xf32> to vector<8x64xf32>
    %625 = vector.extract_strided_slice %624 {offsets = [0, 0], sizes = [1, 64], strides = [1, 1]} : vector<8x64xf32> to vector<1x64xf32>
    %626 = vector.extract_strided_slice %624 {offsets = [1, 0], sizes = [1, 64], strides = [1, 1]} : vector<8x64xf32> to vector<1x64xf32>
    %cst_244 = arith.constant dense<0.000000e+00> : vector<16xf32>
    %627 = vector.multi_reduction <add>, %622, %cst_244 [1] : vector<16x64xf32> to vector<16xf32>
    %628 = vector.shape_cast %627 : vector<16xf32> to vector<16x1xf32>
    %cst_245 = arith.constant 6.400000e+01 : f32
    %629 = vector.broadcast %cst_245 : f32 to vector<16x1xf32>
    %630 = arith.divf %628, %629 : vector<16x1xf32>
    %631 = vector.broadcast %630 : vector<16x1xf32> to vector<16x64xf32>
    %632 = arith.subf %622, %631 : vector<16x64xf32>
    %633 = arith.mulf %632, %632 : vector<16x64xf32>
    %cst_246 = arith.constant dense<0.000000e+00> : vector<16xf32>
    %634 = vector.multi_reduction <add>, %633, %cst_246 [1] : vector<16x64xf32> to vector<16xf32>
    %635 = vector.shape_cast %634 : vector<16xf32> to vector<16x1xf32>
    %cst_247 = arith.constant 6.400000e+01 : f32
    %636 = vector.broadcast %cst_247 : f32 to vector<16x1xf32>
    %637 = arith.divf %635, %636 : vector<16x1xf32>
    %638 = vector.broadcast %630 : vector<16x1xf32> to vector<16x64xf32>
    %639 = arith.subf %622, %638 : vector<16x64xf32>
    %cst_248 = arith.constant 9.99999974E-6 : f32
    %640 = vector.broadcast %cst_248 : f32 to vector<16x1xf32>
    %641 = arith.addf %637, %640 : vector<16x1xf32>
    %642 = math.rsqrt %641 : vector<16x1xf32>
    %643 = vector.broadcast %642 : vector<16x1xf32> to vector<16x64xf32>
    %644 = arith.mulf %639, %643 : vector<16x64xf32>
    %645 = vector.broadcast %625 : vector<1x64xf32> to vector<16x64xf32>
    %646 = arith.mulf %644, %645 : vector<16x64xf32>
    %647 = vector.broadcast %626 : vector<1x64xf32> to vector<16x64xf32>
    %648 = arith.addf %646, %647 : vector<16x64xf32>
    %c3_249 = arith.constant 3 : index
    %c0_250 = arith.constant 0 : index
    %c0_251 = arith.constant 0 : index
    %649 = vector.load %arg6[%c3_249, %c0_250, %c0_251] : memref<4x64x192xf32, #tpu.memory_space<vmem>>, vector<1x64x192xf32>
    %650 = vector.shape_cast %649 : vector<1x64x192xf32> to vector<64x192xf32>
    %cst_252 = arith.constant dense<0.000000e+00> : vector<16x192xf32>
    %651 = tpu.matmul %648, %650, %cst_252 {dimension_numbers = #tpu.dot_dimension_numbers<[1], [0], [0], [1], [0, 0, 1, 1], [], []>} : vector<16x64xf32>, vector<64x192xf32>, vector<16x192xf32> -> vector<16x192xf32>
    %c3_253 = arith.constant 3 : index
    %c0_254 = arith.constant 0 : index
    %c0_255 = arith.constant 0 : index
    %652 = vector.load %arg7[%c3_253, %c0_254, %c0_255] : memref<4x1x192xf32, #tpu.memory_space<vmem>>, vector<1x1x192xf32>
    %653 = vector.shape_cast %652 : vector<1x1x192xf32> to vector<1x192xf32>
    %654 = vector.broadcast %653 : vector<1x192xf32> to vector<16x192xf32>
    %655 = arith.addf %651, %654 : vector<16x192xf32>
    %656 = vector.extract_strided_slice %655 {offsets = [0, 0], sizes = [16, 64], strides = [1, 1]} : vector<16x192xf32> to vector<16x64xf32>
    %657 = vector.extract_strided_slice %655 {offsets = [0, 64], sizes = [16, 64], strides = [1, 1]} : vector<16x192xf32> to vector<16x64xf32>
    %658 = tpu.transpose %657, [1, 0] : vector<16x64xf32> -> vector<64x16xf32>
    %659 = vector.extract_strided_slice %655 {offsets = [0, 128], sizes = [16, 64], strides = [1, 1]} : vector<16x192xf32> to vector<16x64xf32>
    %660 = vector.extract_strided_slice %656 {offsets = [0, 0], sizes = [16, 16], strides = [1, 1]} : vector<16x64xf32> to vector<16x16xf32>
    %661 = vector.extract_strided_slice %658 {offsets = [0, 0], sizes = [16, 16], strides = [1, 1]} : vector<64x16xf32> to vector<16x16xf32>
    %cst_256 = arith.constant dense<0.000000e+00> : vector<16x16xf32>
    %662 = tpu.matmul %660, %661, %cst_256 {dimension_numbers = #tpu.dot_dimension_numbers<[1], [0], [0], [1], [0, 0, 1, 1], [], []>} : vector<16x16xf32>, vector<16x16xf32>, vector<16x16xf32> -> vector<16x16xf32>
    %cst_257 = arith.constant dense<0xFF800000> : vector<16xf32>
    %663 = vector.multi_reduction <maximumf>, %662, %cst_257 [1] : vector<16x16xf32> to vector<16xf32>
    %664 = vector.shape_cast %663 : vector<16xf32> to vector<16x1xf32>
    %665 = vector.broadcast %664 : vector<16x1xf32> to vector<16x16xf32>
    %666 = arith.subf %662, %665 : vector<16x16xf32>
    %667 = math.exp %666 : vector<16x16xf32>
    %cst_258 = arith.constant dense<0.000000e+00> : vector<16xf32>
    %668 = vector.multi_reduction <add>, %667, %cst_258 [1] : vector<16x16xf32> to vector<16xf32>
    %669 = vector.shape_cast %668 : vector<16xf32> to vector<16x1xf32>
    %670 = tpu.reciprocal %669 {approx = true} : vector<16x1xf32> -> vector<16x1xf32>
    %671 = vector.broadcast %670 : vector<16x1xf32> to vector<16x16xf32>
    %672 = arith.mulf %667, %671 : vector<16x16xf32>
    %673 = vector.extract_strided_slice %659 {offsets = [0, 0], sizes = [16, 16], strides = [1, 1]} : vector<16x64xf32> to vector<16x16xf32>
    %cst_259 = arith.constant dense<0.000000e+00> : vector<16x16xf32>
    %674 = tpu.matmul %672, %673, %cst_259 {dimension_numbers = #tpu.dot_dimension_numbers<[1], [0], [0], [1], [0, 0, 1, 1], [], []>} : vector<16x16xf32>, vector<16x16xf32>, vector<16x16xf32> -> vector<16x16xf32>
    %675 = vector.extract_strided_slice %656 {offsets = [0, 16], sizes = [16, 16], strides = [1, 1]} : vector<16x64xf32> to vector<16x16xf32>
    %676 = vector.extract_strided_slice %658 {offsets = [16, 0], sizes = [16, 16], strides = [1, 1]} : vector<64x16xf32> to vector<16x16xf32>
    %cst_260 = arith.constant dense<0.000000e+00> : vector<16x16xf32>
    %677 = tpu.matmul %675, %676, %cst_260 {dimension_numbers = #tpu.dot_dimension_numbers<[1], [0], [0], [1], [0, 0, 1, 1], [], []>} : vector<16x16xf32>, vector<16x16xf32>, vector<16x16xf32> -> vector<16x16xf32>
    %cst_261 = arith.constant dense<0xFF800000> : vector<16xf32>
    %678 = vector.multi_reduction <maximumf>, %677, %cst_261 [1] : vector<16x16xf32> to vector<16xf32>
    %679 = vector.shape_cast %678 : vector<16xf32> to vector<16x1xf32>
    %680 = vector.broadcast %679 : vector<16x1xf32> to vector<16x16xf32>
    %681 = arith.subf %677, %680 : vector<16x16xf32>
    %682 = math.exp %681 : vector<16x16xf32>
    %cst_262 = arith.constant dense<0.000000e+00> : vector<16xf32>
    %683 = vector.multi_reduction <add>, %682, %cst_262 [1] : vector<16x16xf32> to vector<16xf32>
    %684 = vector.shape_cast %683 : vector<16xf32> to vector<16x1xf32>
    %685 = tpu.reciprocal %684 {approx = true} : vector<16x1xf32> -> vector<16x1xf32>
    %686 = vector.broadcast %685 : vector<16x1xf32> to vector<16x16xf32>
    %687 = arith.mulf %682, %686 : vector<16x16xf32>
    %688 = vector.extract_strided_slice %659 {offsets = [0, 16], sizes = [16, 16], strides = [1, 1]} : vector<16x64xf32> to vector<16x16xf32>
    %cst_263 = arith.constant dense<0.000000e+00> : vector<16x16xf32>
    %689 = tpu.matmul %687, %688, %cst_263 {dimension_numbers = #tpu.dot_dimension_numbers<[1], [0], [0], [1], [0, 0, 1, 1], [], []>} : vector<16x16xf32>, vector<16x16xf32>, vector<16x16xf32> -> vector<16x16xf32>
    %690 = vector.extract_strided_slice %656 {offsets = [0, 32], sizes = [16, 16], strides = [1, 1]} : vector<16x64xf32> to vector<16x16xf32>
    %691 = vector.extract_strided_slice %658 {offsets = [32, 0], sizes = [16, 16], strides = [1, 1]} : vector<64x16xf32> to vector<16x16xf32>
    %cst_264 = arith.constant dense<0.000000e+00> : vector<16x16xf32>
    %692 = tpu.matmul %690, %691, %cst_264 {dimension_numbers = #tpu.dot_dimension_numbers<[1], [0], [0], [1], [0, 0, 1, 1], [], []>} : vector<16x16xf32>, vector<16x16xf32>, vector<16x16xf32> -> vector<16x16xf32>
    %cst_265 = arith.constant dense<0xFF800000> : vector<16xf32>
    %693 = vector.multi_reduction <maximumf>, %692, %cst_265 [1] : vector<16x16xf32> to vector<16xf32>
    %694 = vector.shape_cast %693 : vector<16xf32> to vector<16x1xf32>
    %695 = vector.broadcast %694 : vector<16x1xf32> to vector<16x16xf32>
    %696 = arith.subf %692, %695 : vector<16x16xf32>
    %697 = math.exp %696 : vector<16x16xf32>
    %cst_266 = arith.constant dense<0.000000e+00> : vector<16xf32>
    %698 = vector.multi_reduction <add>, %697, %cst_266 [1] : vector<16x16xf32> to vector<16xf32>
    %699 = vector.shape_cast %698 : vector<16xf32> to vector<16x1xf32>
    %700 = tpu.reciprocal %699 {approx = true} : vector<16x1xf32> -> vector<16x1xf32>
    %701 = vector.broadcast %700 : vector<16x1xf32> to vector<16x16xf32>
    %702 = arith.mulf %697, %701 : vector<16x16xf32>
    %703 = vector.extract_strided_slice %659 {offsets = [0, 32], sizes = [16, 16], strides = [1, 1]} : vector<16x64xf32> to vector<16x16xf32>
    %cst_267 = arith.constant dense<0.000000e+00> : vector<16x16xf32>
    %704 = tpu.matmul %702, %703, %cst_267 {dimension_numbers = #tpu.dot_dimension_numbers<[1], [0], [0], [1], [0, 0, 1, 1], [], []>} : vector<16x16xf32>, vector<16x16xf32>, vector<16x16xf32> -> vector<16x16xf32>
    %705 = vector.extract_strided_slice %656 {offsets = [0, 48], sizes = [16, 16], strides = [1, 1]} : vector<16x64xf32> to vector<16x16xf32>
    %706 = vector.extract_strided_slice %658 {offsets = [48, 0], sizes = [16, 16], strides = [1, 1]} : vector<64x16xf32> to vector<16x16xf32>
    %cst_268 = arith.constant dense<0.000000e+00> : vector<16x16xf32>
    %707 = tpu.matmul %705, %706, %cst_268 {dimension_numbers = #tpu.dot_dimension_numbers<[1], [0], [0], [1], [0, 0, 1, 1], [], []>} : vector<16x16xf32>, vector<16x16xf32>, vector<16x16xf32> -> vector<16x16xf32>
    %cst_269 = arith.constant dense<0xFF800000> : vector<16xf32>
    %708 = vector.multi_reduction <maximumf>, %707, %cst_269 [1] : vector<16x16xf32> to vector<16xf32>
    %709 = vector.shape_cast %708 : vector<16xf32> to vector<16x1xf32>
    %710 = vector.broadcast %709 : vector<16x1xf32> to vector<16x16xf32>
    %711 = arith.subf %707, %710 : vector<16x16xf32>
    %712 = math.exp %711 : vector<16x16xf32>
    %cst_270 = arith.constant dense<0.000000e+00> : vector<16xf32>
    %713 = vector.multi_reduction <add>, %712, %cst_270 [1] : vector<16x16xf32> to vector<16xf32>
    %714 = vector.shape_cast %713 : vector<16xf32> to vector<16x1xf32>
    %715 = tpu.reciprocal %714 {approx = true} : vector<16x1xf32> -> vector<16x1xf32>
    %716 = vector.broadcast %715 : vector<16x1xf32> to vector<16x16xf32>
    %717 = arith.mulf %712, %716 : vector<16x16xf32>
    %718 = vector.extract_strided_slice %659 {offsets = [0, 48], sizes = [16, 16], strides = [1, 1]} : vector<16x64xf32> to vector<16x16xf32>
    %cst_271 = arith.constant dense<0.000000e+00> : vector<16x16xf32>
    %719 = tpu.matmul %717, %718, %cst_271 {dimension_numbers = #tpu.dot_dimension_numbers<[1], [0], [0], [1], [0, 0, 1, 1], [], []>} : vector<16x16xf32>, vector<16x16xf32>, vector<16x16xf32> -> vector<16x16xf32>
    %720 = tpu.concatenate %674, %689, %704, %719 in 1 : vector<16x16xf32>, vector<16x16xf32>, vector<16x16xf32>, vector<16x16xf32> -> vector<16x64xf32>
    %c3_272 = arith.constant 3 : index
    %c0_273 = arith.constant 0 : index
    %c0_274 = arith.constant 0 : index
    %721 = vector.load %arg8[%c3_272, %c0_273, %c0_274] : memref<4x64x64xf32, #tpu.memory_space<vmem>>, vector<1x64x64xf32>
    %722 = vector.shape_cast %721 : vector<1x64x64xf32> to vector<64x64xf32>
    %cst_275 = arith.constant dense<0.000000e+00> : vector<16x64xf32>
    %723 = tpu.matmul %720, %722, %cst_275 {dimension_numbers = #tpu.dot_dimension_numbers<[1], [0], [0], [1], [0, 0, 1, 1], [], []>} : vector<16x64xf32>, vector<64x64xf32>, vector<16x64xf32> -> vector<16x64xf32>
    %724 = arith.addf %622, %723 : vector<16x64xf32>
    %725 = vector.extract_strided_slice %624 {offsets = [4, 0], sizes = [1, 64], strides = [1, 1]} : vector<8x64xf32> to vector<1x64xf32>
    %726 = vector.broadcast %725 : vector<1x64xf32> to vector<16x64xf32>
    %727 = arith.addf %724, %726 : vector<16x64xf32>
    %728 = vector.extract_strided_slice %624 {offsets = [2, 0], sizes = [1, 64], strides = [1, 1]} : vector<8x64xf32> to vector<1x64xf32>
    %729 = vector.extract_strided_slice %624 {offsets = [3, 0], sizes = [1, 64], strides = [1, 1]} : vector<8x64xf32> to vector<1x64xf32>
    %cst_276 = arith.constant dense<0.000000e+00> : vector<16xf32>
    %730 = vector.multi_reduction <add>, %727, %cst_276 [1] : vector<16x64xf32> to vector<16xf32>
    %731 = vector.shape_cast %730 : vector<16xf32> to vector<16x1xf32>
    %cst_277 = arith.constant 6.400000e+01 : f32
    %732 = vector.broadcast %cst_277 : f32 to vector<16x1xf32>
    %733 = arith.divf %731, %732 : vector<16x1xf32>
    %734 = vector.broadcast %733 : vector<16x1xf32> to vector<16x64xf32>
    %735 = arith.subf %727, %734 : vector<16x64xf32>
    %736 = arith.mulf %735, %735 : vector<16x64xf32>
    %cst_278 = arith.constant dense<0.000000e+00> : vector<16xf32>
    %737 = vector.multi_reduction <add>, %736, %cst_278 [1] : vector<16x64xf32> to vector<16xf32>
    %738 = vector.shape_cast %737 : vector<16xf32> to vector<16x1xf32>
    %cst_279 = arith.constant 6.400000e+01 : f32
    %739 = vector.broadcast %cst_279 : f32 to vector<16x1xf32>
    %740 = arith.divf %738, %739 : vector<16x1xf32>
    %741 = vector.broadcast %733 : vector<16x1xf32> to vector<16x64xf32>
    %742 = arith.subf %727, %741 : vector<16x64xf32>
    %cst_280 = arith.constant 9.99999974E-6 : f32
    %743 = vector.broadcast %cst_280 : f32 to vector<16x1xf32>
    %744 = arith.addf %740, %743 : vector<16x1xf32>
    %745 = math.rsqrt %744 : vector<16x1xf32>
    %746 = vector.broadcast %745 : vector<16x1xf32> to vector<16x64xf32>
    %747 = arith.mulf %742, %746 : vector<16x64xf32>
    %748 = vector.broadcast %728 : vector<1x64xf32> to vector<16x64xf32>
    %749 = arith.mulf %747, %748 : vector<16x64xf32>
    %750 = vector.broadcast %729 : vector<1x64xf32> to vector<16x64xf32>
    %751 = arith.addf %749, %750 : vector<16x64xf32>
    %c3_281 = arith.constant 3 : index
    %c0_282 = arith.constant 0 : index
    %c0_283 = arith.constant 0 : index
    %752 = vector.load %arg9[%c3_281, %c0_282, %c0_283] : memref<4x64x128xf32, #tpu.memory_space<vmem>>, vector<1x64x128xf32>
    %753 = vector.shape_cast %752 : vector<1x64x128xf32> to vector<64x128xf32>
    %cst_284 = arith.constant dense<0.000000e+00> : vector<16x128xf32>
    %754 = tpu.matmul %751, %753, %cst_284 {dimension_numbers = #tpu.dot_dimension_numbers<[1], [0], [0], [1], [0, 0, 1, 1], [], []>} : vector<16x64xf32>, vector<64x128xf32>, vector<16x128xf32> -> vector<16x128xf32>
    %c3_285 = arith.constant 3 : index
    %c0_286 = arith.constant 0 : index
    %c0_287 = arith.constant 0 : index
    %755 = vector.load %arg10[%c3_285, %c0_286, %c0_287] : memref<4x1x128xf32, #tpu.memory_space<vmem>>, vector<1x1x128xf32>
    %756 = vector.shape_cast %755 : vector<1x1x128xf32> to vector<1x128xf32>
    %757 = vector.broadcast %756 : vector<1x128xf32> to vector<16x128xf32>
    %758 = arith.addf %754, %757 : vector<16x128xf32>
    %cst_288 = arith.constant 5.000000e-01 : f32
    %759 = vector.broadcast %cst_288 : f32 to vector<16x128xf32>
    %760 = arith.mulf %759, %758 : vector<16x128xf32>
    %cst_289 = arith.constant 0.707106769 : f32
    %761 = vector.broadcast %cst_289 : f32 to vector<16x128xf32>
    %762 = arith.mulf %758, %761 : vector<16x128xf32>
    %cst_290 = arith.constant 0.000000e+00 : f32
    %763 = vector.broadcast %cst_290 : f32 to vector<16x128xf32>
    %764 = arith.cmpf oge, %762, %763 : vector<16x128xf32>
    %cst_291 = arith.constant 1.000000e+00 : f32
    %cst_292 = arith.constant -1.000000e+00 : f32
    %765 = vector.broadcast %cst_291 : f32 to vector<16x128xf32>
    %766 = vector.broadcast %cst_292 : f32 to vector<16x128xf32>
    %767 = arith.select %764, %765, %766 : vector<16x128xi1>, vector<16x128xf32>
    %768 = math.absf %762 : vector<16x128xf32>
    %cst_293 = arith.constant 0.327591091 : f32
    %769 = vector.broadcast %cst_293 : f32 to vector<16x128xf32>
    %770 = arith.mulf %769, %768 : vector<16x128xf32>
    %cst_294 = arith.constant 1.000000e+00 : f32
    %771 = vector.broadcast %cst_294 : f32 to vector<16x128xf32>
    %772 = arith.addf %771, %770 : vector<16x128xf32>
    %cst_295 = arith.constant 1.000000e+00 : f32
    %773 = vector.broadcast %cst_295 : f32 to vector<16x128xf32>
    %774 = arith.divf %773, %772 : vector<16x128xf32>
    %cst_296 = arith.constant 1.06140542 : f32
    %775 = vector.broadcast %cst_296 : f32 to vector<16x128xf32>
    %776 = arith.mulf %775, %774 : vector<16x128xf32>
    %cst_297 = arith.constant -1.45315206 : f32
    %777 = vector.broadcast %cst_297 : f32 to vector<16x128xf32>
    %778 = arith.addf %776, %777 : vector<16x128xf32>
    %779 = arith.mulf %778, %774 : vector<16x128xf32>
    %cst_298 = arith.constant 1.42141378 : f32
    %780 = vector.broadcast %cst_298 : f32 to vector<16x128xf32>
    %781 = arith.addf %779, %780 : vector<16x128xf32>
    %782 = arith.mulf %781, %774 : vector<16x128xf32>
    %cst_299 = arith.constant -0.284496725 : f32
    %783 = vector.broadcast %cst_299 : f32 to vector<16x128xf32>
    %784 = arith.addf %782, %783 : vector<16x128xf32>
    %785 = arith.mulf %784, %774 : vector<16x128xf32>
    %cst_300 = arith.constant 0.254829586 : f32
    %786 = vector.broadcast %cst_300 : f32 to vector<16x128xf32>
    %787 = arith.addf %785, %786 : vector<16x128xf32>
    %788 = arith.mulf %787, %774 : vector<16x128xf32>
    %cst_301 = arith.constant 0.000000e+00 : f32
    %789 = vector.broadcast %cst_301 : f32 to vector<16x128xf32>
    %790 = arith.subf %789, %768 : vector<16x128xf32>
    %791 = arith.mulf %790, %768 : vector<16x128xf32>
    %792 = math.exp %791 : vector<16x128xf32>
    %793 = arith.mulf %788, %792 : vector<16x128xf32>
    %cst_302 = arith.constant 1.000000e+00 : f32
    %794 = vector.broadcast %cst_302 : f32 to vector<16x128xf32>
    %795 = arith.subf %794, %793 : vector<16x128xf32>
    %796 = arith.mulf %767, %795 : vector<16x128xf32>
    %cst_303 = arith.constant 1.000000e+00 : f32
    %797 = vector.broadcast %cst_303 : f32 to vector<16x128xf32>
    %798 = arith.addf %797, %796 : vector<16x128xf32>
    %799 = arith.mulf %760, %798 : vector<16x128xf32>
    %c3_304 = arith.constant 3 : index
    %c0_305 = arith.constant 0 : index
    %c0_306 = arith.constant 0 : index
    %800 = vector.load %arg11[%c3_304, %c0_305, %c0_306] : memref<4x128x64xf32, #tpu.memory_space<vmem>>, vector<1x128x64xf32>
    %801 = vector.shape_cast %800 : vector<1x128x64xf32> to vector<128x64xf32>
    %cst_307 = arith.constant dense<0.000000e+00> : vector<16x64xf32>
    %802 = tpu.matmul %799, %801, %cst_307 {dimension_numbers = #tpu.dot_dimension_numbers<[1], [0], [0], [1], [0, 0, 1, 1], [], []>} : vector<16x128xf32>, vector<128x64xf32>, vector<16x64xf32> -> vector<16x64xf32>
    %803 = vector.extract_strided_slice %624 {offsets = [5, 0], sizes = [1, 64], strides = [1, 1]} : vector<8x64xf32> to vector<1x64xf32>
    %804 = vector.broadcast %803 : vector<1x64xf32> to vector<16x64xf32>
    %805 = arith.addf %802, %804 : vector<16x64xf32>
    %806 = arith.addf %727, %805 : vector<16x64xf32>
    %807 = vector.extract_strided_slice %373 {offsets = [2, 0], sizes = [1, 64], strides = [1, 1]} : vector<8x64xf32> to vector<1x64xf32>
    %808 = vector.extract_strided_slice %373 {offsets = [3, 0], sizes = [1, 64], strides = [1, 1]} : vector<8x64xf32> to vector<1x64xf32>
    %cst_308 = arith.constant dense<0.000000e+00> : vector<16xf32>
    %809 = vector.multi_reduction <add>, %806, %cst_308 [1] : vector<16x64xf32> to vector<16xf32>
    %810 = vector.shape_cast %809 : vector<16xf32> to vector<16x1xf32>
    %cst_309 = arith.constant 6.400000e+01 : f32
    %811 = vector.broadcast %cst_309 : f32 to vector<16x1xf32>
    %812 = arith.divf %810, %811 : vector<16x1xf32>
    %813 = vector.broadcast %812 : vector<16x1xf32> to vector<16x64xf32>
    %814 = arith.subf %806, %813 : vector<16x64xf32>
    %815 = arith.mulf %814, %814 : vector<16x64xf32>
    %cst_310 = arith.constant dense<0.000000e+00> : vector<16xf32>
    %816 = vector.multi_reduction <add>, %815, %cst_310 [1] : vector<16x64xf32> to vector<16xf32>
    %817 = vector.shape_cast %816 : vector<16xf32> to vector<16x1xf32>
    %cst_311 = arith.constant 6.400000e+01 : f32
    %818 = vector.broadcast %cst_311 : f32 to vector<16x1xf32>
    %819 = arith.divf %817, %818 : vector<16x1xf32>
    %820 = vector.broadcast %812 : vector<16x1xf32> to vector<16x64xf32>
    %821 = arith.subf %806, %820 : vector<16x64xf32>
    %cst_312 = arith.constant 9.99999974E-6 : f32
    %822 = vector.broadcast %cst_312 : f32 to vector<16x1xf32>
    %823 = arith.addf %819, %822 : vector<16x1xf32>
    %824 = math.rsqrt %823 : vector<16x1xf32>
    %825 = vector.broadcast %824 : vector<16x1xf32> to vector<16x64xf32>
    %826 = arith.mulf %821, %825 : vector<16x64xf32>
    %827 = vector.broadcast %807 : vector<1x64xf32> to vector<16x64xf32>
    %828 = arith.mulf %826, %827 : vector<16x64xf32>
    %829 = vector.broadcast %808 : vector<1x64xf32> to vector<16x64xf32>
    %830 = arith.addf %828, %829 : vector<16x64xf32>
    %c0_313 = arith.constant 0 : index
    %c0_314 = arith.constant 0 : index
    %831 = vector.load %arg19[%c0_313, %c0_314] : memref<64x128xf32, #tpu.memory_space<vmem>>, vector<64x128xf32>
    %cst_315 = arith.constant dense<0.000000e+00> : vector<16x128xf32>
    %832 = tpu.matmul %830, %831, %cst_315 {dimension_numbers = #tpu.dot_dimension_numbers<[1], [0], [0], [1], [0, 0, 1, 1], [], []>} : vector<16x64xf32>, vector<64x128xf32>, vector<16x128xf32> -> vector<16x128xf32>
    %c0_316 = arith.constant 0 : index
    %c0_317 = arith.constant 0 : index
    %833 = vector.load %arg20[%c0_316, %c0_317] : memref<1x128xf32, #tpu.memory_space<vmem>>, vector<1x128xf32>
    %834 = vector.broadcast %833 : vector<1x128xf32> to vector<16x128xf32>
    %835 = arith.addf %832, %834 : vector<16x128xf32>
    %836 = arith.negf %835 : vector<16x128xf32>
    %837 = math.exp %836 : vector<16x128xf32>
    %cst_318 = arith.constant 1.000000e+00 : f32
    %838 = vector.broadcast %cst_318 : f32 to vector<16x128xf32>
    %839 = arith.addf %838, %837 : vector<16x128xf32>
    %840 = arith.divf %838, %839 : vector<16x128xf32>
    %c0_319 = arith.constant 0 : index
    %c0_320 = arith.constant 0 : index
    %841 = vector.load %arg21[%c0_319, %c0_320] : memref<16x128xf32, #tpu.memory_space<vmem>>, vector<16x128xf32>
    tpu.vector_store %arg21[%c0_319, %c0_320], %840 {strides = array<i32>} : memref<16x128xf32, #tpu.memory_space<vmem>>, vector<16x128xf32>,
    return
  }
  func.func @transform_0(%arg0: i32) -> (i32, i32) {
    %c0_i32 = arith.constant 0 : i32
    %c0_i32_0 = arith.constant 0 : i32
    return %arg0, %c0_i32 : i32, i32
  }
  func.func @transform_1(%arg0: i32) -> (i32, i32, i32) {
    %c0_i32 = arith.constant 0 : i32
    %c0_i32_0 = arith.constant 0 : i32
    %c0_i32_1 = arith.constant 0 : i32
    return %arg0, %c0_i32, %c0_i32_0 : i32, i32, i32
  }
  func.func @transform_2(%arg0: i32) -> (i32, i32) {
    %c0_i32 = arith.constant 0 : i32
    %c0_i32_0 = arith.constant 0 : i32
    %c0_i32_1 = arith.constant 0 : i32
    return %c0_i32, %c0_i32_0 : i32, i32
  }
  func.func @transform_3(%arg0: i32) -> (i32, i32) {
    %c0_i32 = arith.constant 0 : i32
    %c0_i32_0 = arith.constant 0 : i32
    %c0_i32_1 = arith.constant 0 : i32
    return %c0_i32, %c0_i32_0 : i32, i32
  }
  func.func @transform_4(%arg0: i32) -> (i32, i32, i32) {
    %c0_i32 = arith.constant 0 : i32
    %c0_i32_0 = arith.constant 0 : i32
    %c0_i32_1 = arith.constant 0 : i32
    %c0_i32_2 = arith.constant 0 : i32
    return %c0_i32, %c0_i32_0, %c0_i32_1 : i32, i32, i32
  }
  func.func @transform_5(%arg0: i32) -> (i32, i32, i32) {
    %c0_i32 = arith.constant 0 : i32
    %c0_i32_0 = arith.constant 0 : i32
    %c0_i32_1 = arith.constant 0 : i32
    %c0_i32_2 = arith.constant 0 : i32
    return %c0_i32, %c0_i32_0, %c0_i32_1 : i32, i32, i32
  }
  func.func @transform_6(%arg0: i32) -> (i32, i32, i32) {
    %c0_i32 = arith.constant 0 : i32
    %c0_i32_0 = arith.constant 0 : i32
    %c0_i32_1 = arith.constant 0 : i32
    %c0_i32_2 = arith.constant 0 : i32
    return %c0_i32, %c0_i32_0, %c0_i32_1 : i32, i32, i32
  }
  func.func @transform_7(%arg0: i32) -> (i32, i32, i32) {
    %c0_i32 = arith.constant 0 : i32
    %c0_i32_0 = arith.constant 0 : i32
    %c0_i32_1 = arith.constant 0 : i32
    %c0_i32_2 = arith.constant 0 : i32
    return %c0_i32, %c0_i32_0, %c0_i32_1 : i32, i32, i32
  }
  func.func @transform_8(%arg0: i32) -> (i32, i32, i32) {
    %c0_i32 = arith.constant 0 : i32
    %c0_i32_0 = arith.constant 0 : i32
    %c0_i32_1 = arith.constant 0 : i32
    %c0_i32_2 = arith.constant 0 : i32
    return %c0_i32, %c0_i32_0, %c0_i32_1 : i32, i32, i32
  }
  func.func @transform_9(%arg0: i32) -> (i32, i32, i32) {
    %c0_i32 = arith.constant 0 : i32
    %c0_i32_0 = arith.constant 0 : i32
    %c0_i32_1 = arith.constant 0 : i32
    %c0_i32_2 = arith.constant 0 : i32
    return %c0_i32, %c0_i32_0, %c0_i32_1 : i32, i32, i32
  }
  func.func @transform_10(%arg0: i32) -> (i32, i32, i32) {
    %c0_i32 = arith.constant 0 : i32
    %c0_i32_0 = arith.constant 0 : i32
    %c0_i32_1 = arith.constant 0 : i32
    %c0_i32_2 = arith.constant 0 : i32
    return %c0_i32, %c0_i32_0, %c0_i32_1 : i32, i32, i32
  }
  func.func @transform_11(%arg0: i32) -> (i32, i32) {
    %c0_i32 = arith.constant 0 : i32
    %c0_i32_0 = arith.constant 0 : i32
    %c0_i32_1 = arith.constant 0 : i32
    return %c0_i32, %c0_i32_0 : i32, i32
  }
  func.func @transform_12(%arg0: i32) -> (i32, i32) {
    %c0_i32 = arith.constant 0 : i32
    %c0_i32_0 = arith.constant 0 : i32
    %c0_i32_1 = arith.constant 0 : i32
    return %c0_i32, %c0_i32_0 : i32, i32
  }
  func.func @transform_13(%arg0: i32) -> (i32, i32) {
    %c0_i32 = arith.constant 0 : i32
    %c0_i32_0 = arith.constant 0 : i32
    %c0_i32_1 = arith.constant 0 : i32
    return %c0_i32, %c0_i32_0 : i32, i32
  }
  func.func @transform_14(%arg0: i32) -> (i32, i32) {
    %c0_i32 = arith.constant 0 : i32
    %c0_i32_0 = arith.constant 0 : i32
    %c0_i32_1 = arith.constant 0 : i32
    return %c0_i32, %c0_i32_0 : i32, i32
  }
  func.func @transform_15(%arg0: i32) -> (i32, i32) {
    %c0_i32 = arith.constant 0 : i32
    %c0_i32_0 = arith.constant 0 : i32
    %c0_i32_1 = arith.constant 0 : i32
    return %c0_i32, %c0_i32_0 : i32, i32
  }
  func.func @transform_16(%arg0: i32) -> (i32, i32) {
    %c0_i32 = arith.constant 0 : i32
    %c0_i32_0 = arith.constant 0 : i32
    %c0_i32_1 = arith.constant 0 : i32
    return %c0_i32, %c0_i32_0 : i32, i32
  }
  func.func @transform_17(%arg0: i32) -> (i32, i32) {
    %c0_i32 = arith.constant 0 : i32
    %c0_i32_0 = arith.constant 0 : i32
    %c0_i32_1 = arith.constant 0 : i32
    return %c0_i32, %c0_i32_0 : i32, i32
  }
  func.func @transform_18(%arg0: i32) -> (i32, i32) {
    %c0_i32 = arith.constant 0 : i32
    %c0_i32_0 = arith.constant 0 : i32
    %c0_i32_1 = arith.constant 0 : i32
    return %c0_i32, %c0_i32_0 : i32, i32
  }
  func.func @transform_19(%arg0: i32) -> (i32, i32) {
    %c0_i32 = arith.constant 0 : i32
    %c0_i32_0 = arith.constant 0 : i32
    %c0_i32_1 = arith.constant 0 : i32
    return %c0_i32, %c0_i32_0 : i32, i32
  }
  func.func @transform_20(%arg0: i32) -> (i32, i32) {
    %c0_i32 = arith.constant 0 : i32
    %c0_i32_0 = arith.constant 0 : i32
    return %arg0, %c0_i32 : i32, i32
  }
  func.func @transform_21(%arg0: i32) -> (i32, i32, i32) {
    %c0_i32 = arith.constant 0 : i32
    %c0_i32_0 = arith.constant 0 : i32
    %c0_i32_1 = arith.constant 0 : i32
    return %arg0, %c0_i32, %c0_i32_0 : i32, i32, i32
  }
}

</mosaic_0001>

<bundles_post_ra>
// kernel: vae_vit_forward.1
= control target key start
LH: loop header
LB: loop body
LE: loop exit
PB: predicated region body
PF: predicated region fallthrough
CT: control target
= control target key end

     0   :  { %s10767_s0 = inlined_call_operand.vmem [shape: f32[32,64], index: 0, kind: input, shape index: {}]   ;;  %s10768_s1 = inlined_call_operand.vmem [shape: f32[2,1,128], index: 1, kind: input, shape index: {}]   ;;  %s10769_s2 = inlined_call_operand.vmem [shape: f32[64,64], index: 2, kind: input, shape index: {}]   ;;  %s10770_s3 = inlined_call_operand.vmem [shape: f32[16,64], index: 3, kind: input, shape index: {}]   ;;  %s10771_s4 = inlined_call_operand.vmem [shape: f32[4,8,64], index: 4, kind: input, shape index: {}]   ;;  %s10772_s5 = inlined_call_operand.vmem [shape: f32[4,64,192], index: 5, kind: input, shape index: {}]   ;;  %s10773_s6 = inlined_call_operand.vmem [shape: f32[4,1,192], index: 6, kind: input, shape index: {}]   ;;  %s10774_s7 = inlined_call_operand.vmem [shape: f32[4,64,64], index: 7, kind: input, shape index: {}]   ;;  %s10775_s8 = inlined_call_operand.vmem [shape: f32[4,64,128], index: 8, kind: input, shape index: {}]   ;;  %s10776_s9 = inlined_call_operand.vmem [shape: f32[4,1,128], index: 9, kind: input, shape index: {}]   ;;  %s10777_s10 = inlined_call_operand.vmem [shape: f32[4,128,64], index: 10, kind: input, shape index: {}]   ;;  %s10778_s11 = inlined_call_operand.vmem [shape: f32[8,64], index: 11, kind: input, shape index: {}]   ;;  %s10779_s12 = inlined_call_operand.vmem [shape: f32[192,32], index: 12, kind: input, shape index: {}]   ;;  %s10780_s13 = inlined_call_operand.vmem [shape: f32[2,32], index: 13, kind: input, shape index: {}]   ;;  %s10781_s14 = inlined_call_operand.vmem [shape: f32[32,256], index: 14, kind: input, shape index: {}]   ;;  %s10782_s15 = inlined_call_operand.vmem [shape: f32[1,256], index: 15, kind: input, shape index: {}]   ;;  %s10783_s16 = inlined_call_operand.vmem [shape: f32[32,64], index: 16, kind: input, shape index: {}]   ;;  %s10784_s17 = inlined_call_operand.vmem [shape: f32[16,64], index: 17, kind: input, shape index: {}]   ;;  %s10785_s18 = inlined_call_operand.vmem [shape: f32[64,128], index: 18, kind: input, shape index: {}]   ;;  %s10786_s19 = inlined_call_operand.vmem [shape: f32[1,128], index: 19, kind: input, shape index: {}]   ;;  %s10787_s20 = inlined_call_operand.vmem [shape: f32[32,128], index: 20, kind: output, shape index: {0}]   ;;  %s10788_s21 = inlined_call_operand.vmem [shape: f32[2,1,256], index: 21, kind: output, shape index: {1}]  }
   0x1   :  { %10815 = sst [smem:[#allocation4_spill]] %s10767_s0 }
   0x2   :  { %10816 = sst [smem:[#allocation5_spill]] %s10768_s1 }
   0x3   :  { %10817 = sst [smem:[#allocation6_spill]] %s10769_s2  ;;  %s9217_s2 = smov 0  }
   0x4   :  { %10818 = sst [smem:[#allocation7_spill]] %s10770_s3 }
   0x5   :  { %10819 = sst [smem:[#allocation8_spill]] %s10771_s4 }
   0x6   :  { %10820 = sst [smem:[#allocation9_spill]] %s10772_s5 }
   0x7   :  { %10821 = sst [smem:[#allocation10_spill]] %s10779_s12 }
   0x8   :  { %10822 = sst [smem:[#allocation11_spill]] %s10785_s18 }
   0x9   :  { %10823 = sst [smem:[#allocation12_spill]] %s10786_s19 }
   0xa   :  { %10824 = sst [smem:[#allocation13_spill]] %s10787_s20 }
   0xb LB: > { %10825 = sst [smem:[#allocation2_spill]] %s9093_s2  ;;  %s9223_s25 = sadd.s32 4294967295, %s9093_s2   ;;  %s9093_s2 = sphi %s9217_s2, %s32_s2  }
   0xc   : > { %p6909_p0 = scmp.ge.s32.totalorder %s9093_s2, 1  ;;  %p599_p1 = scmp.lt.s32.totalorder %s9093_s2, 3 }
   0xe   : > { %p600_p2 = pnand %p6909_p0, %p599_p1 }
  0x10   : > { %603 = sbr.rel (%p600_p2) target bundleno = 18667 (0x48eb), region = 100 }
  0x17   : > { %s10826_s3 = sld [smem:[#allocation6_spill]]  ;;  %s6910_s30 = sshll.u32 %s9223_s25, 1  ;;  %vm697_vm0 = vcmask 523264   ;;  %v9095_v51 = vmov 0.0   ;;  %v807_v59 = vlaneseq  ;;  %vm936_vm1 = vcmask 130048  }
  0x18   : > { %p667_p3 = scmp.lt.s32.totalorder %s6910_s30, 3  ;;  %s10828_s23 = sld [smem:[#allocation4_spill]]  ;;  %917 = vmatprep.mubr.f32.mxu1 %v9095_v51  ;;  %vm9375_vm2 = vmpackc.low %vm936_vm1, %vm936_vm1  ;;  %vm1751_vm3 = vcmask 261120   ;;  %vm1754_vm4 = vcmask 392192   ;;  %vm9105_vm9 = vmmov 0  }
  0x19   : > { %s10829_s28 = sld [smem:[#allocation7_spill]]  ;;  %s10830_s22 = sld [smem:[#allocation9_spill]]  ;;  %v9330_v63 = vshrl.u32 %v807_v59, 7  ;;  %vm3749_vm10 = vcmp.lt.s32.totalorder %v807_v59, 256  ;;  %v3849_v59 = vld [vmem:[%s10783_s16 + $0x18] sm:$0xff] }
  0x1a   : > { %s10852_s30 = smov (!%p667_p3, %s6910_s30), 3  ;;  %s10831_s24 = sld [smem:[#allocation8_spill]] }
  0x1b   : > { %10827 = sst [smem:[#allocation3_spill]] %s10852_s30  ;;  %s10793_s27 = sshll.u32 %s10852_s30, 3 }
  0x1c   : > { %s10805_s0 = smov 64   ;;  %s10801_s4 = smov 32  }
  0x1d   : > { %v687_v0 = vld [vmem:[%s10826_s3] sm:$0xff]  ;;  %v688_v1 = vld [vmem:[%s10826_s3 + $0x8] sm:$0xff]  ;;  %v689_v2 = vld [vmem:[%s10826_s3 + $0x10] sm:$0xff]  ;;  %s10799_s5 = smov 96   ;;  %s10836_s26 = smov 112  }
  0x1e   : > { %v8154_v3 = vpack.c.bf16 %v688_v1, %v687_v0  ;;  %v690_v4 = vld [vmem:[%s10826_s3 + $0x18] sm:$0xff]  ;;  %v691_v6 = vld [vmem:[%s10826_s3 + $0x20] sm:$0xff]  ;;  %v692_v7 = vld [vmem:[%s10826_s3 + $0x28] sm:$0xff]  ;;  %s670_s1 = scalar_lea.vmem %s10828_s23, %s10793_s27  ;;  %v9333_v1 = vsub.s32 0, %v9330_v63  ;;  %s10807_s27 = smov 48  }
  0x1f   : > { %v8158_v5 = vpack.c.bf16 %v690_v4, %v689_v2  ;;  %v8162_v8 = vpack.c.bf16 %v692_v7, %v691_v6  ;;  %v693_v9 = vld [vmem:[%s10826_s3 + $0x30] sm:$0xff]  ;;  %v694_v10 = vld [vmem:[%s10826_s3 + $0x38] sm:$0xff]  ;;  %v685_v11 = vld [vmem:[%s670_s1] sm:$0xff]  ;;  %s10803_s3 = smov 112   ;;  %s10795_s23 = smov 16  }
  0x20   : > { %8155 = vmatprep.subr.bf16.mxu0 %v8154_v3  ;;  %7551 = vmatprep.mubr.msk.f32.mxu0 %vm697_vm0, %v685_v11  ;;  %v8166_v12 = vpack.c.bf16 %v694_v10, %v693_v9  ;;  %v686_v13 = vld [vmem:[%s670_s1 + $0x8] sm:$0xff]  ;;  %v695_v14 = vld [vmem:[%s10829_s28] sm:$0xff]  ;;  %v822_v33 = vld [vmem:[%s10830_s22 + $0x18] sm:$0xff]  ;;  %s10797_s1 = smov 80   ;;  %s10837_s2 = smov 32  }
  0x21   : > { %8157 = vmatpush3.bf16.msra.mxu0 %v8154_v3  ;;  %v696_v16 = vld [vmem:[%s10829_s28 + $0x8] sm:$0xff]  ;;  %v819_v35 = vld [vmem:[%s10830_s22] sm:$0xff]  ;;  %v821_v36 = vld [vmem:[%s10830_s22 + $0x10] sm:$0xff]  ;;  %v9341_v3 = vsub.s32 1, %v9330_v63  ;;  %s10834_s28 = smov 48   ;;  %s10838_s29 = smov 96  }
  0x22   : > { %8159 = vmatprep.subr.bf16.mxu0 %v8158_v5  ;;  %v820_v32 = vld [vmem:[%s10830_s22 + $0x8] sm:$0xff]  ;;  %v8172_v37 = vpack.c.bf16 %v821_v36, %v819_v35  ;;  %v826_v39 = vld [vmem:[%s10830_s22 + $0x38] sm:$0xff]  ;;  %v823_v41 = vld [vmem:[%s10830_s22 + $0x20] sm:$0xff]  ;;  %s10841_s12 = sld [smem:[#allocation10_spill]]  ;;  %p672_p4 = scmp.lt.s32.totalorder %s9223_s25, 1 }
  0x23   : > { %v8170_v34 = vpack.c.bf16 %v822_v33, %v820_v32  ;;  %v824_v38 = vld [vmem:[%s10830_s22 + $0x28] sm:$0xff]  ;;  %v825_v42 = vld [vmem:[%s10830_s22 + $0x30] sm:$0xff]  ;;  %v830_v45 = vld [vmem:[%s10830_s22 + $0x58] sm:$0xff]  ;;  %s10842_s19 = sld [smem:[#allocation5_spill]] }
  0x24   : > { %v8174_v40 = vpack.c.bf16 %v826_v39, %v824_v38  ;;  %v8176_v43 = vpack.c.bf16 %v825_v42, %v823_v41  ;;  %v828_v44 = vld [vmem:[%s10830_s22 + $0x48] sm:$0xff]  ;;  %v827_v46 = vld [vmem:[%s10830_s22 + $0x40] sm:$0xff]  ;;  %v829_v48 = vld [vmem:[%s10830_s22 + $0x50] sm:$0xff]  ;;  %s10854_s25 = smov (!%p672_p4, %s9223_s25), 1  ;;  %s10849_s18 = sld [smem:[#allocation13_spill]] }
  0x25   : > { %8161 = vmatpush3.bf16.msra.mxu0 %v8158_v5  ;;  %8171 = vmatprep.subr.bf16.mxu1 %v8170_v34  ;;  %v8178_v47 = vpack.c.bf16 %v830_v45, %v828_v44  ;;  %v832_v49 = vld [vmem:[%s10830_s22 + $0x68] sm:$0xff]  ;;  %v834_v50 = vld [vmem:[%s10830_s22 + $0x78] sm:$0xff]  ;;  %v8180_v52 = vpack.c.bf16 %v829_v48, %v827_v46  ;;  %v831_v54 = vld [vmem:[%s10830_s22 + $0x60] sm:$0xff] }
  0x26   : > { %8163 = vmatprep.subr.bf16.mxu0 %v8162_v8  ;;  %8173 = vmatpush1.bf16.msra.mxu1 %v8172_v37  ;;  %v8182_v53 = vpack.c.bf16 %v834_v50, %v832_v49  ;;  %v833_v55 = vld [vmem:[%s10830_s22 + $0x70] sm:$0xff]  ;;  %v9338_v2 = vld [vmem:[%s10831_s24] sm:$0xff] }
  0x27   : > { %8175 = vmatprep.subr.bf16.mxu1 %v8174_v40  ;;  %v8184_v56 = vpack.c.bf16 %v833_v55, %v831_v54  ;;  %v810_v4 = vrot.slane %v9338_v2, %v9333_v1  ;;  %v816_v7 = vrot.slane %v9338_v2, %v9341_v3 }
  0x29   : > { %8165 = vmatpush3.bf16.msra.mxu0 %v8162_v8 }
  0x2a   : > { %8167 = vmatprep.subr.bf16.mxu0 %v8166_v12  ;;  %8177 = vmatpush1.bf16.msra.mxu1 %v8176_v43 }
  0x2b   : > { %8179 = vmatprep.subr.bf16.mxu1 %v8178_v47 }
  0x2d   : > { %8169 = vmatpush3.bf16.msra.mxu0 %v8166_v12 }
  0x2e   : > { %8181 = vmatpush1.bf16.msra.mxu1 %v8180_v52 }
  0x2f   : > { %8183 = vmatprep.subr.bf16.mxu1 %v8182_v53 }
  0x30   : > { %7552 = vmatmul.mubr.msk.f32.vlgmr.msra.gmra.mrb[0].mxu0 %vm697_vm0, %v686_v13 }
  0x32   : > { %8185 = vmatpush1.bf16.msra.mxu1 %v8184_v56 }
 0x103   : > { %v7553_v15 = vpop.f32.mrb[0].mxu0 }
 0x104   : > { %v770_v17 = vpop.f32.mrb[1].mxu0  ;;  %v9270_v19 = vadd.f32 %v7553_v15, %v696_v16 }
 0x105   : > { %v9268_v18 = vadd.f32 %v770_v17, %v695_v14  ;;  %v835_v14 = vld [vmem:[%s10773_s6] sm:$0x3] }
 0x106   : > { %v783_v21 = vsel %vm697_vm0, %v9270_v19, 0.0  ;;  %v840_v15 = vrot.slane %v835_v14, %v9333_v1 }
 0x107   : > { %v780_v20 = vsel %vm697_vm0, %v9268_v18, 0.0 }
 0x108   : > { %781 = vadd.xlane.f32.xlu0 %v780_v20 }
 0x10c   : > { %784 = vadd.xlane.f32.xlu0 %v783_v21  ;;  %v844_v21 = vrot.slane %v835_v14, %v9341_v3 }
 0x195   : > { %v782_v22 = vpop.xlane.xlu0 %781 }
 0x196   : > { %v787_v23 = vmul.f32 0.015625, %v782_v22 }
 0x198   : > { %v789_v24 = vsub.f32 %v9268_v18, %v787_v23 }
 0x199   : > { %v785_v25 = vpop.xlane.xlu0 %784 }
 0x19a   : > { %v788_v26 = vmul.f32 0.015625, %v785_v25  ;;  %v791_v27 = vmul.f32 %v789_v24, %v789_v24 }
 0x19c   : > { %v790_v28 = vsub.f32 %v9270_v19, %v788_v26  ;;  %v793_v29 = vsel %vm697_vm0, %v791_v27, 0.0 }
 0x19d   : > { %794 = vadd.xlane.f32.xlu1 %v793_v29 }
 0x19e   : > { %v792_v30 = vmul.f32 %v790_v28, %v790_v28 }
 0x1a0   : > { %v796_v31 = vsel %vm697_vm0, %v792_v30, 0.0 }
 0x1a1   : > { %797 = vadd.xlane.f32.xlu1 %v796_v31 }
 0x22a   : > { %v795_v57 = vpop.xlane.xlu1 %794 }
 0x22b   : > { %v799_v58 = vmul.f32 0.015625, %v795_v57 }
 0x22d   : > { %v801_v60 = vadd.f32 1e-05, %v799_v58 }
 0x22e   : > { %v798_v61 = vpop.xlane.xlu1 %797 }
 0x22f   : > { %8876 = vrsqrt.f32 %v801_v60  ;;  %v800_v62 = vmul.f32 0.015625, %v798_v61 }
 0x231   : > { %v802_v0 = vadd.f32 1e-05, %v800_v62 }
 0x233   : > { %8878 = vrsqrt.f32 %v802_v0 }
 0x239   : > { %v8877_v5 = vpop.eup %8876 }
 0x23a   : > { %v805_v6 = vmul.f32 %v8877_v5, %v789_v24 }
 0x23c   : > { %v811_v8 = vmul.f32 %v810_v4, %v805_v6 }
 0x23d   : > { %v8879_v9 = vpop.eup %8878 }
 0x23e   : > { %v817_v10 = vadd.f32 %v816_v7, %v811_v8  ;;  %v806_v11 = vmul.f32 %v8879_v9, %v790_v28 }
 0x240   : > { %6917 = vmatmul.mubr.msk.f32.vlgmr.msra.gmra.mrb[0].mxu1 %vm697_vm0, %v817_v10  ;;  %v812_v12 = vmul.f32 %v810_v4, %v806_v11 }
 0x241   : > { %923 = vmatprep.mubr.f32.mxu1 %v9095_v51 }
 0x242   : > { %v818_v13 = vadd.f32 %v816_v7, %v812_v12 }
 0x244   : > { %6918 = vmatmul.mubr.msk.f32.gmra.mrb[2].mxu1 %vm697_vm0, %v818_v13 }
 0x313   : > { %v919_v16 = vpop.f32.mrb[0].mxu1 }
 0x314   : > { %v9354_v17 = vadd.f32 %v919_v16, %v840_v15  ;;  %v921_v20 = vpop.f32.mrb[1].mxu1 }
 0x315   : > { %v922_v25 = vadd.f32 %v921_v20, %v844_v21 }
 0x316   : > { %7558 = vmatprep.mubr.msk.f32.mxu0 %vm936_vm1, %v9354_v17 }
 0x317   : > { %v925_v22 = vpop.f32.mrb[2].mxu1 }
 0x318   : > { %v9359_v23 = vadd.f32 %v925_v22, %v840_v15  ;;  %v927_v24 = vpop.f32.mrb[3].mxu1 }
 0x319   : > { %v928_v26 = vadd.f32 %v927_v24, %v844_v21 }
 0x31a   : > { %v9363_v27 = vpack.i.bf16 %v9359_v23, %v9354_v17 }
 0x31b   : > { %v8192_v28 = vpack.c.bf16 %v928_v26, %v922_v25  ;;  %v9365_v29 = vpack.i.bf16 %v928_v26, %v922_v25 }
 0x31c   : > { %8737 = vrot.lane.b32.xlu0 %v9363_v27, %s10805_s0  ;;  %s10843_s0 = smov 16  }
 0x320   : > { %1123 = vrot.lane.b32.xlu0 %v9354_v17, %s10803_s3 }
 0x324   : > { %1125 = vrot.lane.b32.xlu0 %v9359_v23, %s10803_s3 }
 0x38e   : > { %v8738_v30 = vpop.permute.xlu0 %8737 }
 0x38f   : > { %v8740_v31 = vunpack.i.h.bf16 %v8738_v30  ;;  %v8739_v32 = vunpack.i.l.bf16 %v8738_v30 }
 0x391   : > { %v8186_v34 = vpack.c.bf16 %v8740_v31, %v8739_v32 }
 0x392   : > { %v1124_v61 = vpop.permute.xlu0 %1123 }
 0x393   : > { %8188 = vmatprep.subr.msk.bf16.mxu0 %vm9375_vm2, %v8186_v34 }
 0x394   : > { %8191 = vmatpush3.bf16.xpose.msk.msra.mxu0 %vm9375_vm2, %v8186_v34 }
 0x395   : > { %8193 = vmatprep.subr.bf16.mxu0 %v8192_v28 }
 0x396   : > { %v1126_v62 = vpop.permute.xlu0 %1125 }
 0x39b   : > { %7559 = vmatmul.mubr.msk.f32.vlgmr.msra.gmra.mrb[2].mxu0 %vm936_vm1, %v9359_v23 }
 0x39c   : > { %8195 = vmatpush3.bf16.msra.mxu0 %v8192_v28 }
 0x46e   : > { %v7560_v35 = vpop.f32.mrb[2].mxu0 }
 0x46f   : > { %v1011_v36 = vpop.f32.mrb[3].mxu0  ;;  %v1023_v38 = vsel %vm936_vm1, %v7560_v35, -inf }
 0x470   : > { %v1020_v37 = vsel %vm936_vm1, %v1011_v36, -inf }
 0x471   : > { %1021 = vmax.xlane.f32.xlu1 %v1020_v37 }
 0x475   : > { %1024 = vmax.xlane.f32.xlu1 %v1023_v38 }
 0x4fe   : > { %v1022_v39 = vpop.xlane.xlu1 %1021 }
 0x4ff   : > { %v1026_v40 = vsub.f32 %v1011_v36, %v1022_v39 }
 0x501   : > { %v1028_v43 = vmul.f32 1.442695, %v1026_v40 }
 0x502   : > { %v1025_v41 = vpop.xlane.xlu1 %1024 }
 0x503   : > { %v1027_v42 = vsub.f32 %v7560_v35, %v1025_v41 }
 0x505   : > { %v1030_v44 = vmul.f32 1.442695, %v1027_v42 }
 0x507   : > { %8880 = vpow2.f32 %v1030_v44 }
 0x508   : > { %8882 = vpow2.f32 %v1028_v43 }
 0x511   : > { %v8881_v45 = vpop.eup %8880 }
 0x512   : > { %v1035_v46 = vsel %vm936_vm1, %v8881_v45, 0.0  ;;  %v8883_v47 = vpop.eup %8882 }
 0x513   : > { %1036 = vadd.xlane.f32.xlu1 %v1035_v46  ;;  %v1032_v48 = vsel %vm936_vm1, %v8883_v47, 0.0 }
 0x517   : > { %1033 = vadd.xlane.f32.xlu1 %v1032_v48 }
 0x528   : > { %8742 = vrot.lane.b32.xlu1 %v9363_v27, %s10807_s27 }
 0x5a0   : > { %v1037_v49 = vpop.xlane.xlu1 %1036 }
 0x5a1   : > { %8884 = vrcp.f32 %v1037_v49 }
 0x5a4   : > { %v1034_v50 = vpop.xlane.xlu1 %1033 }
 0x5a5   : > { %8886 = vrcp.f32 %v1034_v50 }
 0x5a8   : > { %v8743_v52 = vpop.permute.xlu1 %8742 }
 0x5a9   : > { %v8745_v53 = vunpack.i.h.bf16 %v8743_v52  ;;  %v8744_v54 = vunpack.i.l.bf16 %v8743_v52 }
 0x5ab   : > { %v8196_v55 = vpack.c.bf16 %v8745_v53, %v8744_v54  ;;  %v8885_v56 = vpop.eup %8884 }
 0x5ac   : > { %v1041_v60 = vmul.f32 %v8885_v56, %v8881_v45 }
 0x5ad   : > { %8198 = vmatprep.subr.msk.bf16.mxu0 %vm9375_vm2, %v8196_v55 }
 0x5af   : > { %v8887_v57 = vpop.eup %8886 }
 0x5b0   : > { %v1040_v58 = vmul.f32 %v8887_v57, %v8883_v47 }
 0x5b2   : > { %7565 = vmatprep.mubr.msk.f32.mxu0 %vm936_vm1, %v1040_v58 }
 0x5b3   : > { %7566 = vmatmul.mubr.msk.f32.vlgmr.msra.gmra.mrb[4].mxu0 %vm936_vm1, %v1041_v60 }
 0x5b4   : > { %8201 = vmatpush3.bf16.xpose.msk.msra.mxu0 %vm9375_vm2, %v8196_v55  ;;  %7572 = vmatprep.mubr.msk.f32.mxu0 %vm936_vm1, %v1124_v61 }
 0x5bb   : > { %7573 = vmatmul.mubr.msk.f32.vlgmr.msra.gmra.mrb[6].mxu0 %vm936_vm1, %v1126_v62 }
 0x686   : > { %v9399_v0 = vpop.f32.mrb[4].mxu0 }
 0x687   : > { %v9401_v4 = vpop.f32.mrb[5].mxu0 }
 0x68e   : > { %v7574_v5 = vpop.f32.mrb[6].mxu0 }
 0x68f   : > { %v1205_v6 = vpop.f32.mrb[7].mxu0  ;;  %v1217_v7 = vsel %vm936_vm1, %v7574_v5, -inf }
 0x690   : > { %1218 = vmax.xlane.f32.xlu1 %v1217_v7  ;;  %v1214_v8 = vsel %vm936_vm1, %v1205_v6, -inf }
 0x691   : > { %1215 = vmax.xlane.f32.xlu0 %v1214_v8 }
 0x6a1   : > { %8752 = vrot.lane.b32.xlu1 %v9363_v27, %s10801_s4 }
 0x6a5   : > { %1325 = vrot.lane.b32.xlu1 %v9354_v17, %s10799_s5 }
 0x6a9   : > { %1327 = vrot.lane.b32.xlu1 %v9359_v23, %s10799_s5 }
 0x71d   : > { %v1219_v9 = vpop.xlane.xlu1 %1218 }
 0x71e   : > { %v1221_v10 = vsub.f32 %v7574_v5, %v1219_v9  ;;  %v1216_v11 = vpop.xlane.xlu0 %1215 }
 0x71f   : > { %v1220_v12 = vsub.f32 %v1205_v6, %v1216_v11 }
 0x720   : > { %v1224_v13 = vmul.f32 1.442695, %v1221_v10 }
 0x721   : > { %v1222_v14 = vmul.f32 1.442695, %v1220_v12  ;;  %v8753_v25 = vpop.permute.xlu1 %8752 }
 0x722   : > { %8888 = vpow2.f32 %v1224_v13  ;;  %v8755_v28 = vunpack.i.h.bf16 %v8753_v25  ;;  %v8754_v30 = vunpack.i.l.bf16 %v8753_v25 }
 0x723   : > { %8890 = vpow2.f32 %v1222_v14 }
 0x724   : > { %v8206_v35 = vpack.c.bf16 %v8755_v28, %v8754_v30 }
 0x725   : > { %v1326_v40 = vpop.permute.xlu1 %1325 }
 0x729   : > { %v1328_v41 = vpop.permute.xlu1 %1327 }
 0x72c   : > { %v8889_v15 = vpop.eup %8888 }
 0x72d   : > { %v1229_v16 = vsel %vm936_vm1, %v8889_v15, 0.0  ;;  %v8891_v20 = vpop.eup %8890 }
 0x72e   : > { %1230 = vadd.xlane.f32.xlu0 %v1229_v16  ;;  %v1226_v21 = vsel %vm936_vm1, %v8891_v20, 0.0 }
 0x732   : > { %1227 = vadd.xlane.f32.xlu0 %v1226_v21 }
 0x748   : > { %8747 = vrot.lane.b32.xlu0 %v9365_v29, %s10803_s3 }
 0x7bb   : > { %v1231_v22 = vpop.xlane.xlu0 %1230 }
 0x7bc   : > { %8892 = vrcp.f32 %v1231_v22 }
 0x7bf   : > { %v1228_v24 = vpop.xlane.xlu0 %1227 }
 0x7c0   : > { %8894 = vrcp.f32 %v1228_v24 }
 0x7c3   : > { %v8748_v26 = vpop.permute.xlu0 %8747 }
 0x7c4   : > { %v8750_v31 = vunpack.i.h.bf16 %v8748_v26  ;;  %v8749_v32 = vunpack.i.l.bf16 %v8748_v26 }
 0x7c6   : > { %v8202_v34 = vpack.c.bf16 %v8750_v31, %v8749_v32  ;;  %v8893_v36 = vpop.eup %8892 }
 0x7c7   : > { %v1235_v39 = vmul.f32 %v8893_v36, %v8889_v15 }
 0x7c8   : > { %8203 = vmatprep.subr.bf16.mxu1 %v8202_v34 }
 0x7c9   : > { %8205 = vmatpush3.bf16.msra.mxu1 %v8202_v34 }
 0x7ca   : > { %v8895_v37 = vpop.eup %8894  ;;  %8208 = vmatprep.subr.msk.bf16.mxu1 %vm9375_vm2, %v8206_v35 }
 0x7cb   : > { %v1234_v38 = vmul.f32 %v8895_v37, %v8891_v20 }
 0x7cd   : > { %7579 = vmatprep.mubr.msk.f32.mxu1 %vm936_vm1, %v1234_v38 }
 0x7ce   : > { %7580 = vmatmul.mubr.msk.f32.vlgmr.msra.gmra.mrb[4].mxu1 %vm936_vm1, %v1235_v39 }
 0x7cf   : > { %7586 = vmatprep.mubr.msk.f32.mxu1 %vm936_vm1, %v1326_v40 }
 0x7d2   : > { %8211 = vmatpush3.bf16.xpose.msk.msra.mxu1 %vm9375_vm2, %v8206_v35 }
 0x7d9   : > { %7587 = vmatmul.mubr.msk.f32.vlgmr.msra.gmra.mrb[6].mxu1 %vm936_vm1, %v1328_v41 }
 0x8a1   : > { %v7581_v42 = vpop.f32.mrb[4].mxu1 }
 0x8a2   : > { %v1316_v43 = vpop.f32.mrb[5].mxu1 }
 0x8ac   : > { %v7588_v44 = vpop.f32.mrb[6].mxu1 }
 0x8ad   : > { %v1407_v45 = vpop.f32.mrb[7].mxu1  ;;  %v1419_v46 = vsel %vm936_vm1, %v7588_v44, -inf }
 0x8ae   : > { %1420 = vmax.xlane.f32.xlu1 %v1419_v46  ;;  %v1416_v47 = vsel %vm936_vm1, %v1407_v45, -inf }
 0x8af   : > { %1417 = vmax.xlane.f32.xlu0 %v1416_v47 }
 0x8bf   : > { %8762 = vrot.lane.b32.xlu1 %v9363_v27, %s10795_s23 }
 0x8c3   : > { %1525 = vrot.lane.b32.xlu1 %v9354_v17, %s10797_s1 }
 0x8c7   : > { %1527 = vrot.lane.b32.xlu1 %v9359_v23, %s10797_s1 }
 0x93b   : > { %v1421_v48 = vpop.xlane.xlu1 %1420 }
 0x93c   : > { %v1423_v49 = vsub.f32 %v7588_v44, %v1421_v48  ;;  %v1418_v50 = vpop.xlane.xlu0 %1417  ;;  %v1758_v48 = vld [vmem:[%s10774_s7 + $0x8] sm:$0xff] }
 0x93d   : > { %v1422_v52 = vsub.f32 %v1407_v45, %v1418_v50 }
 0x93e   : > { %v1426_v53 = vmul.f32 1.442695, %v1423_v49  ;;  %v1759_v49 = vld [vmem:[%s10774_s7 + $0x10] sm:$0xff] }
 0x93f   : > { %v1424_v54 = vmul.f32 1.442695, %v1422_v52  ;;  %v8763_v58 = vpop.permute.xlu1 %8762  ;;  %v1760_v52 = vld [vmem:[%s10774_s7 + $0x18] sm:$0xff] }
 0x940   : > { %8896 = vpow2.f32 %v1426_v53  ;;  %v8765_v61 = vunpack.i.h.bf16 %v8763_v58  ;;  %v8764_v62 = vunpack.i.l.bf16 %v8763_v58  ;;  %v8230_v53 = vpack.c.bf16 %v1760_v52, %v1759_v49 }
 0x941   : > { %8898 = vpow2.f32 %v1424_v54  ;;  %v1761_v54 = vld [vmem:[%s10774_s7 + $0x20] sm:$0xff] }
 0x942   : > { %v8216_v8 = vpack.c.bf16 %v8765_v61, %v8764_v62 }
 0x943   : > { %v1526_v13 = vpop.permute.xlu1 %1525 }
 0x947   : > { %v1528_v14 = vpop.permute.xlu1 %1527 }
 0x94a   : > { %v8897_v55 = vpop.eup %8896 }
 0x94b   : > { %v1431_v56 = vsel %vm936_vm1, %v8897_v55, 0.0  ;;  %v8899_v57 = vpop.eup %8898 }
 0x94c   : > { %1432 = vadd.xlane.f32.xlu0 %v1431_v56  ;;  %v1428_v27 = vsel %vm936_vm1, %v8899_v57, 0.0 }
 0x950   : > { %1429 = vadd.xlane.f32.xlu0 %v1428_v27  ;;  %v1764_v27 = vld [vmem:[%s10774_s7 + $0x38] sm:$0xff] }
 0x966   : > { %8757 = vrot.lane.b32.xlu0 %v9365_v29, %s10799_s5  ;;  %s10840_s5 = smov 16  }
 0x9d9   : > { %v1433_v17 = vpop.xlane.xlu0 %1432 }
 0x9da   : > { %8900 = vrcp.f32 %v1433_v17 }
 0x9dd   : > { %v1430_v23 = vpop.xlane.xlu0 %1429 }
 0x9de   : > { %8902 = vrcp.f32 %v1430_v23 }
 0x9e1   : > { %v8758_v60 = vpop.permute.xlu0 %8757 }
 0x9e2   : > { %v8760_v5 = vunpack.i.h.bf16 %v8758_v60  ;;  %v8759_v6 = vunpack.i.l.bf16 %v8758_v60 }
 0x9e4   : > { %v8212_v7 = vpack.c.bf16 %v8760_v5, %v8759_v6  ;;  %v8901_v9 = vpop.eup %8900 }
 0x9e5   : > { %v1437_v12 = vmul.f32 %v8901_v9, %v8897_v55  ;;  %v1762_v55 = vld [vmem:[%s10774_s7 + $0x28] sm:$0xff] }
 0x9e6   : > { %8213 = vmatprep.subr.bf16.mxu0 %v8212_v7  ;;  %v8234_v56 = vpack.c.bf16 %v1762_v55, %v1761_v54  ;;  %v9535_v55 = vsub.s32 2, %v9330_v63 }
 0x9e7   : > { %8215 = vmatpush3.bf16.msra.mxu0 %v8212_v7 }
 0x9e8   : > { %v8903_v10 = vpop.eup %8902  ;;  %8218 = vmatprep.subr.msk.bf16.mxu0 %vm9375_vm2, %v8216_v8 }
 0x9e9   : > { %v1436_v11 = vmul.f32 %v8903_v10, %v8899_v57  ;;  %v1763_v57 = vld [vmem:[%s10774_s7 + $0x30] sm:$0xff] }
 0x9ea   : > { %v8238_v17 = vpack.c.bf16 %v1764_v27, %v1763_v57  ;;  %v1883_v57 = vrot.slane %v9338_v2, %v9535_v55 }
 0x9eb   : > { %7593 = vmatprep.mubr.msk.f32.mxu0 %vm936_vm1, %v1436_v11 }
 0x9ec   : > { %7594 = vmatmul.mubr.msk.f32.vlgmr.msra.gmra.mrb[8].mxu0 %vm936_vm1, %v1437_v12 }
 0x9ed   : > { %7600 = vmatprep.mubr.msk.f32.mxu0 %vm936_vm1, %v1526_v13 }
 0x9f0   : > { %8221 = vmatpush3.bf16.xpose.msk.msra.mxu0 %vm9375_vm2, %v8216_v8 }
 0x9f7   : > { %7601 = vmatmul.mubr.msk.f32.vlgmr.msra.gmra.mrb[10].mxu0 %vm936_vm1, %v1528_v14  ;;  %v9492_v14 = vsub.s32 4, %v9330_v63 }
 0xabf   : > { %v7595_v15 = vpop.f32.mrb[8].mxu0 }
 0xac0   : > { %v1516_v16 = vpop.f32.mrb[9].mxu0 }
 0xaca   : > { %v7602_v20 = vpop.f32.mrb[10].mxu0 }
 0xacb   : > { %v1607_v21 = vpop.f32.mrb[11].mxu0  ;;  %v1619_v22 = vsel %vm936_vm1, %v7602_v20, -inf }
 0xacc   : > { %1620 = vmax.xlane.f32.xlu1 %v1619_v22  ;;  %v1616_v24 = vsel %vm936_vm1, %v1607_v21, -inf }
 0xacd   : > { %1617 = vmax.xlane.f32.xlu0 %v1616_v24 }
 0xadd   : > { %1727 = vrot.lane.b32.xlu1 %v1316_v43, %s10795_s23 }
 0xae1   : > { %1729 = vrot.lane.b32.xlu1 %v7581_v42, %s10795_s23  ;;  %s6914_s23 = sshll.u32 %s10854_s25, 1 }
 0xae2   : > { %s684_s30 = scalar_lea.vmem %s10788_s21, %s6914_s23  ;;  %s10844_s23 = smov 80  }
 0xae5   : > { %1735 = vrot.lane.b32.xlu1 %v1516_v16, %s10801_s4 }
 0xb59   : > { %v1621_v25 = vpop.xlane.xlu1 %1620 }
 0xb5a   : > { %v1623_v26 = vsub.f32 %v7602_v20, %v1621_v25  ;;  %v1618_v28 = vpop.xlane.xlu0 %1617 }
 0xb5b   : > { %v1622_v30 = vsub.f32 %v1607_v21, %v1618_v28 }
 0xb5c   : > { %v1626_v31 = vmul.f32 1.442695, %v1623_v26 }
 0xb5d   : > { %v1624_v32 = vmul.f32 1.442695, %v1622_v30  ;;  %v1728_v60 = vpop.permute.xlu1 %1727 }
 0xb5e   : > { %8904 = vpow2.f32 %v1626_v31  ;;  %v1749_v6 = vsel %vm936_vm1, %v9401_v4, %v1728_v60  ;;  %v1851_v4 = vrot.slane %v9338_v2, %v9492_v14 }
 0xb5f   : > { %8906 = vpow2.f32 %v1624_v32 }
 0xb61   : > { %v1730_v61 = vpop.permute.xlu1 %1729 }
 0xb62   : > { %v1750_v8 = vsel %vm936_vm1, %v9399_v0, %v1730_v61 }
 0xb65   : > { %v1736_v5 = vpop.permute.xlu1 %1735 }
 0xb66   : > { %v1752_v9 = vsel %vm1751_vm3, %v1749_v6, %v1736_v5 }
 0xb68   : > { %v8905_v34 = vpop.eup %8904 }
 0xb69   : > { %v1631_v35 = vsel %vm936_vm1, %v8905_v34, 0.0  ;;  %v8907_v36 = vpop.eup %8906 }
 0xb6a   : > { %1632 = vadd.xlane.f32.xlu0 %v1631_v35  ;;  %v1628_v37 = vsel %vm936_vm1, %v8907_v36, 0.0 }
 0xb6e   : > { %1629 = vadd.xlane.f32.xlu0 %v1628_v37  ;;  %v1892_v37 = vld [vmem:[%s10775_s8] sm:$0xff] }
 0xb84   : > { %8767 = vrot.lane.b32.xlu0 %v9365_v29, %s10797_s1  ;;  %v1757_v29 = vld [vmem:[%s10774_s7] sm:$0xff]  ;;  %s10835_s1 = smov 64  }
 0xb85   : > { %v8226_v50 = vpack.c.bf16 %v1758_v48, %v1757_v29 }
 0xb88   : > { %1737 = vrot.lane.b32.xlu0 %v7595_v15, %s10801_s4  ;;  %s10839_s4 = smov 80  }
 0xbf7   : > { %v1633_v38 = vpop.xlane.xlu0 %1632 }
 0xbf8   : > { %8908 = vrcp.f32 %v1633_v38  ;;  %v1893_v38 = vld [vmem:[%s10775_s8 + $0x8] sm:$0xff] }
 0xbfb   : > { %v1630_v39 = vpop.xlane.xlu0 %1629 }
 0xbfc   : > { %8910 = vrcp.f32 %v1630_v39  ;;  %v8242_v39 = vpack.c.bf16 %v1893_v38, %v1892_v37  ;;  %v6945_v37 = vld [vmem:[%s10776_s9] ss:$0 sm:$0xff] }
 0xbfe   : > { %8243 = vmatprep.subr.bf16.mxu0 %v8242_v39 }
 0xbff   : > { %v8768_v40 = vpop.permute.xlu0 %8767  ;;  %8245 = vmatpush3.bf16.msra.mxu0 %v8242_v39 }
 0xc00   : > { %v8770_v41 = vunpack.i.h.bf16 %v8768_v40  ;;  %v8769_v42 = vunpack.i.l.bf16 %v8768_v40  ;;  %v1894_v40 = vld [vmem:[%s10775_s8 + $0x10] sm:$0xff] }
 0xc02   : > { %v8222_v43 = vpack.c.bf16 %v8770_v41, %v8769_v42  ;;  %v8909_v44 = vpop.eup %8908  ;;  %v1895_v41 = vld [vmem:[%s10775_s8 + $0x18] sm:$0xff] }
 0xc03   : > { %v1637_v47 = vmul.f32 %v8909_v44, %v8905_v34  ;;  %v1738_v62 = vpop.permute.xlu0 %1737  ;;  %v8246_v42 = vpack.c.bf16 %v1895_v41, %v1894_v40  ;;  %v1897_v44 = vld [vmem:[%s10775_s8 + $0x28] sm:$0xff] }
 0xc04   : > { %8223 = vmatprep.subr.bf16.mxu1 %v8222_v43  ;;  %v1753_v11 = vsel %vm1751_vm3, %v1750_v8, %v1738_v62  ;;  %v2043_v8 = vld [vmem:[%s10777_s10 + $0x8] sm:$0xff] }
 0xc05   : > { %8225 = vmatpush3.bf16.msra.mxu1 %v8222_v43  ;;  %8247 = vmatprep.subr.bf16.mxu0 %v8246_v42  ;;  %v1896_v43 = vld [vmem:[%s10775_s8 + $0x20] sm:$0xff] }
 0xc06   : > { %v8911_v45 = vpop.eup %8910  ;;  %8227 = vmatprep.subr.bf16.mxu1 %v8226_v50  ;;  %8249 = vmatpush3.bf16.msra.mxu0 %v8246_v42 }
 0xc07   : > { %v1636_v46 = vmul.f32 %v8911_v45, %v8907_v36  ;;  %v8250_v45 = vpack.c.bf16 %v1897_v44, %v1896_v43 }
 0xc09   : > { %7607 = vmatprep.mubr.msk.f32.mxu1 %vm936_vm1, %v1636_v46  ;;  %8251 = vmatprep.subr.bf16.mxu0 %v8250_v45  ;;  %v1898_v46 = vld [vmem:[%s10775_s8 + $0x30] sm:$0xff] }
 0xc0a   : > { %7608 = vmatmul.mubr.msk.f32.vlgmr.msra.gmra.mrb[8].mxu1 %vm936_vm1, %v1637_v47  ;;  %8253 = vmatpush3.bf16.msra.mxu0 %v8250_v45  ;;  %v1899_v47 = vld [vmem:[%s10775_s8 + $0x38] sm:$0xff] }
 0xc0b   : > { %8229 = vmatpush3.bf16.msra.mxu1 %v8226_v50  ;;  %v8254_v29 = vpack.c.bf16 %v1899_v47, %v1898_v46 }
 0xc0c   : > { %8231 = vmatprep.subr.bf16.mxu1 %v8230_v53 }
 0xc0d   : > { %8255 = vmatprep.subr.bf16.mxu0 %v8254_v29 }
 0xc0e   : > { %8257 = vmatpush3.bf16.msra.mxu0 %v8254_v29 }
 0xc0f   : > { %8233 = vmatpush3.bf16.msra.mxu1 %v8230_v53 }
 0xc10   : > { %8235 = vmatprep.subr.bf16.mxu1 %v8234_v56 }
 0xc13   : > { %8237 = vmatpush3.bf16.msra.mxu1 %v8234_v56  ;;  %v9538_v56 = vsub.s32 3, %v9330_v63 }
 0xc14   : > { %8239 = vmatprep.subr.bf16.mxu1 %v8238_v17 }
 0xc17   : > { %8241 = vmatpush3.bf16.msra.mxu1 %v8238_v17 }
 0xcdd   : > { %v7609_v23 = vpop.f32.mrb[8].mxu1 }
 0xcde   : > { %1745 = vrot.lane.b32.xlu0 %v7609_v23, %s10834_s28  ;;  %v1716_v58 = vpop.f32.mrb[9].mxu1  ;;  %v1889_v23 = vrot.slane %v9338_v2, %v9538_v56 }
 0xcdf   : > { %1743 = vrot.lane.b32.xlu1 %v1716_v58, %s10834_s28 }
 0xd50   : > { %v1746_v7 = vpop.permute.xlu0 %1745 }
 0xd51   : > { %v1744_v10 = vpop.permute.xlu1 %1743  ;;  %v1756_v13 = vsel %vm1754_vm4, %v1753_v11, %v1746_v7  ;;  %v2042_v7 = vld [vmem:[%s10777_s10] sm:$0xff]  ;;  %v2045_v11 = vld [vmem:[%s10777_s10 + $0x18] sm:$0xff] }
 0xd52   : > { %v1755_v12 = vsel %vm1754_vm4, %v1752_v9, %v1744_v10  ;;  %v8258_v9 = vpack.c.bf16 %v2043_v8, %v2042_v7  ;;  %v2044_v10 = vld [vmem:[%s10777_s10 + $0x10] sm:$0xff] }
 0xd53   : > { %7626 = vmatprep.mubr.msk.f32.mxu1 %vm697_vm0, %v1755_v12  ;;  %v8262_v12 = vpack.c.bf16 %v2045_v11, %v2044_v10 }
 0xd54   : > { %7627 = vmatmul.mubr.msk.f32.vlgmr.msra.gmra.mrb[10].mxu1 %vm697_vm0, %v1756_v13  ;;  %8259 = vmatprep.subr.bf16.mxu1 %v8258_v9  ;;  %v2046_v13 = vld [vmem:[%s10777_s10 + $0x20] sm:$0xff] }
 0xd55   : > { %8261 = vmatpush3.bf16.msra.mxu1 %v8258_v9 }
 0xd56   : > { %8263 = vmatprep.subr.bf16.mxu1 %v8262_v12 }
 0xd59   : > { %8265 = vmatpush3.bf16.msra.mxu1 %v8262_v12 }
 0xe27   : > { %v7628_v0 = vpop.f32.mrb[10].mxu1 }
 0xe28   : > { %v1847_v15 = vadd.f32 %v7628_v0, %v9270_v19  ;;  %v1837_v16 = vpop.f32.mrb[11].mxu1 }
 0xe29   : > { %v1846_v20 = vadd.f32 %v1837_v16, %v9268_v18  ;;  %v2049_v16 = vld [vmem:[%s10777_s10 + $0x38] sm:$0xff] }
 0xe2a   : > { %v9498_v21 = vadd.f32 %v1851_v4, %v1847_v15  ;;  %v2048_v15 = vld [vmem:[%s10777_s10 + $0x30] sm:$0xff] }
 0xe2b   : > { %v9500_v22 = vadd.f32 %v1851_v4, %v1846_v20  ;;  %v2047_v4 = vld [vmem:[%s10777_s10 + $0x28] sm:$0xff]  ;;  %v8270_v20 = vpack.c.bf16 %v2049_v16, %v2048_v15 }
 0xe2c   : > { %v1857_v24 = vsel %vm697_vm0, %v9498_v21, 0.0  ;;  %v8266_v0 = vpack.c.bf16 %v2047_v4, %v2046_v13 }
 0xe2d   : > { %1858 = vadd.xlane.f32.xlu0 %v1857_v24  ;;  %v1854_v25 = vsel %vm697_vm0, %v9500_v22, 0.0  ;;  %v2050_v24 = vld [vmem:[%s10777_s10 + $0x40] sm:$0xff] }
 0xe2e   : > { %1855 = vadd.xlane.f32.xlu1 %v1854_v25  ;;  %8267 = vmatprep.subr.bf16.mxu1 %v8266_v0  ;;  %v2051_v25 = vld [vmem:[%s10777_s10 + $0x48] sm:$0xff] }
 0xe2f   : > { %8269 = vmatpush3.bf16.msra.mxu1 %v8266_v0 }
 0xe30   : > { %8271 = vmatprep.subr.bf16.mxu1 %v8270_v20 }
 0xe33   : > { %8273 = vmatpush3.bf16.msra.mxu1 %v8270_v20 }
 0xeba   : > { %v1859_v26 = vpop.xlane.xlu0 %1858 }
 0xebb   : > { %v1861_v28 = vmul.f32 0.015625, %v1859_v26  ;;  %v1856_v30 = vpop.xlane.xlu1 %1855  ;;  %v8274_v26 = vpack.c.bf16 %v2051_v25, %v2050_v24 }
 0xebc   : > { %v1860_v31 = vmul.f32 0.015625, %v1856_v30  ;;  %v2053_v30 = vld [vmem:[%s10777_s10 + $0x58] sm:$0xff] }
 0xebd   : > { %v1863_v19 = vsub.f32 %v9498_v21, %v1861_v28  ;;  %8275 = vmatprep.subr.bf16.mxu1 %v8274_v26  ;;  %v2052_v28 = vld [vmem:[%s10777_s10 + $0x50] sm:$0xff] }
 0xebe   : > { %v1862_v18 = vsub.f32 %v9500_v22, %v1860_v31  ;;  %8277 = vmatpush3.bf16.msra.mxu1 %v8274_v26  ;;  %v8278_v31 = vpack.c.bf16 %v2053_v30, %v2052_v28  ;;  %v9103_v30 = vmov -1.0  }
 0xebf   : > { %v1865_v35 = vmul.f32 %v1863_v19, %v1863_v19 }
 0xec0   : > { %v1864_v32 = vmul.f32 %v1862_v18, %v1862_v18  ;;  %8279 = vmatprep.subr.bf16.mxu1 %v8278_v31 }
 0xec1   : > { %v1869_v36 = vsel %vm697_vm0, %v1865_v35, 0.0  ;;  %v2057_v35 = vld [vmem:[%s10777_s10 + $0x78] sm:$0xff] }
 0xec2   : > { %v1866_v34 = vsel %vm697_vm0, %v1864_v32, 0.0  ;;  %8281 = vmatpush3.bf16.msra.mxu1 %v8278_v31 }
 0xec3   : > { %1867 = vadd.xlane.f32.xlu0 %v1866_v34  ;;  %v2056_v34 = vld [vmem:[%s10777_s10 + $0x70] sm:$0xff] }
 0xec7   : > { %1870 = vadd.xlane.f32.xlu0 %v1869_v36  ;;  %v8286_v36 = vpack.c.bf16 %v2057_v35, %v2056_v34 }
 0xf50   : > { %v1868_v48 = vpop.xlane.xlu0 %1867 }
 0xf51   : > { %v1872_v49 = vmul.f32 0.015625, %v1868_v48 }
 0xf53   : > { %v1874_v50 = vadd.f32 1e-05, %v1872_v49 }
 0xf54   : > { %v1871_v52 = vpop.xlane.xlu0 %1870 }
 0xf55   : > { %8912 = vrsqrt.f32 %v1874_v50  ;;  %v1873_v53 = vmul.f32 0.015625, %v1871_v52 }
 0xf57   : > { %v1875_v54 = vadd.f32 1e-05, %v1873_v53 }
 0xf59   : > { %8914 = vrsqrt.f32 %v1875_v54 }
 0xf5f   : > { %v8913_v27 = vpop.eup %8912 }
 0xf60   : > { %v1878_v17 = vmul.f32 %v8913_v27, %v1862_v18  ;;  %v2055_v18 = vld [vmem:[%s10777_s10 + $0x68] sm:$0xff] }
 0xf62   : > { %v1884_v58 = vmul.f32 %v1883_v57, %v1878_v17 }
 0xf63   : > { %v8915_v60 = vpop.eup %8914 }
 0xf64   : > { %v1879_v61 = vmul.f32 %v8915_v60, %v1863_v19  ;;  %v1890_v62 = vadd.f32 %v1889_v23, %v1884_v58  ;;  %v2054_v19 = vld [vmem:[%s10777_s10 + $0x60] sm:$0xff] }
 0xf65   : > { %v8282_v32 = vpack.c.bf16 %v2055_v18, %v2054_v19 }
 0xf66   : > { %v1885_v5 = vmul.f32 %v1883_v57, %v1879_v61  ;;  %7645 = vmatprep.mubr.msk.f32.mxu0 %vm697_vm0, %v1890_v62 }
 0xf67   : > { %8283 = vmatprep.subr.bf16.mxu1 %v8282_v32 }
 0xf68   : > { %v1891_v6 = vadd.f32 %v1889_v23, %v1885_v5  ;;  %8285 = vmatpush3.bf16.msra.mxu1 %v8282_v32 }
 0xf69   : > { %8287 = vmatprep.subr.bf16.mxu1 %v8286_v36 }
 0xf6a   : > { %7646 = vmatmul.mubr.msk.f32.vlgmr.msra.gmra.mrb[12].mxu0 %vm697_vm0, %v1891_v6 }
 0xf6b   : > { %2279 = vmatprep.mubr.f32.mxu0 %v9095_v51 }
 0xf6c   : > { %8289 = vmatpush3.bf16.msra.mxu1 %v8286_v36 }
0x103d   : > { %v7647_v38 = vpop.f32.mrb[12].mxu0 }
0x103e   : > { %v1985_v39 = vadd.f32 %v7647_v38, %v6945_v37  ;;  %v1979_v40 = vpop.f32.mrb[13].mxu0 }
0x103f   : > { %v1980_v41 = vadd.f32 %v6945_v37, %v1979_v40 }
0x1040   : > { %v1991_v42 = vmul.f32 0.70710677, %v1985_v39  ;;  %v1989_v38 = vmul.f32 0.5, %v1985_v39 }
0x1041   : > { %v1990_v43 = vmul.f32 0.70710677, %v1980_v41  ;;  %v1988_v36 = vmul.f32 0.5, %v1980_v41 }
0x1042   : > { %v1997_v44 = vand.u32 2147483647, %v1991_v42  ;;  %vm1993_vm5 = vcmp.ge.f32.partialorder %v1991_v42, 0.0  ;;  %v9601_v42 = vsub.s32 5, %v9330_v63 }
0x1043   : > { %v1996_v45 = vand.u32 2147483647, %v1990_v43  ;;  %vm1992_vm6 = vcmp.ge.f32.partialorder %v1990_v43, 0.0  ;;  %v1995_v31 = vsel %vm1993_vm5, 1.0, %v9103_v30 }
0x1044   : > { %v1999_v46 = vmul.f32 0.3275911, %v1997_v44  ;;  %v2025_v49 = vsub.f32 0.0, %v1997_v44  ;;  %v1994_v32 = vsel %vm1992_vm6, 1.0, %v9103_v30  ;;  %v2061_v43 = vrot.slane %v9338_v2, %v9601_v42 }
0x1045   : > { %v1998_v47 = vmul.f32 0.3275911, %v1996_v45  ;;  %v2024_v50 = vsub.f32 0.0, %v1996_v45 }
0x1046   : > { %v2001_v29 = vadd.f32 1.0, %v1999_v46  ;;  %v2027_v53 = vmul.f32 %v2025_v49, %v1997_v44 }
0x1047   : > { %v2000_v48 = vadd.f32 1.0, %v1998_v47  ;;  %v2026_v27 = vmul.f32 %v2024_v50, %v1996_v45 }
0x1048   : > { %8916 = vrcp.f32 %v2001_v29  ;;  %v2030_v58 = vmul.f32 1.442695, %v2027_v53 }
0x1049   : > { %8918 = vrcp.f32 %v2000_v48  ;;  %v2028_v62 = vmul.f32 1.442695, %v2026_v27 }
0x104a   : > { %8920 = vpow2.f32 %v2030_v58  ;;  %v6952_v58 = vld [vmem:[%s10830_s22 + $0x98] sm:$0xff] }
0x104b   : > { %8922 = vpow2.f32 %v2028_v62  ;;  %v6951_v62 = vld [vmem:[%s10830_s22 + $0x90] sm:$0xff] }
0x1052   : > { %v8917_v52 = vpop.eup %8916 }
0x1053   : > { %v8919_v54 = vpop.eup %8918  ;;  %v2007_v57 = vmul.f32 1.0614054, %v8917_v52 }
0x1054   : > { %v2006_v17 = vmul.f32 1.0614054, %v8919_v54  ;;  %v8921_v16 = vpop.eup %8920 }
0x1055   : > { %v2009_v23 = vadd.f32 -1.4531521, %v2007_v57  ;;  %v8923_v24 = vpop.eup %8922 }
0x1056   : > { %v2008_v60 = vadd.f32 -1.4531521, %v2006_v17 }
0x1057   : > { %v2011_v61 = vmul.f32 %v8917_v52, %v2009_v23  ;;  %v6950_v23 = vld [vmem:[%s10830_s22 + $0x88] sm:$0xff] }
0x1058   : > { %v2010_v5 = vmul.f32 %v8919_v54, %v2008_v60  ;;  %v8290_v60 = vpack.c.bf16 %v6952_v58, %v6950_v23 }
0x1059   : > { %v2013_v6 = vadd.f32 1.4214138, %v2011_v61  ;;  %v6949_v61 = vld [vmem:[%s10830_s22 + $0x80] sm:$0xff] }
0x105a   : > { %v2012_v7 = vadd.f32 1.4214138, %v2010_v5  ;;  %v8292_v5 = vpack.c.bf16 %v6951_v62, %v6949_v61  ;;  %8291 = vmatprep.subr.bf16.mxu0 %v8290_v60 }
0x105b   : > { %v2015_v8 = vmul.f32 %v8917_v52, %v2013_v6  ;;  %v6954_v6 = vld [vmem:[%s10830_s22 + $0xa8] sm:$0xff] }
0x105c   : > { %v2014_v9 = vmul.f32 %v8919_v54, %v2012_v7  ;;  %8293 = vmatpush1.bf16.msra.mxu0 %v8292_v5  ;;  %v6956_v7 = vld [vmem:[%s10830_s22 + $0xb8] sm:$0xff] }
0x105d   : > { %v2017_v10 = vadd.f32 -0.28449672, %v2015_v8  ;;  %v8294_v8 = vpack.c.bf16 %v6956_v7, %v6954_v6 }
0x105e   : > { %v2016_v11 = vadd.f32 -0.28449672, %v2014_v9  ;;  %v6953_v9 = vld [vmem:[%s10830_s22 + $0xa0] sm:$0xff] }
0x105f   : > { %v2019_v12 = vmul.f32 %v8917_v52, %v2017_v10  ;;  %v6955_v10 = vld [vmem:[%s10830_s22 + $0xb0] sm:$0xff]  ;;  %8295 = vmatprep.subr.bf16.mxu0 %v8294_v8 }
0x1060   : > { %v2018_v13 = vmul.f32 %v8919_v54, %v2016_v11  ;;  %v8296_v11 = vpack.c.bf16 %v6955_v10, %v6953_v9 }
0x1061   : > { %v2021_v4 = vadd.f32 0.2548296, %v2019_v12  ;;  %v6958_v12 = vld [vmem:[%s10830_s22 + $0xc8] sm:$0xff] }
0x1062   : > { %v2020_v0 = vadd.f32 0.2548296, %v2018_v13  ;;  %8297 = vmatpush1.bf16.msra.mxu0 %v8296_v11  ;;  %v6960_v13 = vld [vmem:[%s10830_s22 + $0xd8] sm:$0xff] }
0x1063   : > { %v2023_v15 = vmul.f32 %v8917_v52, %v2021_v4  ;;  %v8298_v4 = vpack.c.bf16 %v6960_v13, %v6958_v12 }
0x1064   : > { %v2022_v20 = vmul.f32 %v8919_v54, %v2020_v0  ;;  %v6957_v0 = vld [vmem:[%s10830_s22 + $0xc0] sm:$0xff] }
0x1065   : > { %v2033_v25 = vmul.f32 %v8921_v16, %v2023_v15  ;;  %v6959_v15 = vld [vmem:[%s10830_s22 + $0xd0] sm:$0xff]  ;;  %8299 = vmatprep.subr.bf16.mxu0 %v8298_v4 }
0x1066   : > { %v2032_v26 = vmul.f32 %v8923_v24, %v2022_v20  ;;  %v8300_v16 = vpack.c.bf16 %v6959_v15, %v6957_v0  ;;  %v6962_v20 = vld [vmem:[%s10830_s22 + $0xe8] sm:$0xff]  ;;  %v6964_v24 = vld [vmem:[%s10830_s22 + $0xf8] sm:$0xff] }
0x1067   : > { %v2035_v28 = vsub.f32 1.0, %v2033_v25  ;;  %v8302_v25 = vpack.c.bf16 %v6964_v24, %v6962_v20 }
0x1068   : > { %v2034_v19 = vsub.f32 1.0, %v2032_v26  ;;  %8301 = vmatpush1.bf16.msra.mxu0 %v8300_v16  ;;  %v6961_v26 = vld [vmem:[%s10830_s22 + $0xe0] sm:$0xff] }
0x1069   : > { %v2037_v18 = vmul.f32 %v2035_v28, %v1995_v31  ;;  %v6963_v28 = vld [vmem:[%s10830_s22 + $0xf0] sm:$0xff]  ;;  %8303 = vmatprep.subr.bf16.mxu0 %v8302_v25 }
0x106a   : > { %v2036_v34 = vmul.f32 %v2034_v19, %v1994_v32  ;;  %v8304_v31 = vpack.c.bf16 %v6963_v28, %v6961_v26 }
0x106b   : > { %v2039_v35 = vadd.f32 1.0, %v2037_v18 }
0x106c   : > { %v2038_v37 = vadd.f32 1.0, %v2036_v34  ;;  %8305 = vmatpush1.bf16.msra.mxu0 %v8304_v31 }
0x106d   : > { %v2041_v44 = vmul.f32 %v2039_v35, %v1989_v38 }
0x106e   : > { %v2040_v40 = vmul.f32 %v2038_v37, %v1988_v36  ;;  %v9670_v37 = vld [vmem:[%s10831_s24 + $0x8] sm:$0xff] }
0x1070   : > { %7680 = vmatprep.mubr.f32.mxu1 %v2040_v40  ;;  %v2170_v40 = vrot.slane %v9670_v37, %v9333_v1 }
0x1071   : > { %7681 = vmatmul.mubr.f32.vlgmr.msra.gmra.mrb[12].mxu1 %v2041_v44 }
0x1144   : > { %v7682_v45 = vpop.f32.mrb[12].mxu1 }
0x1145   : > { %v2134_v46 = vadd.f32 %v7682_v45, %v2061_v43  ;;  %v2128_v47 = vpop.f32.mrb[13].mxu1  ;;  %v2176_v45 = vrot.slane %v9670_v37, %v9341_v3 }
0x1146   : > { %v2129_v29 = vadd.f32 %v2128_v47, %v2061_v43 }
0x1147   : > { %v9606_v48 = vadd.f32 %v2134_v46, %v9498_v21 }
0x1148   : > { %v9609_v41 = vadd.f32 %v2129_v29, %v9500_v22 }
0x1149   : > { %v2144_v39 = vsel %vm697_vm0, %v9606_v48, 0.0 }
0x114a   : > { %2145 = vadd.xlane.f32.xlu0 %v2144_v39  ;;  %v2141_v49 = vsel %vm697_vm0, %v9609_v41, 0.0 }
0x114b   : > { %2142 = vadd.xlane.f32.xlu1 %v2141_v49 }
0x11d7   : > { %v2146_v50 = vpop.xlane.xlu0 %2145 }
0x11d8   : > { %v2148_v2 = vmul.f32 0.015625, %v2146_v50  ;;  %v2143_v52 = vpop.xlane.xlu1 %2142  ;;  %v6965_v50 = vld [vmem:[%s10773_s6 + $0x2] sm:$0x3] }
0x11d9   : > { %v2147_v53 = vmul.f32 0.015625, %v2143_v52 }
0x11da   : > { %v2150_v54 = vsub.f32 %v9606_v48, %v2148_v2  ;;  %v2202_v2 = vrot.slane %v6965_v50, %v9333_v1 }
0x11db   : > { %v2149_v21 = vsub.f32 %v9609_v41, %v2147_v53 }
0x11dc   : > { %v2152_v57 = vmul.f32 %v2150_v54, %v2150_v54 }
0x11dd   : > { %v2151_v27 = vmul.f32 %v2149_v21, %v2149_v21 }
0x11de   : > { %v2156_v22 = vsel %vm697_vm0, %v2152_v57, 0.0 }
0x11df   : > { %2157 = vadd.xlane.f32.xlu0 %v2156_v22  ;;  %v2153_v17 = vsel %vm697_vm0, %v2151_v27, 0.0 }
0x11e0   : > { %2154 = vadd.xlane.f32.xlu1 %v2153_v17 }
0x126c   : > { %v2158_v19 = vpop.xlane.xlu0 %2157 }
0x126d   : > { %v2160_v18 = vmul.f32 0.015625, %v2158_v19  ;;  %v2155_v32 = vpop.xlane.xlu1 %2154 }
0x126e   : > { %v2159_v34 = vmul.f32 0.015625, %v2155_v32 }
0x126f   : > { %v2162_v35 = vadd.f32 1e-05, %v2160_v18 }
0x1270   : > { %v2161_v36 = vadd.f32 1e-05, %v2159_v34 }
0x1271   : > { %8924 = vrsqrt.f32 %v2162_v35 }
0x1272   : > { %8926 = vrsqrt.f32 %v2161_v36 }
0x127b   : > { %v8925_v38 = vpop.eup %8924 }
0x127c   : > { %v8927_v44 = vpop.eup %8926  ;;  %v2166_v46 = vmul.f32 %v8925_v38, %v2150_v54 }
0x127d   : > { %v2165_v43 = vmul.f32 %v8927_v44, %v2149_v21  ;;  %v2206_v21 = vrot.slane %v6965_v50, %v9341_v3 }
0x127e   : > { %v2172_v39 = vmul.f32 %v2170_v40, %v2166_v46 }
0x127f   : > { %v2171_v47 = vmul.f32 %v2170_v40, %v2165_v43 }
0x1280   : > { %v2178_v49 = vadd.f32 %v2176_v45, %v2172_v39 }
0x1281   : > { %v2177_v29 = vadd.f32 %v2176_v45, %v2171_v47 }
0x1283   : > { %6966 = vmatmul.mubr.msk.f32.vlgmr.msra.gmra.mrb[14].mxu0 %vm697_vm0, %v2177_v29 }
0x1284   : > { %2285 = vmatprep.mubr.f32.mxu0 %v9095_v51 }
0x1287   : > { %6967 = vmatmul.mubr.msk.f32.gmra.mrb[16].mxu0 %vm697_vm0, %v2178_v49 }
0x1356   : > { %v2281_v52 = vpop.f32.mrb[14].mxu0 }
0x1357   : > { %v9683_v53 = vadd.f32 %v2281_v52, %v2202_v2  ;;  %v2283_v54 = vpop.f32.mrb[15].mxu0 }
0x1358   : > { %v2284_v17 = vadd.f32 %v2283_v54, %v2206_v21 }
0x1359   : > { %7687 = vmatprep.mubr.msk.f32.mxu0 %vm936_vm1, %v9683_v53 }
0x135a   : > { %v2287_v57 = vpop.f32.mrb[16].mxu0 }
0x135b   : > { %v9688_v27 = vadd.f32 %v2287_v57, %v2202_v2  ;;  %v2289_v22 = vpop.f32.mrb[17].mxu0 }
0x135c   : > { %v2290_v23 = vadd.f32 %v2289_v22, %v2206_v21 }
0x135d   : > { %v9692_v58 = vpack.i.bf16 %v9688_v27, %v9683_v53 }
0x135e   : > { %v8312_v60 = vpack.c.bf16 %v2290_v23, %v2284_v17  ;;  %v9694_v61 = vpack.i.bf16 %v2290_v23, %v2284_v17 }
0x135f   : > { %8772 = vrot.lane.b32.xlu1 %v9692_v58, %s10835_s1 }
0x1363   : > { %8777 = vrot.lane.b32.xlu1 %v9692_v58, %s10834_s28 }
0x1367   : > { %2486 = vrot.lane.b32.xlu1 %v9688_v27, %s10836_s26 }
0x13d1   : > { %v8773_v62 = vpop.permute.xlu1 %8772 }
0x13d2   : > { %v8775_v5 = vunpack.i.h.bf16 %v8773_v62  ;;  %v8774_v6 = vunpack.i.l.bf16 %v8773_v62 }
0x13d4   : > { %v8306_v7 = vpack.c.bf16 %v8775_v5, %v8774_v6 }
0x13d5   : > { %v8778_v8 = vpop.permute.xlu1 %8777 }
0x13d6   : > { %8308 = vmatprep.subr.msk.bf16.mxu0 %vm9375_vm2, %v8306_v7  ;;  %v8780_v9 = vunpack.i.h.bf16 %v8778_v8  ;;  %v8779_v10 = vunpack.i.l.bf16 %v8778_v8 }
0x13d7   : > { %8311 = vmatpush3.bf16.xpose.msk.msra.mxu0 %vm9375_vm2, %v8306_v7 }
0x13d8   : > { %8313 = vmatprep.subr.bf16.mxu0 %v8312_v60  ;;  %v8316_v11 = vpack.c.bf16 %v8780_v9, %v8779_v10 }
0x13d9   : > { %v2487_v43 = vpop.permute.xlu1 %2486 }
0x13de   : > { %7688 = vmatmul.mubr.msk.f32.vlgmr.msra.gmra.mrb[18].mxu0 %vm936_vm1, %v9688_v27 }
0x13df   : > { %8315 = vmatpush3.bf16.msra.mxu0 %v8312_v60 }
0x13e0   : > { %8318 = vmatprep.subr.msk.bf16.mxu0 %vm9375_vm2, %v8316_v11 }
0x14b1   : > { %v7689_v12 = vpop.f32.mrb[18].mxu0 }
0x14b2   : > { %v2372_v13 = vpop.f32.mrb[19].mxu0  ;;  %v2384_v0 = vsel %vm936_vm1, %v7689_v12, -inf }
0x14b3   : > { %v2381_v4 = vsel %vm936_vm1, %v2372_v13, -inf }
0x14b4   : > { %2382 = vmax.xlane.f32.xlu0 %v2381_v4 }
0x14b8   : > { %2385 = vmax.xlane.f32.xlu0 %v2384_v0 }
0x1541   : > { %v2383_v15 = vpop.xlane.xlu0 %2382 }
0x1542   : > { %v2387_v16 = vsub.f32 %v2372_v13, %v2383_v15 }
0x1544   : > { %v2389_v20 = vmul.f32 1.442695, %v2387_v16 }
0x1545   : > { %v2386_v24 = vpop.xlane.xlu0 %2385 }
0x1546   : > { %8928 = vpow2.f32 %v2389_v20  ;;  %v2388_v25 = vsub.f32 %v7689_v12, %v2386_v24 }
0x1548   : > { %v2391_v26 = vmul.f32 1.442695, %v2388_v25 }
0x154a   : > { %8930 = vpow2.f32 %v2391_v26 }
0x1550   : > { %v8929_v28 = vpop.eup %8928 }
0x1551   : > { %v2393_v31 = vsel %vm936_vm1, %v8929_v28, 0.0 }
0x1552   : > { %2394 = vadd.xlane.f32.xlu0 %v2393_v31 }
0x1554   : > { %v8931_v19 = vpop.eup %8930 }
0x1555   : > { %v2396_v18 = vsel %vm936_vm1, %v8931_v19, 0.0 }
0x1556   : > { %2397 = vadd.xlane.f32.xlu0 %v2396_v18 }
0x156c   : > { %2484 = vrot.lane.b32.xlu0 %v9683_v53, %s10836_s26 }
0x15df   : > { %v2395_v32 = vpop.xlane.xlu0 %2394 }
0x15e0   : > { %8932 = vrcp.f32 %v2395_v32 }
0x15e3   : > { %v2398_v34 = vpop.xlane.xlu0 %2397 }
0x15e4   : > { %8934 = vrcp.f32 %v2398_v34 }
0x15e7   : > { %v2485_v44 = vpop.permute.xlu0 %2484 }
0x15ea   : > { %v8933_v35 = vpop.eup %8932 }
0x15eb   : > { %v2401_v36 = vmul.f32 %v8933_v35, %v8929_v28 }
0x15ed   : > { %7694 = vmatprep.mubr.msk.f32.mxu0 %vm936_vm1, %v2401_v36 }
0x15ee   : > { %v8935_v38 = vpop.eup %8934 }
0x15ef   : > { %v2402_v40 = vmul.f32 %v8935_v38, %v8931_v19 }
0x15f1   : > { %7695 = vmatmul.mubr.msk.f32.vlgmr.msra.gmra.mrb[20].mxu0 %vm936_vm1, %v2402_v40 }
0x15f2   : > { %8321 = vmatpush3.bf16.xpose.msk.msra.mxu0 %vm9375_vm2, %v8316_v11  ;;  %7701 = vmatprep.mubr.msk.f32.mxu0 %vm936_vm1, %v2485_v44 }
0x15f9   : > { %7702 = vmatmul.mubr.msk.f32.vlgmr.msra.gmra.mrb[22].mxu0 %vm936_vm1, %v2487_v43 }
0x16c4   : > { %v9722_v45 = vpop.f32.mrb[20].mxu0 }
0x16c5   : > { %v9724_v46 = vpop.f32.mrb[21].mxu0 }
0x16cc   : > { %v7703_v47 = vpop.f32.mrb[22].mxu0 }
0x16cd   : > { %v2566_v29 = vpop.f32.mrb[23].mxu0  ;;  %v2578_v39 = vsel %vm936_vm1, %v7703_v47, -inf }
0x16ce   : > { %2579 = vmax.xlane.f32.xlu0 %v2578_v39  ;;  %v2575_v49 = vsel %vm936_vm1, %v2566_v29, -inf }
0x16cf   : > { %2576 = vmax.xlane.f32.xlu1 %v2575_v49 }
0x16e0   : > { %8782 = vrot.lane.b32.xlu1 %v9694_v61, %s10836_s26 }
0x16e4   : > { %8787 = vrot.lane.b32.xlu0 %v9692_v58, %s10837_s2  ;;  %2686 = vrot.lane.b32.xlu1 %v9683_v53, %s10838_s29 }
0x175b   : > { %v2580_v50 = vpop.xlane.xlu0 %2579 }
0x175c   : > { %v2582_v2 = vsub.f32 %v7703_v47, %v2580_v50  ;;  %v2577_v52 = vpop.xlane.xlu1 %2576 }
0x175d   : > { %v2581_v54 = vsub.f32 %v2566_v29, %v2577_v52 }
0x175e   : > { %v2585_v21 = vmul.f32 1.442695, %v2582_v2 }
0x175f   : > { %v2583_v57 = vmul.f32 1.442695, %v2581_v54  ;;  %v8788_v22 = vpop.permute.xlu0 %8787 }
0x1760   : > { %8936 = vpow2.f32 %v2585_v21  ;;  %v8783_v17 = vpop.permute.xlu1 %8782  ;;  %v8790_v23 = vunpack.i.h.bf16 %v8788_v22  ;;  %v8789_v60 = vunpack.i.l.bf16 %v8788_v22 }
0x1761   : > { %v8785_v62 = vunpack.i.h.bf16 %v8783_v17  ;;  %v8784_v5 = vunpack.i.l.bf16 %v8783_v17  ;;  %8938 = vpow2.f32 %v2583_v57 }
0x1762   : > { %v8326_v7 = vpack.c.bf16 %v8790_v23, %v8789_v60 }
0x1763   : > { %v8322_v6 = vpack.c.bf16 %v8785_v62, %v8784_v5 }
0x1764   : > { %v2687_v12 = vpop.permute.xlu1 %2686 }
0x1765   : > { %8323 = vmatprep.subr.bf16.mxu1 %v8322_v6 }
0x1766   : > { %8325 = vmatpush3.bf16.msra.mxu1 %v8322_v6 }
0x1767   : > { %8328 = vmatprep.subr.msk.bf16.mxu1 %vm9375_vm2, %v8326_v7 }
0x176a   : > { %v8937_v8 = vpop.eup %8936 }
0x176b   : > { %v2590_v9 = vsel %vm936_vm1, %v8937_v8, 0.0  ;;  %v8939_v10 = vpop.eup %8938 }
0x176c   : > { %2591 = vadd.xlane.f32.xlu1 %v2590_v9  ;;  %v2587_v11 = vsel %vm936_vm1, %v8939_v10, 0.0 }
0x1770   : > { %2588 = vadd.xlane.f32.xlu1 %v2587_v11 }
0x1781   : > { %2688 = vrot.lane.b32.xlu1 %v9688_v27, %s10838_s29 }
0x17f9   : > { %v2592_v13 = vpop.xlane.xlu1 %2591 }
0x17fa   : > { %8940 = vrcp.f32 %v2592_v13 }
0x17fd   : > { %v2589_v4 = vpop.xlane.xlu1 %2588 }
0x17fe   : > { %8942 = vrcp.f32 %v2589_v4 }
0x1801   : > { %v2689_v24 = vpop.permute.xlu1 %2688 }
0x1804   : > { %v8941_v0 = vpop.eup %8940 }
0x1805   : > { %v2596_v20 = vmul.f32 %v8941_v0, %v8937_v8 }
0x1808   : > { %v8943_v15 = vpop.eup %8942 }
0x1809   : > { %v2595_v16 = vmul.f32 %v8943_v15, %v8939_v10 }
0x180b   : > { %7708 = vmatprep.mubr.msk.f32.mxu1 %vm936_vm1, %v2595_v16 }
0x180c   : > { %7709 = vmatmul.mubr.msk.f32.vlgmr.msra.gmra.mrb[14].mxu1 %vm936_vm1, %v2596_v20 }
0x180d   : > { %8331 = vmatpush3.bf16.xpose.msk.msra.mxu1 %vm9375_vm2, %v8326_v7  ;;  %7715 = vmatprep.mubr.msk.f32.mxu1 %vm936_vm1, %v2687_v12 }
0x1814   : > { %7716 = vmatmul.mubr.msk.f32.vlgmr.msra.gmra.mrb[16].mxu1 %vm936_vm1, %v2689_v24 }
0x18df   : > { %v7710_v25 = vpop.f32.mrb[14].mxu1 }
0x18e0   : > { %v9746_v26 = vpop.f32.mrb[15].mxu1 }
0x18e7   : > { %v7717_v28 = vpop.f32.mrb[16].mxu1 }
0x18e8   : > { %v2768_v31 = vpop.f32.mrb[17].mxu1  ;;  %v2780_v19 = vsel %vm936_vm1, %v7717_v28, -inf }
0x18e9   : > { %2781 = vmax.xlane.f32.xlu0 %v2780_v19  ;;  %v2777_v18 = vsel %vm936_vm1, %v2768_v31, -inf }
0x18ea   : > { %2778 = vmax.xlane.f32.xlu1 %v2777_v18 }
0x18fb   : > { %8792 = vrot.lane.b32.xlu1 %v9694_v61, %s10838_s29 }
0x18ff   : > { %2886 = vrot.lane.b32.xlu1 %v9683_v53, %s10839_s4 }
0x1903   : > { %2888 = vrot.lane.b32.xlu1 %v9688_v27, %s10839_s4 }
0x1976   : > { %v2782_v32 = vpop.xlane.xlu0 %2781 }
0x1977   : > { %v2784_v34 = vsub.f32 %v7717_v28, %v2782_v32  ;;  %v2779_v35 = vpop.xlane.xlu1 %2778 }
0x1978   : > { %v2783_v36 = vsub.f32 %v2768_v31, %v2779_v35 }
0x1979   : > { %v2787_v38 = vmul.f32 1.442695, %v2784_v34 }
0x197a   : > { %v2785_v40 = vmul.f32 1.442695, %v2783_v36 }
0x197b   : > { %8944 = vpow2.f32 %v2787_v38  ;;  %v8793_v44 = vpop.permute.xlu1 %8792 }
0x197c   : > { %v8795_v43 = vunpack.i.h.bf16 %v8793_v44  ;;  %v8794_v47 = vunpack.i.l.bf16 %v8793_v44  ;;  %8946 = vpow2.f32 %v2785_v40  ;;  %v6992_v40 = vld [vmem:[%s10774_s7 + $0x40] sm:$0xff]  ;;  %v6994_v44 = vld [vmem:[%s10774_s7 + $0x50] sm:$0xff] }
0x197e   : > { %v8332_v29 = vpack.c.bf16 %v8795_v43, %v8794_v47  ;;  %v6995_v47 = vld [vmem:[%s10774_s7 + $0x58] sm:$0xff] }
0x197f   : > { %v2887_v62 = vpop.permute.xlu1 %2886 }
0x1980   : > { %8333 = vmatprep.subr.bf16.mxu0 %v8332_v29 }
0x1981   : > { %8335 = vmatpush3.bf16.msra.mxu0 %v8332_v29  ;;  %v8350_v29 = vpack.c.bf16 %v6995_v47, %v6994_v44  ;;  %v7008_v44 = vld [vmem:[%s10775_s8 + $0x70] sm:$0xff] }
0x1985   : > { %v8945_v39 = vpop.eup %8944 }
0x1986   : > { %v2792_v53 = vsel %vm936_vm1, %v8945_v39, 0.0  ;;  %v8947_v49 = vpop.eup %8946 }
0x1987   : > { %2793 = vadd.xlane.f32.xlu0 %v2792_v53  ;;  %v2789_v27 = vsel %vm936_vm1, %v8947_v49, 0.0  ;;  %v6997_v53 = vld [vmem:[%s10774_s7 + $0x68] sm:$0xff] }
0x198b   : > { %2790 = vadd.xlane.f32.xlu0 %v2789_v27  ;;  %v6998_v27 = vld [vmem:[%s10774_s7 + $0x70] sm:$0xff] }
0x19a1   : > { %8797 = vrot.lane.b32.xlu0 %v9692_v58, %s10840_s5  ;;  %v2889_v58 = vpop.permute.xlu1 %2888 }
0x1a14   : > { %v2794_v50 = vpop.xlane.xlu0 %2793 }
0x1a15   : > { %8948 = vrcp.f32 %v2794_v50  ;;  %v6999_v50 = vld [vmem:[%s10774_s7 + $0x78] sm:$0xff] }
0x1a18   : > { %v2791_v2 = vpop.xlane.xlu0 %2790 }
0x1a19   : > { %8950 = vrcp.f32 %v2791_v2  ;;  %v8358_v2 = vpack.c.bf16 %v6999_v50, %v6998_v27 }
0x1a1c   : > { %v8798_v52 = vpop.permute.xlu0 %8797 }
0x1a1d   : > { %v8800_v54 = vunpack.i.h.bf16 %v8798_v52  ;;  %v8799_v21 = vunpack.i.l.bf16 %v8798_v52 }
0x1a1f   : > { %v8336_v57 = vpack.c.bf16 %v8800_v54, %v8799_v21  ;;  %v8949_v22 = vpop.eup %8948 }
0x1a20   : > { %v2798_v60 = vmul.f32 %v8949_v22, %v8945_v39  ;;  %v6996_v39 = vld [vmem:[%s10774_s7 + $0x60] sm:$0xff] }
0x1a21   : > { %8338 = vmatprep.subr.msk.bf16.mxu0 %vm9375_vm2, %v8336_v57 }
0x1a23   : > { %v8951_v17 = vpop.eup %8950 }
0x1a24   : > { %v2797_v23 = vmul.f32 %v8951_v17, %v8947_v49  ;;  %v8354_v49 = vpack.c.bf16 %v6997_v53, %v6996_v39 }
0x1a26   : > { %7722 = vmatprep.mubr.msk.f32.mxu0 %vm936_vm1, %v2797_v23 }
0x1a27   : > { %7723 = vmatmul.mubr.msk.f32.vlgmr.msra.gmra.mrb[24].mxu0 %vm936_vm1, %v2798_v60 }
0x1a28   : > { %8341 = vmatpush3.bf16.xpose.msk.msra.mxu0 %vm9375_vm2, %v8336_v57  ;;  %7729 = vmatprep.mubr.msk.f32.mxu0 %vm936_vm1, %v2887_v62 }
0x1a2f   : > { %7730 = vmatmul.mubr.msk.f32.vlgmr.msra.gmra.mrb[26].mxu0 %vm936_vm1, %v2889_v58 }
0x1afa   : > { %v7724_v5 = vpop.f32.mrb[24].mxu0 }
0x1afb   : > { %v2877_v6 = vpop.f32.mrb[25].mxu0 }
0x1b02   : > { %v7731_v7 = vpop.f32.mrb[26].mxu0 }
0x1b03   : > { %v2968_v8 = vpop.f32.mrb[27].mxu0  ;;  %v2980_v9 = vsel %vm936_vm1, %v7731_v7, -inf }
0x1b04   : > { %2981 = vmax.xlane.f32.xlu0 %v2980_v9  ;;  %v2977_v10 = vsel %vm936_vm1, %v2968_v8, -inf }
0x1b05   : > { %2978 = vmax.xlane.f32.xlu1 %v2977_v10 }
0x1b16   : > { %8802 = vrot.lane.b32.xlu1 %v9694_v61, %s10839_s4  ;;  %s674_s4 = scalar_lea.vmem %s10842_s19, %s10854_s25 }
0x1b1a   : > { %3090 = vrot.lane.b32.xlu1 %v7710_v25, %s10840_s5 }
0x1b1e   : > { %3096 = vrot.lane.b32.xlu1 %v2877_v6, %s10837_s2 }
0x1b22   : > { %3098 = vrot.lane.b32.xlu1 %v7724_v5, %s10837_s2 }
0x1b91   : > { %v2982_v11 = vpop.xlane.xlu0 %2981 }
0x1b92   : > { %v2984_v12 = vsub.f32 %v7731_v7, %v2982_v11  ;;  %v2979_v13 = vpop.xlane.xlu1 %2978 }
0x1b93   : > { %v2983_v4 = vsub.f32 %v2968_v8, %v2979_v13 }
0x1b94   : > { %v2987_v0 = vmul.f32 1.442695, %v2984_v12 }
0x1b95   : > { %v2985_v15 = vmul.f32 1.442695, %v2983_v4 }
0x1b96   : > { %v8803_v16 = vpop.permute.xlu1 %8802 }
0x1b97   : > { %8952 = vpow2.f32 %v2985_v15  ;;  %v8805_v20 = vunpack.i.h.bf16 %v8803_v16  ;;  %v8804_v24 = vunpack.i.l.bf16 %v8803_v16 }
0x1b98   : > { %8954 = vpow2.f32 %v2987_v0 }
0x1b99   : > { %v8342_v28 = vpack.c.bf16 %v8805_v20, %v8804_v24 }
0x1b9a   : > { %v3091_v21 = vpop.permute.xlu1 %3090 }
0x1b9b   : > { %8343 = vmatprep.subr.bf16.mxu1 %v8342_v28  ;;  %v3111_v62 = vsel %vm936_vm1, %v9722_v45, %v3091_v21  ;;  %v3249_v21 = vrot.slane %v9670_v37, %v9538_v56 }
0x1b9c   : > { %8345 = vmatpush3.bf16.msra.mxu1 %v8342_v28 }
0x1b9e   : > { %v3097_v57 = vpop.permute.xlu1 %3096 }
0x1ba1   : > { %v8953_v61 = vpop.eup %8952 }
0x1ba2   : > { %v2989_v25 = vsel %vm936_vm1, %v8953_v61, 0.0  ;;  %v8955_v31 = vpop.eup %8954  ;;  %v3099_v17 = vpop.permute.xlu1 %3098 }
0x1ba3   : > { %2990 = vadd.xlane.f32.xlu0 %v2989_v25  ;;  %v2992_v19 = vsel %vm936_vm1, %v8955_v31, 0.0  ;;  %v3113_v6 = vsel %vm1751_vm3, %v3111_v62, %v3099_v17 }
0x1ba7   : > { %2993 = vadd.xlane.f32.xlu0 %v2992_v19  ;;  %v7002_v19 = vld [vmem:[%s10775_s8 + $0x40] sm:$0xff] }
0x1bbd   : > { %3088 = vrot.lane.b32.xlu0 %v9746_v26, %s10840_s5  ;;  %v6993_v26 = vld [vmem:[%s10774_s7 + $0x48] sm:$0xff] }
0x1bbe   : > { %v8346_v43 = vpack.c.bf16 %v6993_v26, %v6992_v40  ;;  %v7007_v40 = vld [vmem:[%s10775_s8 + $0x68] sm:$0xff] }
0x1bc0   : > { %8347 = vmatprep.subr.bf16.mxu1 %v8346_v43 }
0x1c30   : > { %v2991_v18 = vpop.xlane.xlu0 %2990 }
0x1c31   : > { %8956 = vrcp.f32 %v2991_v18  ;;  %v7003_v18 = vld [vmem:[%s10775_s8 + $0x48] sm:$0xff] }
0x1c34   : > { %v2994_v32 = vpop.xlane.xlu0 %2993 }
0x1c35   : > { %8958 = vrcp.f32 %v2994_v32  ;;  %v8362_v32 = vpack.c.bf16 %v7003_v18, %v7002_v19  ;;  %v7029_v19 = vld [vmem:[%s10777_s10 + $0xf8] sm:$0xff] }
0x1c37   : > { %8363 = vmatprep.subr.bf16.mxu0 %v8362_v32 }
0x1c38   : > { %v3089_v22 = vpop.permute.xlu0 %3088  ;;  %8365 = vmatpush3.bf16.msra.mxu0 %v8362_v32  ;;  %v7011_v32 = vld [vmem:[%s10776_s9 + $0x1] ss:$0 sm:$0xff] }
0x1c39   : > { %v3110_v23 = vsel %vm936_vm1, %v9724_v46, %v3089_v22  ;;  %v3211_v46 = vrot.slane %v9670_v37, %v9492_v14 }
0x1c3a   : > { %v3112_v58 = vsel %vm1751_vm3, %v3110_v23, %v3097_v57 }
0x1c3b   : > { %v8957_v34 = vpop.eup %8956 }
0x1c3c   : > { %v2997_v35 = vmul.f32 %v8957_v34, %v8953_v61  ;;  %v7004_v34 = vld [vmem:[%s10775_s8 + $0x50] sm:$0xff] }
0x1c3e   : > { %7736 = vmatprep.mubr.msk.f32.mxu1 %vm936_vm1, %v2997_v35  ;;  %v7005_v35 = vld [vmem:[%s10775_s8 + $0x58] sm:$0xff] }
0x1c3f   : > { %v8959_v36 = vpop.eup %8958 }
0x1c40   : > { %v2998_v38 = vmul.f32 %v8959_v36, %v8955_v31  ;;  %v8366_v36 = vpack.c.bf16 %v7005_v35, %v7004_v34 }
0x1c42   : > { %7737 = vmatmul.mubr.msk.f32.vlgmr.msra.gmra.mrb[18].mxu1 %vm936_vm1, %v2998_v38  ;;  %8367 = vmatprep.subr.bf16.mxu0 %v8366_v36  ;;  %v7006_v38 = vld [vmem:[%s10775_s8 + $0x60] sm:$0xff] }
0x1c43   : > { %8349 = vmatpush3.bf16.msra.mxu1 %v8346_v43  ;;  %8369 = vmatpush3.bf16.msra.mxu0 %v8366_v36  ;;  %v8370_v26 = vpack.c.bf16 %v7007_v40, %v7006_v38  ;;  %v7009_v43 = vld [vmem:[%s10775_s8 + $0x78] sm:$0xff] }
0x1c44   : > { %8351 = vmatprep.subr.bf16.mxu1 %v8350_v29  ;;  %v8374_v47 = vpack.c.bf16 %v7009_v43, %v7008_v44 }
0x1c45   : > { %8371 = vmatprep.subr.bf16.mxu0 %v8370_v26 }
0x1c47   : > { %8353 = vmatpush3.bf16.msra.mxu1 %v8350_v29  ;;  %8373 = vmatpush3.bf16.msra.mxu0 %v8370_v26 }
0x1c48   : > { %8355 = vmatprep.subr.bf16.mxu1 %v8354_v49  ;;  %8375 = vmatprep.subr.bf16.mxu0 %v8374_v47 }
0x1c4b   : > { %8357 = vmatpush3.bf16.msra.mxu1 %v8354_v49  ;;  %8377 = vmatpush3.bf16.msra.mxu0 %v8374_v47 }
0x1c4c   : > { %8359 = vmatprep.subr.bf16.mxu1 %v8358_v2 }
0x1c4f   : > { %8361 = vmatpush3.bf16.msra.mxu1 %v8358_v2  ;;  %v3243_v2 = vrot.slane %v9670_v37, %v9535_v55 }
0x1d15   : > { %v7738_v52 = vpop.f32.mrb[18].mxu1 }
0x1d16   : > { %3106 = vrot.lane.b32.xlu1 %v7738_v52, %s10834_s28  ;;  %v3077_v54 = vpop.f32.mrb[19].mxu1 }
0x1d17   : > { %3104 = vrot.lane.b32.xlu0 %v3077_v54, %s10834_s28 }
0x1d88   : > { %v3107_v60 = vpop.permute.xlu1 %3106 }
0x1d89   : > { %v3105_v5 = vpop.permute.xlu0 %3104  ;;  %v3115_v8 = vsel %vm1754_vm4, %v3113_v6, %v3107_v60 }
0x1d8a   : > { %v3114_v7 = vsel %vm1754_vm4, %v3112_v58, %v3105_v5  ;;  %v7014_v58 = vld [vmem:[%s10777_s10 + $0x80] sm:$0xff]  ;;  %v7015_v5 = vld [vmem:[%s10777_s10 + $0x88] sm:$0xff] }
0x1d8b   : > { %7755 = vmatprep.mubr.msk.f32.mxu1 %vm697_vm0, %v3114_v7  ;;  %v8378_v6 = vpack.c.bf16 %v7015_v5, %v7014_v58  ;;  %v7016_v7 = vld [vmem:[%s10777_s10 + $0x90] sm:$0xff] }
0x1d8c   : > { %7756 = vmatmul.mubr.msk.f32.vlgmr.msra.gmra.mrb[20].mxu1 %vm697_vm0, %v3115_v8  ;;  %v7017_v8 = vld [vmem:[%s10777_s10 + $0x98] sm:$0xff] }
0x1d8d   : > { %8379 = vmatprep.subr.bf16.mxu1 %v8378_v6 }
0x1d8e   : > { %8381 = vmatpush3.bf16.msra.mxu1 %v8378_v6 }
0x1e5f   : > { %v7757_v9 = vpop.f32.mrb[20].mxu1 }
0x1e60   : > { %v3207_v10 = vadd.f32 %v7757_v9, %v9606_v48  ;;  %v3197_v45 = vpop.f32.mrb[21].mxu1  ;;  %v7018_v9 = vld [vmem:[%s10777_s10 + $0xa0] sm:$0xff] }
0x1e61   : > { %v3206_v11 = vadd.f32 %v3197_v45, %v9609_v41 }
0x1e62   : > { %v9821_v12 = vadd.f32 %v3211_v46, %v3207_v10  ;;  %v7019_v10 = vld [vmem:[%s10777_s10 + $0xa8] sm:$0xff] }
0x1e63   : > { %v9823_v13 = vadd.f32 %v3211_v46, %v3206_v11  ;;  %v8382_v46 = vpack.c.bf16 %v7017_v8, %v7016_v7  ;;  %v8386_v45 = vpack.c.bf16 %v7019_v10, %v7018_v9  ;;  %v7020_v11 = vld [vmem:[%s10777_s10 + $0xb0] sm:$0xff] }
0x1e64   : > { %v3217_v4 = vsel %vm697_vm0, %v9821_v12, 0.0 }
0x1e65   : > { %3218 = vadd.xlane.f32.xlu1 %v3217_v4  ;;  %v3214_v0 = vsel %vm697_vm0, %v9823_v13, 0.0  ;;  %8383 = vmatprep.subr.bf16.mxu1 %v8382_v46  ;;  %v7021_v4 = vld [vmem:[%s10777_s10 + $0xb8] sm:$0xff] }
0x1e66   : > { %3215 = vadd.xlane.f32.xlu0 %v3214_v0  ;;  %8385 = vmatpush3.bf16.msra.mxu1 %v8382_v46  ;;  %v8390_v0 = vpack.c.bf16 %v7021_v4, %v7020_v11 }
0x1e67   : > { %8387 = vmatprep.subr.bf16.mxu1 %v8386_v45 }
0x1e6a   : > { %8389 = vmatpush3.bf16.msra.mxu1 %v8386_v45 }
0x1e6b   : > { %8391 = vmatprep.subr.bf16.mxu1 %v8390_v0 }
0x1e6e   : > { %8393 = vmatpush3.bf16.msra.mxu1 %v8390_v0 }
0x1ef2   : > { %v3219_v15 = vpop.xlane.xlu1 %3218 }
0x1ef3   : > { %v3221_v16 = vmul.f32 0.015625, %v3219_v15  ;;  %v3216_v20 = vpop.xlane.xlu0 %3215  ;;  %v7022_v15 = vld [vmem:[%s10777_s10 + $0xc0] sm:$0xff] }
0x1ef4   : > { %v3220_v24 = vmul.f32 0.015625, %v3216_v20 }
0x1ef5   : > { %v3223_v48 = vsub.f32 %v9821_v12, %v3221_v16  ;;  %v7023_v16 = vld [vmem:[%s10777_s10 + $0xc8] sm:$0xff] }
0x1ef6   : > { %v3222_v41 = vsub.f32 %v9823_v13, %v3220_v24  ;;  %v8394_v20 = vpack.c.bf16 %v7023_v16, %v7022_v15  ;;  %v7024_v24 = vld [vmem:[%s10777_s10 + $0xd0] sm:$0xff] }
0x1ef7   : > { %v3225_v25 = vmul.f32 %v3223_v48, %v3223_v48 }
0x1ef8   : > { %v3224_v28 = vmul.f32 %v3222_v41, %v3222_v41  ;;  %8395 = vmatprep.subr.bf16.mxu1 %v8394_v20 }
0x1ef9   : > { %v3229_v31 = vsel %vm697_vm0, %v3225_v25, 0.0  ;;  %8397 = vmatpush3.bf16.msra.mxu1 %v8394_v20 }
0x1efa   : > { %v3226_v61 = vsel %vm697_vm0, %v3224_v28, 0.0  ;;  %v7026_v28 = vld [vmem:[%s10777_s10 + $0xe0] sm:$0xff] }
0x1efb   : > { %3227 = vadd.xlane.f32.xlu0 %v3226_v61  ;;  %v7027_v61 = vld [vmem:[%s10777_s10 + $0xe8] sm:$0xff] }
0x1efc   : > { %v8402_v25 = vpack.c.bf16 %v7027_v61, %v7026_v28 }
0x1eff   : > { %3230 = vadd.xlane.f32.xlu0 %v3229_v31  ;;  %v7028_v31 = vld [vmem:[%s10777_s10 + $0xf0] sm:$0xff] }
0x1f00   : > { %v8406_v18 = vpack.c.bf16 %v7029_v19, %v7028_v31 }
0x1f88   : > { %v3228_v29 = vpop.xlane.xlu0 %3227 }
0x1f89   : > { %v3232_v39 = vmul.f32 0.015625, %v3228_v29 }
0x1f8b   : > { %v3234_v53 = vadd.f32 1e-05, %v3232_v39 }
0x1f8c   : > { %v3231_v49 = vpop.xlane.xlu0 %3230 }
0x1f8d   : > { %8960 = vrsqrt.f32 %v3234_v53  ;;  %v3233_v27 = vmul.f32 0.015625, %v3231_v49 }
0x1f8f   : > { %v3235_v50 = vadd.f32 1e-05, %v3233_v27 }
0x1f91   : > { %8962 = vrsqrt.f32 %v3235_v50 }
0x1f97   : > { %v8961_v52 = vpop.eup %8960 }
0x1f98   : > { %v3238_v54 = vmul.f32 %v8961_v52, %v3222_v41 }
0x1f9a   : > { %v3244_v57 = vmul.f32 %v3243_v2, %v3238_v54 }
0x1f9b   : > { %v8963_v22 = vpop.eup %8962 }
0x1f9c   : > { %v3239_v17 = vmul.f32 %v8963_v22, %v3223_v48  ;;  %v3250_v23 = vadd.f32 %v3249_v21, %v3244_v57  ;;  %v7025_v48 = vld [vmem:[%s10777_s10 + $0xd8] sm:$0xff] }
0x1f9d   : > { %v8398_v41 = vpack.c.bf16 %v7025_v48, %v7024_v24 }
0x1f9e   : > { %v3245_v60 = vmul.f32 %v3243_v2, %v3239_v17  ;;  %7774 = vmatprep.mubr.msk.f32.mxu0 %vm697_vm0, %v3250_v23 }
0x1f9f   : > { %8399 = vmatprep.subr.bf16.mxu1 %v8398_v41 }
0x1fa0   : > { %v3251_v62 = vadd.f32 %v3249_v21, %v3245_v60  ;;  %8401 = vmatpush3.bf16.msra.mxu1 %v8398_v41 }
0x1fa1   : > { %8403 = vmatprep.subr.bf16.mxu1 %v8402_v25 }
0x1fa2   : > { %7775 = vmatmul.mubr.msk.f32.vlgmr.msra.gmra.mrb[28].mxu0 %vm697_vm0, %v3251_v62 }
0x1fa3   : > { %7828 = vmatprep.mubr.msk.f32.mxu0 %vm9105_vm9, %v9095_v51 }
0x1fa4   : > { %8405 = vmatpush3.bf16.msra.mxu1 %v8402_v25 }
0x1fa5   : > { %8407 = vmatprep.subr.bf16.mxu1 %v8406_v18 }
0x1fa8   : > { %8409 = vmatpush3.bf16.msra.mxu1 %v8406_v18 }
0x2075   : > { %v7776_v34 = vpop.f32.mrb[28].mxu0 }
0x2076   : > { %v3347_v35 = vadd.f32 %v7776_v34, %v7011_v32  ;;  %v3341_v36 = vpop.f32.mrb[29].mxu0 }
0x2077   : > { %v3342_v38 = vadd.f32 %v7011_v32, %v3341_v36 }
0x2078   : > { %v3353_v40 = vmul.f32 0.70710677, %v3347_v35  ;;  %v3351_v36 = vmul.f32 0.5, %v3347_v35 }
0x2079   : > { %v3352_v26 = vmul.f32 0.70710677, %v3342_v38  ;;  %v3350_v32 = vmul.f32 0.5, %v3342_v38 }
0x207a   : > { %v3359_v44 = vand.u32 2147483647, %v3353_v40  ;;  %vm3355_vm7 = vcmp.ge.f32.partialorder %v3353_v40, 0.0  ;;  %v3424_v40 = vrot.slane %v9670_v37, %v9601_v42 }
0x207b   : > { %v3358_v43 = vand.u32 2147483647, %v3352_v26  ;;  %vm3354_vm8 = vcmp.ge.f32.partialorder %v3352_v26, 0.0  ;;  %v3357_v28 = vsel %vm3355_vm7, 1.0, %v9103_v30 }
0x207c   : > { %v3361_v47 = vmul.f32 0.3275911, %v3359_v44  ;;  %v3387_v49 = vsub.f32 0.0, %v3359_v44  ;;  %v3356_v31 = vsel %vm3354_vm8, 1.0, %v9103_v30 }
0x207d   : > { %v3360_v29 = vmul.f32 0.3275911, %v3358_v43  ;;  %v3386_v27 = vsub.f32 0.0, %v3358_v43 }
0x207e   : > { %v3363_v39 = vadd.f32 1.0, %v3361_v47  ;;  %v3389_v2 = vmul.f32 %v3387_v49, %v3359_v44 }
0x207f   : > { %v3362_v53 = vadd.f32 1.0, %v3360_v29  ;;  %v3388_v21 = vmul.f32 %v3386_v27, %v3358_v43 }
0x2080   : > { %8964 = vrcp.f32 %v3363_v39  ;;  %v3392_v17 = vmul.f32 1.442695, %v3389_v2 }
0x2081   : > { %8966 = vrcp.f32 %v3362_v53  ;;  %v3390_v62 = vmul.f32 1.442695, %v3388_v21 }
0x2082   : > { %8968 = vpow2.f32 %v3392_v17  ;;  %v3553_v17 = vld [vmem:[%s10841_s12 + $0x8] sm:$0xff] }
0x2083   : > { %8970 = vpow2.f32 %v3390_v62  ;;  %v3555_v62 = vld [vmem:[%s10841_s12 + $0x18] sm:$0xff] }
0x208a   : > { %v8965_v50 = vpop.eup %8964 }
0x208b   : > { %v8967_v52 = vpop.eup %8966  ;;  %v3369_v54 = vmul.f32 1.0614054, %v8965_v50 }
0x208c   : > { %v3368_v57 = vmul.f32 1.0614054, %v8967_v52  ;;  %v8969_v15 = vpop.eup %8968 }
0x208d   : > { %v3371_v22 = vadd.f32 -1.4531521, %v3369_v54  ;;  %v8971_v20 = vpop.eup %8970 }
0x208e   : > { %v3370_v23 = vadd.f32 -1.4531521, %v3368_v57 }
0x208f   : > { %v3373_v60 = vmul.f32 %v8965_v50, %v3371_v22 }
0x2090   : > { %v3372_v58 = vmul.f32 %v8967_v52, %v3370_v23 }
0x2091   : > { %v3375_v5 = vadd.f32 1.4214138, %v3373_v60  ;;  %v3554_v60 = vld [vmem:[%s10841_s12 + $0x10] sm:$0xff] }
0x2092   : > { %v3374_v6 = vadd.f32 1.4214138, %v3372_v58  ;;  %v9104_v58 = vmov 0.0|0.0  }
0x2093   : > { %v3377_v7 = vmul.f32 %v8965_v50, %v3375_v5  ;;  %8410 = vmatprep.subr.bf16.mxu0 %v9104_v58  ;;  %v8414_v5 = vpack.c.bf16 %v3555_v62, %v3554_v60  ;;  %8454 = vmatprep.subr.bf16.mxu1 %v9104_v58 }
0x2094   : > { %v3376_v8 = vmul.f32 %v8967_v52, %v3374_v6  ;;  %v3556_v6 = vld [vmem:[%s10841_s12 + $0x20] sm:$0xff] }
0x2095   : > { %v3379_v46 = vadd.f32 -0.28449672, %v3377_v7  ;;  %v3557_v7 = vld [vmem:[%s10841_s12 + $0x28] sm:$0xff] }
0x2096   : > { %v3378_v9 = vadd.f32 -0.28449672, %v3376_v8  ;;  %v8417_v8 = vpack.c.bf16 %v3557_v7, %v3556_v6  ;;  %v3760_v7 = vld [vmem:[%s10841_s12 + $0x50] sm:$0xff] }
0x2097   : > { %v3381_v10 = vmul.f32 %v8965_v50, %v3379_v46  ;;  %v3558_v46 = vld [vmem:[%s10841_s12 + $0x30] sm:$0xff] }
0x2098   : > { %v3380_v45 = vmul.f32 %v8967_v52, %v3378_v9  ;;  %v3559_v9 = vld [vmem:[%s10841_s12 + $0x38] sm:$0xff] }
0x2099   : > { %v3383_v11 = vadd.f32 0.2548296, %v3381_v10  ;;  %v8420_v10 = vpack.c.bf16 %v3559_v9, %v3558_v46  ;;  %v3762_v9 = vld [vmem:[%s10841_s12 + $0x60] sm:$0xff] }
0x209a   : > { %v3382_v4 = vadd.f32 0.2548296, %v3380_v45  ;;  %v3636_v45 = vld [vmem:[%s10781_s14 + $0x8] sm:$0xff] }
0x209b   : > { %v3385_v0 = vmul.f32 %v8965_v50, %v3383_v11  ;;  %v3638_v11 = vld [vmem:[%s10781_s14 + $0x18] sm:$0xff] }
0x209c   : > { %v3384_v16 = vmul.f32 %v8967_v52, %v3382_v4  ;;  %v8422_v4 = vpack.c.bf16 %v3638_v11, %v3636_v45  ;;  %v3764_v11 = vld [vmem:[%s10841_s12 + $0x70] sm:$0xff] }
0x209d   : > { %v3395_v24 = vmul.f32 %v8969_v15, %v3385_v0 }
0x209e   : > { %v3394_v48 = vmul.f32 %v8971_v20, %v3384_v16 }
0x209f   : > { %v3397_v41 = vsub.f32 1.0, %v3395_v24 }
0x20a0   : > { %v3396_v61 = vsub.f32 1.0, %v3394_v48 }
0x20a1   : > { %v3399_v25 = vmul.f32 %v3397_v41, %v3357_v28  ;;  %v9966_v41 = vld [vmem:[%s10778_s11] sm:$0xff] }
0x20a2   : > { %v3398_v19 = vmul.f32 %v3396_v61, %v3356_v31  ;;  %v3532_v28 = vrot.slane %v9966_v41, %v9333_v1  ;;  %v3538_v31 = vrot.slane %v9966_v41, %v9341_v3 }
0x20a3   : > { %v3401_v18 = vadd.f32 1.0, %v3399_v25 }
0x20a4   : > { %v3400_v34 = vadd.f32 1.0, %v3398_v19 }
0x20a5   : > { %v3403_v43 = vmul.f32 %v3401_v18, %v3351_v36 }
0x20a6   : > { %v3402_v44 = vmul.f32 %v3400_v34, %v3350_v32 }
0x20a8   : > { %7809 = vmatprep.mubr.f32.mxu1 %v3402_v44 }
0x20a9   : > { %7810 = vmatmul.mubr.f32.vlgmr.msra.gmra.mrb[22].mxu1 %v3403_v43 }
0x20aa   : > { %7874 = vmatprep.mubr.msk.f32.mxu1 %vm9105_vm9, %v9095_v51 }
0x217c   : > { %v7811_v26 = vpop.f32.mrb[22].mxu1 }
0x217d   : > { %v3497_v47 = vadd.f32 %v7811_v26, %v3424_v40  ;;  %v3491_v29 = vpop.f32.mrb[23].mxu1 }
0x217e   : > { %v3492_v39 = vadd.f32 %v3491_v29, %v3424_v40 }
0x217f   : > { %v3501_v53 = vadd.f32 %v3497_v47, %v9821_v12 }
0x2180   : > { %v3500_v49 = vadd.f32 %v3492_v39, %v9823_v13  ;;  %v3552_v13 = vld [vmem:[%s10841_s12] sm:$0xff] }
0x2181   : > { %v3506_v27 = vsel %vm697_vm0, %v3501_v53, 0.0  ;;  %v8411_v23 = vpack.c.bf16 %v3553_v17, %v3552_v13  ;;  %v3758_v13 = vld [vmem:[%s10841_s12 + $0x40] sm:$0xff]  ;;  %v3759_v17 = vld [vmem:[%s10841_s12 + $0x48] sm:$0xff] }
0x2182   : > { %3507 = vadd.xlane.f32.xlu1 %v3506_v27  ;;  %v3503_v35 = vsel %vm697_vm0, %v3500_v49, 0.0  ;;  %v3635_v27 = vld [vmem:[%s10781_s14] sm:$0xff] }
0x2183   : > { %3504 = vadd.xlane.f32.xlu0 %v3503_v35  ;;  %8412 = vmatpush3.bf16.msra.mxu0 %v8411_v23  ;;  %v3637_v35 = vld [vmem:[%s10781_s14 + $0x10] sm:$0xff] }
0x2184   : > { %8413 = vmatprep.subr.bf16.mxu0 %v9104_v58 }
0x2187   : > { %8415 = vmatpush3.bf16.msra.mxu0 %v8414_v5  ;;  %v8431_v5 = vpack.c.bf16 %v3759_v17, %v3758_v13  ;;  %v3774_v13 = vld [vmem:[%s10780_s13 + $0x1] sm:$0x1] }
0x2188   : > { %8416 = vmatprep.subr.bf16.mxu0 %v9104_v58 }
0x218b   : > { %8418 = vmatpush3.bf16.msra.mxu0 %v8417_v8  ;;  %v3761_v8 = vld [vmem:[%s10841_s12 + $0x58] sm:$0xff] }
0x218c   : > { %8419 = vmatprep.subr.bf16.mxu0 %v9104_v58  ;;  %v8434_v46 = vpack.c.bf16 %v3761_v8, %v3760_v7 }
0x218f   : > { %8421 = vmatpush3.bf16.msra.mxu0 %v8420_v10  ;;  %v3763_v10 = vld [vmem:[%s10841_s12 + $0x68] sm:$0xff] }
0x2190   : > { %8423 = vmatprep.subr.bf16.mxu0 %v8422_v4  ;;  %v8437_v45 = vpack.c.bf16 %v3763_v10, %v3762_v9  ;;  %v3765_v4 = vld [vmem:[%s10841_s12 + $0x78] sm:$0xff]  ;;  %v3928_v9 = vld [vmem:[%s10784_s17 + $0x8] sm:$0xff]  ;;  %v3927_v10 = vld [vmem:[%s10784_s17] sm:$0xff] }
0x220f   : > { %v3508_v38 = vpop.xlane.xlu1 %3507 }
0x2210   : > { %v3510_v50 = vmul.f32 0.015625, %v3508_v38  ;;  %v3505_v2 = vpop.xlane.xlu0 %3504 }
0x2211   : > { %v3509_v52 = vmul.f32 0.015625, %v3505_v2 }
0x2212   : > { %v3512_v54 = vsub.f32 %v3501_v53, %v3510_v50  ;;  %v8424_v50 = vpack.c.bf16 %v3637_v35, %v3635_v27 }
0x2213   : > { %v3511_v37 = vsub.f32 %v3500_v49, %v3509_v52  ;;  %v3640_v52 = vld [vmem:[%s10781_s14 + $0x28] sm:$0xff] }
0x2214   : > { %v3514_v21 = vmul.f32 %v3512_v54, %v3512_v54 }
0x2215   : > { %v3513_v57 = vmul.f32 %v3511_v37, %v3511_v37 }
0x2216   : > { %v3518_v22 = vsel %vm697_vm0, %v3514_v21, 0.0  ;;  %v3639_v21 = vld [vmem:[%s10781_s14 + $0x20] sm:$0xff] }
0x2217   : > { %3519 = vadd.xlane.f32.xlu1 %v3518_v22  ;;  %v3515_v12 = vsel %vm697_vm0, %v3513_v57, 0.0  ;;  %v3641_v57 = vld [vmem:[%s10781_s14 + $0x30] sm:$0xff] }
0x2218   : > { %3516 = vadd.xlane.f32.xlu0 %v3515_v12  ;;  %v8428_v22 = vpack.c.bf16 %v3641_v57, %v3639_v21  ;;  %v3560_v12 = vld [vmem:[%s10780_s13] sm:$0x1] }
0x22a4   : > { %v3520_v0 = vpop.xlane.xlu1 %3519 }
0x22a5   : > { %v3522_v15 = vmul.f32 0.015625, %v3520_v0  ;;  %v3517_v16 = vpop.xlane.xlu0 %3516  ;;  %v8440_v0 = vpack.c.bf16 %v3765_v4, %v3764_v11 }
0x22a6   : > { %v3521_v20 = vmul.f32 0.015625, %v3517_v16  ;;  %v3767_v16 = vld [vmem:[%s10841_s12 + $0x88] sm:$0xff] }
0x22a7   : > { %v3524_v24 = vadd.f32 1e-05, %v3522_v15  ;;  %v3766_v15 = vld [vmem:[%s10841_s12 + $0x80] sm:$0xff] }
0x22a8   : > { %v3523_v48 = vadd.f32 1e-05, %v3521_v20  ;;  %v8443_v20 = vpack.c.bf16 %v3767_v16, %v3766_v15 }
0x22a9   : > { %8972 = vrsqrt.f32 %v3524_v24  ;;  %v3768_v24 = vld [vmem:[%s10841_s12 + $0x90] sm:$0xff] }
0x22aa   : > { %8974 = vrsqrt.f32 %v3523_v48  ;;  %v3769_v48 = vld [vmem:[%s10841_s12 + $0x98] sm:$0xff] }
0x22b3   : > { %v8973_v61 = vpop.eup %8972 }
0x22b4   : > { %v8975_v25 = vpop.eup %8974  ;;  %v3528_v19 = vmul.f32 %v8973_v61, %v3512_v54  ;;  %v3642_v54 = vld [vmem:[%s10781_s14 + $0x38] sm:$0xff]  ;;  %v3770_v61 = vld [vmem:[%s10841_s12 + $0xa0] sm:$0xff] }
0x22b5   : > { %v3527_v18 = vmul.f32 %v8975_v25, %v3511_v37  ;;  %v8426_v37 = vpack.c.bf16 %v3642_v54, %v3640_v52  ;;  %v3771_v25 = vld [vmem:[%s10841_s12 + $0xa8] sm:$0xff] }
0x22b6   : > { %v3534_v32 = vmul.f32 %v3532_v28, %v3528_v19  ;;  %v3772_v19 = vld [vmem:[%s10841_s12 + $0xb0] sm:$0xff] }
0x22b7   : > { %v3533_v34 = vmul.f32 %v3532_v28, %v3527_v18  ;;  %v8446_v28 = vpack.c.bf16 %v3769_v48, %v3768_v24  ;;  %v3773_v18 = vld [vmem:[%s10841_s12 + $0xb8] sm:$0xff] }
0x22b8   : > { %v3540_v36 = vadd.f32 %v3538_v31, %v3534_v32  ;;  %v8452_v32 = vpack.c.bf16 %v3773_v18, %v3772_v19  ;;  %v7035_v18 = vld [vmem:[%s10830_s22 + $0x108] sm:$0xff] }
0x22b9   : > { %v3539_v44 = vadd.f32 %v3538_v31, %v3533_v34  ;;  %v8449_v31 = vpack.c.bf16 %v3771_v25, %v3770_v61  ;;  %v3846_v34 = vld [vmem:[%s10783_s16] sm:$0xff] }
0x22ba   : > { %v3542_v43 = vsel %vm697_vm0, %v3540_v36, 0.0  ;;  %v3847_v36 = vld [vmem:[%s10783_s16 + $0x8] sm:$0xff] }
0x22bb   : > { %v3541_v40 = vsel %vm697_vm0, %v3539_v44, 0.0  ;;  %v8455_v44 = vpack.c.bf16 %v3847_v36, %v3846_v34  ;;  %v7034_v36 = vld [vmem:[%s10830_s22 + $0x100] sm:$0xff] }
0x22bc   : > { %v3543_v26 = vadd.f32 %v3542_v43, %v3541_v40  ;;  %v3643_v43 = vld [vmem:[%s10782_s15] sm:$0x3]  ;;  %v9106_v40 = vmov 1966171168  }
0x22bd   : > { %8456 = vmatpush3.bf16.msra.mxu1 %v8455_v44  ;;  %v7036_v44 = vld [vmem:[%s10830_s22 + $0x110] sm:$0xff] }
0x22be   : > { %v3544_v47 = vrot.slane %v3543_v26, 4  ;;  %8457 = vmatprep.subr.bf16.mxu1 %v9104_v58 }
0x22c0   : > { %v3545_v29 = vadd.f32 %v3544_v47, %v3543_v26  ;;  %v3733_v26 = vunpack.c.l.s4 %v9106_v40  ;;  %v3648_v47 = vrot.slane %v3643_v43, %v9333_v1  ;;  %v7039_v40 = vld [vmem:[%s10830_s22 + $0x128] sm:$0xff] }
0x22c2   : > { %v3546_v39 = vrot.slane %v3545_v29, 2 }
0x22c4   : > { %v3547_v53 = vadd.f32 %v3546_v39, %v3545_v29  ;;  %v3652_v29 = vrot.slane %v3643_v43, %v9341_v3  ;;  %v3734_v39 = vunpack.c.0.s8 %v3733_v26  ;;  %v8462_v43 = vpack.c.bf16 %v7036_v44, %v7034_v36  ;;  %v7041_v26 = vld [vmem:[%s10830_s22 + $0x138] sm:$0xff] }
0x22c6   : > { %v3548_v49 = vrot.slane %v3547_v53, 1 }
0x22c8   : > { %v3549_v38 = vadd.f32 %v3548_v49, %v3547_v53 }
0x22ca   : > { %v3551_v2 = vmul.f32 0.0625, %v3549_v38  ;;  %v3737_v38 = vsub.s32 %v3734_v39, %v9330_v63  ;;  %v7040_v39 = vld [vmem:[%s10830_s22 + $0x130] sm:$0xff] }
0x22cc   : > { %7829 = vmatmul.mubr.msk.f32.vlgmr.msra.gmra.mrb[30].mxu0 %vm697_vm0, %v3551_v2 }
0x22cd   : > { %8425 = vmatpush1.bf16.msra.mxu0 %v8424_v50  ;;  %3722 = vmatprep.mubr.f32.mxu0 %v9095_v51 }
0x22ce   : > { %8427 = vmatprep.subr.bf16.mxu0 %v8426_v37  ;;  %v3752_v37 = vld [vmem:[%s674_s4] sm:$0x1] }
0x22d1   : > { %8429 = vmatpush1.bf16.msra.mxu0 %v8428_v22  ;;  %v3848_v22 = vld [vmem:[%s10783_s16 + $0x10] sm:$0xff] }
0x22d2   : > { %8430 = vmatprep.subr.bf16.mxu0 %v9104_v58 }
0x239f   : > { %v3630_v23 = vpop.f32.mrb[30].mxu0 }
0x23a0   : > { %v3631_v60 = vadd.f32 %v3630_v23, %v3560_v12  ;;  %v7830_v62 = vpop.f32.mrb[31].mxu0  ;;  %v8458_v12 = vpack.c.bf16 %v3849_v59, %v3848_v22 }
0x23a2   : > { %v3634_v6 = vmax.f32 %v3631_v60, 0.0  ;;  %8459 = vmatpush3.bf16.msra.mxu1 %v8458_v12 }
0x23a4   : > { %7031 = vmatmul.mubr.msk.f32.vlgmr.msra.gmra.mrb[32].mxu0 %vm1751_vm3, %v3634_v6 }
0x23a5   : > { %8432 = vmatpush3.bf16.msra.mxu0 %v8431_v5  ;;  %7863 = vmatprep.mubr.msk.f32.mxu0 %vm9105_vm9, %v9095_v51  ;;  %v3851_v5 = vrot.slane %v9966_v41, 4 }
0x23a6   : > { %8433 = vmatprep.subr.bf16.mxu0 %v9104_v58 }
0x23a9   : > { %8435 = vmatpush3.bf16.msra.mxu0 %v8434_v46 }
0x23aa   : > { %8436 = vmatprep.subr.bf16.mxu0 %v9104_v58 }
0x23ad   : > { %8438 = vmatpush3.bf16.msra.mxu0 %v8437_v45 }
0x23ae   : > { %8439 = vmatprep.subr.bf16.mxu0 %v9104_v58 }
0x23b1   : > { %8441 = vmatpush3.bf16.msra.mxu0 %v8440_v0 }
0x23b2   : > { %8442 = vmatprep.subr.bf16.mxu0 %v9104_v58 }
0x23b5   : > { %8444 = vmatpush3.bf16.msra.mxu0 %v8443_v20 }
0x23b6   : > { %8445 = vmatprep.subr.bf16.mxu0 %v9104_v58 }
0x23b9   : > { %8447 = vmatpush3.bf16.msra.mxu0 %v8446_v28 }
0x23ba   : > { %8448 = vmatprep.subr.bf16.mxu0 %v9104_v58 }
0x23bd   : > { %8450 = vmatpush3.bf16.msra.mxu0 %v8449_v31 }
0x23be   : > { %8451 = vmatprep.subr.bf16.mxu0 %v9104_v58 }
0x23c1   : > { %8453 = vmatpush3.bf16.msra.mxu0 %v8452_v32  ;;  %v7037_v32 = vld [vmem:[%s10830_s22 + $0x118] sm:$0xff] }
0x23c2   : > { %v8460_v34 = vpack.c.bf16 %v7037_v32, %v7035_v18 }
0x23c4   : > { %8461 = vmatprep.subr.bf16.mxu1 %v8460_v34 }
0x2477   : > { %v3724_v53 = vpop.f32.mrb[32].mxu0 }
0x2478   : > { %v3725_v49 = vadd.f32 %v3724_v53, %v3648_v47  ;;  %v3726_v27 = vpop.f32.mrb[33].mxu0  ;;  %v8464_v47 = vpack.c.bf16 %v7041_v26, %v7039_v40 }
0x2479   : > { %v3727_v35 = vadd.f32 %v3726_v27, %v3652_v29  ;;  %v7038_v29 = vld [vmem:[%s10830_s22 + $0x120] sm:$0xff]  ;;  %v7045_v27 = vld [vmem:[%s10830_s22 + $0x158] sm:$0xff] }
0x247a   : > { %v8466_v53 = vpack.c.bf16 %v7040_v39, %v7038_v29 }
0x247b   : > { %v3731_v58 = vcombine.low %v3725_v49, %v3727_v35  ;;  %v3753_v50 = vmul.f32 0.5, %v3727_v35 }
0x247d   : > { %v3738_v2 = vrot.slane %v3731_v58, %v3737_v38  ;;  %v3754_v52 = vmul.f32 1.442695, %v3753_v50  ;;  %v7044_v58 = vld [vmem:[%s10830_s22 + $0x150] sm:$0xff] }
0x247f   : > { %v3745_v54 = vrot.slane %v3738_v2, %v3737_v38  ;;  %8976 = vpow2.f32 %v3754_v52  ;;  %v7042_v38 = vld [vmem:[%s10830_s22 + $0x140] sm:$0xff]  ;;  %v7047_v2 = vld [vmem:[%s10830_s22 + $0x168] sm:$0xff]  ;;  %v7049_v52 = vld [vmem:[%s10830_s22 + $0x178] sm:$0xff] }
0x2480   : > { %v8470_v50 = vpack.c.bf16 %v7044_v58, %v7042_v38 }
0x2481   : > { %3751 = vst.msk [vmem:[%s684_s30] sm:$0x3] %vm3749_vm10, %v3745_v54  ;;  %v8472_v54 = vpack.c.bf16 %v7049_v52, %v7047_v2 }
0x2489   : > { %v8977_v63 = vpop.eup %8976 }
0x248a   : > { %v3756_v21 = vmul.f32 %v8977_v63, %v3752_v37  ;;  %v7046_v37 = vld [vmem:[%s10830_s22 + $0x160] sm:$0xff]  ;;  %v7048_v63 = vld [vmem:[%s10830_s22 + $0x170] sm:$0xff] }
0x248c   : > { %v3757_v57 = vadd.f32 %v3756_v21, %v3725_v49  ;;  %v7043_v49 = vld [vmem:[%s10830_s22 + $0x148] sm:$0xff]  ;;  %v8474_v21 = vpack.c.bf16 %v7048_v63, %v7046_v37 }
0x248d   : > { %v8468_v35 = vpack.c.bf16 %v7045_v27, %v7043_v49 }
0x248e   : > { %7864 = vmatmul.mubr.f32.vlgmr.msra.gmra.mrb[34].mxu0 %v3757_v57 }
0x2561   : > { %v3841_v17 = vpop.f32.mrb[34].mxu0 }
0x2562   : > { %v3842_v23 = vadd.f32 %v3841_v17, %v3774_v13  ;;  %v7865_v60 = vpop.f32.mrb[35].mxu0 }
0x2564   : > { %v3845_v62 = vmax.f32 %v3842_v23, 0.0  ;;  %v10160_v23 = vld [vmem:[%s10831_s24 + $0x10] sm:$0xff] }
0x2566   : > { %7875 = vmatmul.mubr.msk.f32.vlgmr.msra.gmra.mrb[24].mxu1 %vm1751_vm3, %v3845_v62  ;;  %v3966_v62 = vrot.slane %v10160_v23, %v9333_v1 }
0x2567   : > { %4075 = vmatprep.mubr.f32.mxu1 %v9095_v51  ;;  %8463 = vmatpush1.bf16.msra.mxu1 %v8462_v43 }
0x2568   : > { %8465 = vmatprep.subr.bf16.mxu1 %v8464_v47 }
0x256b   : > { %8467 = vmatpush1.bf16.msra.mxu1 %v8466_v53 }
0x256c   : > { %8469 = vmatprep.subr.bf16.mxu1 %v8468_v35 }
0x256f   : > { %8471 = vmatpush1.bf16.msra.mxu1 %v8470_v50 }
0x2570   : > { %8473 = vmatprep.subr.bf16.mxu1 %v8472_v54 }
0x2573   : > { %8475 = vmatpush1.bf16.msra.mxu1 %v8474_v21 }
0x2639   : > { %v3922_v6 = vpop.f32.mrb[24].mxu1 }
0x263a   : > { %v3923_v7 = vadd.f32 %v3922_v6, %v3851_v5  ;;  %v7876_v8 = vpop.f32.mrb[25].mxu1 }
0x263c   : > { %v3926_v46 = vmax.f32 %v3923_v7, 0.0  ;;  %v3972_v7 = vrot.slane %v10160_v23, %v9341_v3 }
0x263e   : > { %v3932_v45 = vrot.slane %v3926_v46, %v9333_v1 }
0x2640   : > { %v10097_v11 = vadd.f32 %v3932_v45, %v3928_v9  ;;  %v10099_v4 = vadd.f32 %v3932_v45, %v3927_v10 }
0x2642   : > { %v3940_v41 = vsel %vm697_vm0, %v10097_v11, 0.0  ;;  %v3937_v0 = vsel %vm697_vm0, %v10099_v4, 0.0 }
0x2643   : > { %3941 = vadd.xlane.f32.xlu1 %v3940_v41  ;;  %3938 = vadd.xlane.f32.xlu0 %v3937_v0  ;;  %v7050_v41 = vld [vmem:[%s10773_s6 + $0x4] sm:$0x3] }
0x2644   : > { %v3998_v0 = vrot.slane %v7050_v41, %v9333_v1 }
0x26d0   : > { %v3942_v15 = vpop.xlane.xlu1 %3941  ;;  %v3939_v16 = vpop.xlane.xlu0 %3938 }
0x26d1   : > { %v3944_v20 = vmul.f32 0.015625, %v3942_v15  ;;  %v3943_v24 = vmul.f32 0.015625, %v3939_v16 }
0x26d3   : > { %v3946_v48 = vsub.f32 %v10097_v11, %v3944_v20  ;;  %v3945_v28 = vsub.f32 %v10099_v4, %v3943_v24  ;;  %v4002_v24 = vrot.slane %v7050_v41, %v9341_v3 }
0x26d5   : > { %v3948_v61 = vmul.f32 %v3946_v48, %v3946_v48  ;;  %v3947_v25 = vmul.f32 %v3945_v28, %v3945_v28 }
0x26d7   : > { %v3952_v31 = vsel %vm697_vm0, %v3948_v61, 0.0  ;;  %v3949_v19 = vsel %vm697_vm0, %v3947_v25, 0.0 }
0x26d8   : > { %3953 = vadd.xlane.f32.xlu1 %v3952_v31  ;;  %3950 = vadd.xlane.f32.xlu0 %v3949_v19 }
0x2765   : > { %v3954_v57 = vpop.xlane.xlu1 %3953  ;;  %v3951_v22 = vpop.xlane.xlu0 %3950 }
0x2766   : > { %v3956_v59 = vmul.f32 0.015625, %v3954_v57  ;;  %v3955_v12 = vmul.f32 0.015625, %v3951_v22 }
0x2768   : > { %v3958_v13 = vadd.f32 1e-05, %v3956_v59  ;;  %v3957_v17 = vadd.f32 1e-05, %v3955_v12 }
0x276a   : > { %8978 = vrsqrt.f32 %v3958_v13 }
0x276b   : > { %8980 = vrsqrt.f32 %v3957_v17 }
0x2774   : > { %v8979_v60 = vpop.eup %8978 }
0x2775   : > { %v8981_v5 = vpop.eup %8980  ;;  %v3962_v8 = vmul.f32 %v8979_v60, %v3946_v48 }
0x2776   : > { %v3961_v6 = vmul.f32 %v8981_v5, %v3945_v28 }
0x2777   : > { %v3968_v10 = vmul.f32 %v3966_v62, %v3962_v8 }
0x2778   : > { %v3967_v46 = vmul.f32 %v3966_v62, %v3961_v6 }
0x2779   : > { %v3974_v45 = vadd.f32 %v3972_v7, %v3968_v10 }
0x277a   : > { %v3973_v9 = vadd.f32 %v3972_v7, %v3967_v46 }
0x277c   : > { %7051 = vmatmul.mubr.msk.f32.vlgmr.msra.gmra.mrb[26].mxu1 %vm697_vm0, %v3973_v9 }
0x277d   : > { %4081 = vmatprep.mubr.f32.mxu1 %v9095_v51 }
0x2780   : > { %7052 = vmatmul.mubr.msk.f32.gmra.mrb[28].mxu1 %vm697_vm0, %v3974_v45 }
0x284f   : > { %v4077_v15 = vpop.f32.mrb[26].mxu1 }
0x2850   : > { %v10173_v16 = vadd.f32 %v4077_v15, %v3998_v0  ;;  %v4079_v20 = vpop.f32.mrb[27].mxu1 }
0x2851   : > { %v4080_v25 = vadd.f32 %v4079_v20, %v4002_v24 }
0x2852   : > { %7881 = vmatprep.mubr.msk.f32.mxu1 %vm936_vm1, %v10173_v16 }
0x2853   : > { %v4083_v48 = vpop.f32.mrb[28].mxu1 }
0x2854   : > { %v10178_v28 = vadd.f32 %v4083_v48, %v3998_v0  ;;  %v4085_v61 = vpop.f32.mrb[29].mxu1 }
0x2855   : > { %v4086_v31 = vadd.f32 %v4085_v61, %v4002_v24 }
0x2856   : > { %v10182_v19 = vpack.i.bf16 %v10178_v28, %v10173_v16 }
0x2857   : > { %v8482_v18 = vpack.c.bf16 %v4086_v31, %v4080_v25  ;;  %v10184_v32 = vpack.i.bf16 %v4086_v31, %v4080_v25 }
0x2858   : > { %8807 = vrot.lane.b32.xlu0 %v10182_v19, %s10835_s1 }
0x2859   : > { %8483 = vmatprep.subr.bf16.mxu0 %v8482_v18 }
0x285a   : > { %8485 = vmatpush3.bf16.msra.mxu0 %v8482_v18 }
0x285c   : > { %4280 = vrot.lane.b32.xlu0 %v10173_v16, %s10836_s26 }
0x2860   : > { %4282 = vrot.lane.b32.xlu0 %v10178_v28, %s10836_s26 }
0x28ca   : > { %v8808_v34 = vpop.permute.xlu0 %8807 }
0x28cb   : > { %v8810_v36 = vunpack.i.h.bf16 %v8808_v34  ;;  %v8809_v44 = vunpack.i.l.bf16 %v8808_v34 }
0x28cd   : > { %v8476_v43 = vpack.c.bf16 %v8810_v36, %v8809_v44 }
0x28ce   : > { %v4281_v60 = vpop.permute.xlu0 %4280 }
0x28cf   : > { %8478 = vmatprep.subr.msk.bf16.mxu1 %vm9375_vm2, %v8476_v43 }
0x28d0   : > { %8481 = vmatpush3.bf16.xpose.msk.msra.mxu1 %vm9375_vm2, %v8476_v43 }
0x28d2   : > { %v4283_v62 = vpop.permute.xlu0 %4282 }
0x28d7   : > { %7882 = vmatmul.mubr.msk.f32.vlgmr.msra.gmra.mrb[30].mxu1 %vm936_vm1, %v10178_v28 }
0x29aa   : > { %v7883_v40 = vpop.f32.mrb[30].mxu1 }
0x29ab   : > { %v4168_v26 = vpop.f32.mrb[31].mxu1  ;;  %v4180_v29 = vsel %vm936_vm1, %v7883_v40, -inf }
0x29ac   : > { %v4177_v47 = vsel %vm936_vm1, %v4168_v26, -inf }
0x29ad   : > { %4178 = vmax.xlane.f32.xlu1 %v4177_v47 }
0x29b1   : > { %4181 = vmax.xlane.f32.xlu1 %v4180_v29 }
0x2a3a   : > { %v4179_v39 = vpop.xlane.xlu1 %4178 }
0x2a3b   : > { %v4183_v53 = vsub.f32 %v4168_v26, %v4179_v39 }
0x2a3d   : > { %v4185_v35 = vmul.f32 1.442695, %v4183_v53 }
0x2a3e   : > { %v4182_v49 = vpop.xlane.xlu1 %4181 }
0x2a3f   : > { %v4184_v27 = vsub.f32 %v7883_v40, %v4182_v49 }
0x2a41   : > { %v4187_v38 = vmul.f32 1.442695, %v4184_v27 }
0x2a43   : > { %8982 = vpow2.f32 %v4187_v38 }
0x2a44   : > { %8984 = vpow2.f32 %v4185_v35 }
0x2a4d   : > { %v8983_v58 = vpop.eup %8982 }
0x2a4e   : > { %v4192_v50 = vsel %vm936_vm1, %v8983_v58, 0.0  ;;  %v8985_v2 = vpop.eup %8984 }
0x2a4f   : > { %4193 = vadd.xlane.f32.xlu1 %v4192_v50  ;;  %v4189_v52 = vsel %vm936_vm1, %v8985_v2, 0.0 }
0x2a53   : > { %4190 = vadd.xlane.f32.xlu1 %v4189_v52 }
0x2a64   : > { %8812 = vrot.lane.b32.xlu1 %v10182_v19, %s10834_s28 }
0x2adc   : > { %v4194_v54 = vpop.xlane.xlu1 %4193 }
0x2add   : > { %8986 = vrcp.f32 %v4194_v54 }
0x2ae0   : > { %v4191_v37 = vpop.xlane.xlu1 %4190 }
0x2ae1   : > { %8988 = vrcp.f32 %v4191_v37 }
0x2ae4   : > { %v8813_v63 = vpop.permute.xlu1 %8812 }
0x2ae5   : > { %v8815_v21 = vunpack.i.h.bf16 %v8813_v63  ;;  %v8814_v57 = vunpack.i.l.bf16 %v8813_v63 }
0x2ae7   : > { %v8486_v22 = vpack.c.bf16 %v8815_v21, %v8814_v57  ;;  %v8987_v59 = vpop.eup %8986 }
0x2ae8   : > { %v4198_v17 = vmul.f32 %v8987_v59, %v8983_v58 }
0x2ae9   : > { %8488 = vmatprep.subr.msk.bf16.mxu0 %vm9375_vm2, %v8486_v22 }
0x2aeb   : > { %v8989_v12 = vpop.eup %8988 }
0x2aec   : > { %v4197_v13 = vmul.f32 %v8989_v12, %v8985_v2 }
0x2aee   : > { %7888 = vmatprep.mubr.msk.f32.mxu0 %vm936_vm1, %v4197_v13 }
0x2aef   : > { %7889 = vmatmul.mubr.msk.f32.vlgmr.msra.gmra.mrb[36].mxu0 %vm936_vm1, %v4198_v17 }
0x2af0   : > { %8491 = vmatpush3.bf16.xpose.msk.msra.mxu0 %vm9375_vm2, %v8486_v22  ;;  %7895 = vmatprep.mubr.msk.f32.mxu0 %vm936_vm1, %v4281_v60 }
0x2af7   : > { %7896 = vmatmul.mubr.msk.f32.vlgmr.msra.gmra.mrb[38].mxu0 %vm936_vm1, %v4283_v62 }
0x2bc2   : > { %v10212_v5 = vpop.f32.mrb[36].mxu0 }
0x2bc3   : > { %v10214_v6 = vpop.f32.mrb[37].mxu0 }
0x2bca   : > { %v7897_v7 = vpop.f32.mrb[38].mxu0 }
0x2bcb   : > { %v4362_v8 = vpop.f32.mrb[39].mxu0  ;;  %v4374_v46 = vsel %vm936_vm1, %v7897_v7, -inf }
0x2bcc   : > { %4375 = vmax.xlane.f32.xlu1 %v4374_v46  ;;  %v4371_v9 = vsel %vm936_vm1, %v4362_v8, -inf }
0x2bcd   : > { %4372 = vmax.xlane.f32.xlu0 %v4371_v9 }
0x2bdd   : > { %8822 = vrot.lane.b32.xlu1 %v10182_v19, %s10837_s2 }
0x2be1   : > { %4482 = vrot.lane.b32.xlu1 %v10173_v16, %s10838_s29 }
0x2be5   : > { %4484 = vrot.lane.b32.xlu1 %v10178_v28, %s10838_s29 }
0x2c59   : > { %v4376_v10 = vpop.xlane.xlu1 %4375 }
0x2c5a   : > { %v4378_v45 = vsub.f32 %v7897_v7, %v4376_v10  ;;  %v4373_v41 = vpop.xlane.xlu0 %4372 }
0x2c5b   : > { %v4377_v0 = vsub.f32 %v4362_v8, %v4373_v41 }
0x2c5c   : > { %v4381_v15 = vmul.f32 1.442695, %v4378_v45 }
0x2c5d   : > { %v4379_v20 = vmul.f32 1.442695, %v4377_v0  ;;  %v8823_v34 = vpop.permute.xlu1 %8822 }
0x2c5e   : > { %8990 = vpow2.f32 %v4381_v15  ;;  %v8825_v44 = vunpack.i.h.bf16 %v8823_v34  ;;  %v8824_v43 = vunpack.i.l.bf16 %v8823_v34 }
0x2c5f   : > { %8992 = vpow2.f32 %v4379_v20 }
0x2c60   : > { %v8496_v29 = vpack.c.bf16 %v8825_v44, %v8824_v43 }
0x2c61   : > { %v4483_v35 = vpop.permute.xlu1 %4482 }
0x2c65   : > { %v4485_v38 = vpop.permute.xlu1 %4484 }
0x2c68   : > { %v8991_v24 = vpop.eup %8990 }
0x2c69   : > { %v4386_v48 = vsel %vm936_vm1, %v8991_v24, 0.0  ;;  %v8993_v61 = vpop.eup %8992 }
0x2c6a   : > { %4387 = vadd.xlane.f32.xlu0 %v4386_v48  ;;  %v4383_v25 = vsel %vm936_vm1, %v8993_v61, 0.0 }
0x2c6e   : > { %4384 = vadd.xlane.f32.xlu0 %v4383_v25 }
0x2c84   : > { %8817 = vrot.lane.b32.xlu0 %v10184_v32, %s10836_s26 }
0x2cf7   : > { %v4388_v31 = vpop.xlane.xlu0 %4387 }
0x2cf8   : > { %8994 = vrcp.f32 %v4388_v31 }
0x2cfb   : > { %v4385_v18 = vpop.xlane.xlu0 %4384 }
0x2cfc   : > { %8996 = vrcp.f32 %v4385_v18 }
0x2cff   : > { %v8818_v36 = vpop.permute.xlu0 %8817 }
0x2d00   : > { %v8820_v40 = vunpack.i.h.bf16 %v8818_v36  ;;  %v8819_v26 = vunpack.i.l.bf16 %v8818_v36 }
0x2d02   : > { %v8492_v47 = vpack.c.bf16 %v8820_v40, %v8819_v26  ;;  %v8995_v39 = vpop.eup %8994 }
0x2d03   : > { %v4392_v27 = vmul.f32 %v8995_v39, %v8991_v24 }
0x2d04   : > { %8493 = vmatprep.subr.bf16.mxu1 %v8492_v47 }
0x2d05   : > { %8495 = vmatpush3.bf16.msra.mxu1 %v8492_v47 }
0x2d06   : > { %v8997_v53 = vpop.eup %8996  ;;  %8498 = vmatprep.subr.msk.bf16.mxu1 %vm9375_vm2, %v8496_v29 }
0x2d07   : > { %v4391_v49 = vmul.f32 %v8997_v53, %v8993_v61 }
0x2d09   : > { %7902 = vmatprep.mubr.msk.f32.mxu1 %vm936_vm1, %v4391_v49 }
0x2d0a   : > { %7903 = vmatmul.mubr.msk.f32.vlgmr.msra.gmra.mrb[32].mxu1 %vm936_vm1, %v4392_v27 }
0x2d0b   : > { %7909 = vmatprep.mubr.msk.f32.mxu1 %vm936_vm1, %v4483_v35 }
0x2d0e   : > { %8501 = vmatpush3.bf16.xpose.msk.msra.mxu1 %vm9375_vm2, %v8496_v29 }
0x2d15   : > { %7910 = vmatmul.mubr.msk.f32.vlgmr.msra.gmra.mrb[34].mxu1 %vm936_vm1, %v4485_v38 }
0x2ddd   : > { %v7904_v58 = vpop.f32.mrb[32].mxu1 }
0x2dde   : > { %v4473_v50 = vpop.f32.mrb[33].mxu1 }
0x2de8   : > { %v7911_v2 = vpop.f32.mrb[34].mxu1 }
0x2de9   : > { %v4564_v52 = vpop.f32.mrb[35].mxu1  ;;  %v4576_v54 = vsel %vm936_vm1, %v7911_v2, -inf }
0x2dea   : > { %4577 = vmax.xlane.f32.xlu1 %v4576_v54  ;;  %v4573_v37 = vsel %vm936_vm1, %v4564_v52, -inf }
0x2deb   : > { %4574 = vmax.xlane.f32.xlu0 %v4573_v37 }
0x2dfb   : > { %8832 = vrot.lane.b32.xlu1 %v10182_v19, %s10843_s0 }
0x2dff   : > { %4682 = vrot.lane.b32.xlu1 %v10173_v16, %s10844_s23 }
0x2e03   : > { %4684 = vrot.lane.b32.xlu1 %v10178_v28, %s10844_s23 }
0x2e77   : > { %v4578_v63 = vpop.xlane.xlu1 %4577 }
0x2e78   : > { %v4580_v21 = vsub.f32 %v7911_v2, %v4578_v63  ;;  %v4575_v57 = vpop.xlane.xlu0 %4574 }
0x2e79   : > { %v4579_v22 = vsub.f32 %v4564_v52, %v4575_v57 }
0x2e7a   : > { %v4583_v59 = vmul.f32 1.442695, %v4580_v21 }
0x2e7b   : > { %v4581_v12 = vmul.f32 1.442695, %v4579_v22  ;;  %v8833_v62 = vpop.permute.xlu1 %8832  ;;  %v7078_v22 = vld [vmem:[%s10774_s7 + $0x88] sm:$0xff] }
0x2e7c   : > { %8998 = vpow2.f32 %v4583_v59  ;;  %v8835_v8 = vunpack.i.h.bf16 %v8833_v62  ;;  %v8834_v46 = vunpack.i.l.bf16 %v8833_v62  ;;  %v7079_v59 = vld [vmem:[%s10774_s7 + $0x90] sm:$0xff]  ;;  %v7084_v62 = vld [vmem:[%s10774_s7 + $0xb8] sm:$0xff] }
0x2e7d   : > { %9000 = vpow2.f32 %v4581_v12 }
0x2e7e   : > { %v8506_v41 = vpack.c.bf16 %v8835_v8, %v8834_v46 }
0x2e7f   : > { %v4683_v48 = vpop.permute.xlu1 %4682 }
0x2e83   : > { %v4685_v61 = vpop.permute.xlu1 %4684 }
0x2e86   : > { %v8999_v13 = vpop.eup %8998 }
0x2e87   : > { %v4588_v17 = vsel %vm936_vm1, %v8999_v13, 0.0  ;;  %v9001_v60 = vpop.eup %9000 }
0x2e88   : > { %4589 = vadd.xlane.f32.xlu0 %v4588_v17  ;;  %v4585_v19 = vsel %vm936_vm1, %v9001_v60, 0.0 }
0x2e8c   : > { %4586 = vadd.xlane.f32.xlu0 %v4585_v19  ;;  %v7082_v19 = vld [vmem:[%s10774_s7 + $0xa8] sm:$0xff] }
0x2ea2   : > { %8827 = vrot.lane.b32.xlu0 %v10184_v32, %s10838_s29 }
0x2f15   : > { %v4590_v16 = vpop.xlane.xlu0 %4589 }
0x2f16   : > { %9002 = vrcp.f32 %v4590_v16 }
0x2f19   : > { %v4587_v28 = vpop.xlane.xlu0 %4586 }
0x2f1a   : > { %9004 = vrcp.f32 %v4587_v28  ;;  %v7083_v28 = vld [vmem:[%s10774_s7 + $0xb0] sm:$0xff] }
0x2f1d   : > { %v8828_v7 = vpop.permute.xlu0 %8827 }
0x2f1e   : > { %v8830_v9 = vunpack.i.h.bf16 %v8828_v7  ;;  %v8829_v10 = vunpack.i.l.bf16 %v8828_v7  ;;  %v8528_v7 = vpack.c.bf16 %v7084_v62, %v7083_v28  ;;  %v5039_v28 = vrot.slane %v10160_v23, %v9535_v55 }
0x2f20   : > { %v8502_v45 = vpack.c.bf16 %v8830_v9, %v8829_v10  ;;  %v9003_v0 = vpop.eup %9002 }
0x2f21   : > { %v4594_v24 = vmul.f32 %v9003_v0, %v8999_v13  ;;  %v7080_v13 = vld [vmem:[%s10774_s7 + $0x98] sm:$0xff] }
0x2f22   : > { %8503 = vmatprep.subr.bf16.mxu0 %v8502_v45  ;;  %v8520_v17 = vpack.c.bf16 %v7080_v13, %v7079_v59 }
0x2f23   : > { %8505 = vmatpush3.bf16.msra.mxu0 %v8502_v45 }
0x2f24   : > { %v9005_v15 = vpop.eup %9004  ;;  %8508 = vmatprep.subr.msk.bf16.mxu0 %vm9375_vm2, %v8506_v41 }
0x2f25   : > { %v4593_v20 = vmul.f32 %v9005_v15, %v9001_v60  ;;  %v7081_v60 = vld [vmem:[%s10774_s7 + $0xa0] sm:$0xff] }
0x2f26   : > { %v8524_v16 = vpack.c.bf16 %v7082_v19, %v7081_v60 }
0x2f27   : > { %7916 = vmatprep.mubr.msk.f32.mxu0 %vm936_vm1, %v4593_v20 }
0x2f28   : > { %7917 = vmatmul.mubr.msk.f32.vlgmr.msra.gmra.mrb[40].mxu0 %vm936_vm1, %v4594_v24 }
0x2f29   : > { %7923 = vmatprep.mubr.msk.f32.mxu0 %vm936_vm1, %v4683_v48 }
0x2f2c   : > { %8511 = vmatpush3.bf16.xpose.msk.msra.mxu0 %vm9375_vm2, %v8506_v41 }
0x2f33   : > { %7924 = vmatmul.mubr.msk.f32.vlgmr.msra.gmra.mrb[42].mxu0 %vm936_vm1, %v4685_v61 }
0x2ffb   : > { %v7918_v25 = vpop.f32.mrb[40].mxu0 }
0x2ffc   : > { %v4673_v31 = vpop.f32.mrb[41].mxu0 }
0x3006   : > { %v7925_v18 = vpop.f32.mrb[42].mxu0 }
0x3007   : > { %v4764_v34 = vpop.f32.mrb[43].mxu0  ;;  %v4776_v36 = vsel %vm936_vm1, %v7925_v18, -inf }
0x3008   : > { %4777 = vmax.xlane.f32.xlu1 %v4776_v36  ;;  %v4773_v44 = vsel %vm936_vm1, %v4764_v34, -inf }
0x3009   : > { %4774 = vmax.xlane.f32.xlu0 %v4773_v44 }
0x3019   : > { %4884 = vrot.lane.b32.xlu1 %v4473_v50, %s10843_s0 }
0x301d   : > { %4886 = vrot.lane.b32.xlu1 %v7904_v58, %s10843_s0 }
0x3021   : > { %4892 = vrot.lane.b32.xlu1 %v4673_v31, %s10837_s2 }
0x3095   : > { %v4778_v43 = vpop.xlane.xlu1 %4777 }
0x3096   : > { %v4780_v40 = vsub.f32 %v7925_v18, %v4778_v43  ;;  %v4775_v26 = vpop.xlane.xlu0 %4774 }
0x3097   : > { %v4779_v47 = vsub.f32 %v4764_v34, %v4775_v26 }
0x3098   : > { %v4783_v29 = vmul.f32 1.442695, %v4780_v40 }
0x3099   : > { %v4781_v39 = vmul.f32 1.442695, %v4779_v47  ;;  %v4885_v9 = vpop.permute.xlu1 %4884 }
0x309a   : > { %9006 = vpow2.f32 %v4783_v29  ;;  %v4906_v0 = vsel %vm936_vm1, %v10214_v6, %v4885_v9  ;;  %v5007_v6 = vrot.slane %v10160_v23, %v9492_v14 }
0x309b   : > { %9008 = vpow2.f32 %v4781_v39 }
0x309d   : > { %v4887_v10 = vpop.permute.xlu1 %4886 }
0x309e   : > { %v4907_v20 = vsel %vm936_vm1, %v10212_v5, %v4887_v10 }
0x30a1   : > { %v4893_v41 = vpop.permute.xlu1 %4892 }
0x30a2   : > { %v4908_v24 = vsel %vm1751_vm3, %v4906_v0, %v4893_v41 }
0x30a4   : > { %v9007_v53 = vpop.eup %9006 }
0x30a5   : > { %v4788_v49 = vsel %vm936_vm1, %v9007_v53, 0.0  ;;  %v9009_v27 = vpop.eup %9008 }
0x30a6   : > { %4789 = vadd.xlane.f32.xlu0 %v4788_v49  ;;  %v4785_v35 = vsel %vm936_vm1, %v9009_v27, 0.0 }
0x30aa   : > { %4786 = vadd.xlane.f32.xlu0 %v4785_v35 }
0x30c0   : > { %8837 = vrot.lane.b32.xlu0 %v10184_v32, %s10844_s23  ;;  %v7077_v32 = vld [vmem:[%s10774_s7 + $0x80] sm:$0xff] }
0x30c1   : > { %v8516_v12 = vpack.c.bf16 %v7078_v22, %v7077_v32  ;;  %v7093_v32 = vld [vmem:[%s10775_s8 + $0xb0] sm:$0xff]  ;;  %v7094_v22 = vld [vmem:[%s10775_s8 + $0xb8] sm:$0xff] }
0x30c2   : > { %v8544_v59 = vpack.c.bf16 %v7094_v22, %v7093_v32 }
0x30c4   : > { %4894 = vrot.lane.b32.xlu0 %v7918_v25, %s10837_s2 }
0x3133   : > { %v4790_v38 = vpop.xlane.xlu0 %4789 }
0x3134   : > { %9010 = vrcp.f32 %v4790_v38 }
0x3137   : > { %v4787_v58 = vpop.xlane.xlu0 %4786 }
0x3138   : > { %9012 = vrcp.f32 %v4787_v58  ;;  %v7087_v58 = vld [vmem:[%s10775_s8 + $0x80] sm:$0xff] }
0x313b   : > { %v8838_v50 = vpop.permute.xlu0 %8837 }
0x313c   : > { %v8840_v2 = vunpack.i.h.bf16 %v8838_v50  ;;  %v8839_v52 = vunpack.i.l.bf16 %v8838_v50  ;;  %v7088_v50 = vld [vmem:[%s10775_s8 + $0x88] sm:$0xff] }
0x313e   : > { %v8512_v54 = vpack.c.bf16 %v8840_v2, %v8839_v52  ;;  %v9011_v37 = vpop.eup %9010  ;;  %v8532_v2 = vpack.c.bf16 %v7088_v50, %v7087_v58  ;;  %v7089_v52 = vld [vmem:[%s10775_s8 + $0x90] sm:$0xff]  ;;  %v7096_v58 = vld [vmem:[%s10776_s9 + $0x2] ss:$0 sm:$0xff] }
0x313f   : > { %v4794_v57 = vmul.f32 %v9011_v37, %v9007_v53  ;;  %v4895_v45 = vpop.permute.xlu0 %4894 }
0x3140   : > { %8513 = vmatprep.subr.bf16.mxu1 %v8512_v54  ;;  %v4909_v61 = vsel %vm1751_vm3, %v4907_v20, %v4895_v45  ;;  %8533 = vmatprep.subr.bf16.mxu0 %v8532_v2  ;;  %v7100_v20 = vld [vmem:[%s10777_s10 + $0x108] sm:$0xff] }
0x3141   : > { %8515 = vmatpush3.bf16.msra.mxu1 %v8512_v54  ;;  %8535 = vmatpush3.bf16.msra.mxu0 %v8532_v2  ;;  %v7090_v54 = vld [vmem:[%s10775_s8 + $0x98] sm:$0xff] }
0x3142   : > { %v9013_v63 = vpop.eup %9012  ;;  %8517 = vmatprep.subr.bf16.mxu1 %v8516_v12  ;;  %v8536_v37 = vpack.c.bf16 %v7090_v54, %v7089_v52 }
0x3143   : > { %v4793_v21 = vmul.f32 %v9013_v63, %v9009_v27  ;;  %v7091_v63 = vld [vmem:[%s10775_s8 + $0xa0] sm:$0xff] }
0x3144   : > { %8537 = vmatprep.subr.bf16.mxu0 %v8536_v37 }
0x3145   : > { %7930 = vmatprep.mubr.msk.f32.mxu1 %vm936_vm1, %v4793_v21  ;;  %8539 = vmatpush3.bf16.msra.mxu0 %v8536_v37  ;;  %v7092_v21 = vld [vmem:[%s10775_s8 + $0xa8] sm:$0xff] }
0x3146   : > { %7931 = vmatmul.mubr.msk.f32.vlgmr.msra.gmra.mrb[36].mxu1 %vm936_vm1, %v4794_v57  ;;  %v8540_v57 = vpack.c.bf16 %v7092_v21, %v7091_v63 }
0x3147   : > { %8519 = vmatpush3.bf16.msra.mxu1 %v8516_v12 }
0x3148   : > { %8521 = vmatprep.subr.bf16.mxu1 %v8520_v17  ;;  %8541 = vmatprep.subr.bf16.mxu0 %v8540_v57 }
0x3149   : > { %8543 = vmatpush3.bf16.msra.mxu0 %v8540_v57 }
0x314a   : > { %8545 = vmatprep.subr.bf16.mxu0 %v8544_v59 }
0x314b   : > { %8523 = vmatpush3.bf16.msra.mxu1 %v8520_v17 }
0x314c   : > { %8525 = vmatprep.subr.bf16.mxu1 %v8524_v16 }
0x314d   : > { %8547 = vmatpush3.bf16.msra.mxu0 %v8544_v59 }
0x314f   : > { %8527 = vmatpush3.bf16.msra.mxu1 %v8524_v16 }
0x3150   : > { %8529 = vmatprep.subr.bf16.mxu1 %v8528_v7 }
0x3153   : > { %8531 = vmatpush3.bf16.msra.mxu1 %v8528_v7 }
0x3219   : > { %v7932_v8 = vpop.f32.mrb[36].mxu1 }
0x321a   : > { %4902 = vrot.lane.b32.xlu0 %v7932_v8, %s10834_s28  ;;  %v4873_v46 = vpop.f32.mrb[37].mxu1  ;;  %v5045_v8 = vrot.slane %v10160_v23, %v9538_v56 }
0x321b   : > { %4900 = vrot.lane.b32.xlu1 %v4873_v46, %s10834_s28 }
0x328c   : > { %v4903_v15 = vpop.permute.xlu0 %4902 }
0x328d   : > { %v4901_v48 = vpop.permute.xlu1 %4900  ;;  %v4911_v31 = vsel %vm1754_vm4, %v4909_v61, %v4903_v15  ;;  %v7099_v15 = vld [vmem:[%s10777_s10 + $0x100] sm:$0xff]  ;;  %v7102_v61 = vld [vmem:[%s10777_s10 + $0x118] sm:$0xff] }
0x328e   : > { %v4910_v25 = vsel %vm1754_vm4, %v4908_v24, %v4901_v48  ;;  %v8548_v24 = vpack.c.bf16 %v7100_v20, %v7099_v15  ;;  %v7101_v48 = vld [vmem:[%s10777_s10 + $0x110] sm:$0xff] }
0x328f   : > { %7949 = vmatprep.mubr.msk.f32.mxu1 %vm697_vm0, %v4910_v25  ;;  %v8552_v25 = vpack.c.bf16 %v7102_v61, %v7101_v48 }
0x3290   : > { %7950 = vmatmul.mubr.msk.f32.vlgmr.msra.gmra.mrb[38].mxu1 %vm697_vm0, %v4911_v31  ;;  %8549 = vmatprep.subr.bf16.mxu1 %v8548_v24  ;;  %v7103_v31 = vld [vmem:[%s10777_s10 + $0x120] sm:$0xff] }
0x3291   : > { %8551 = vmatpush3.bf16.msra.mxu1 %v8548_v24 }
0x3292   : > { %8553 = vmatprep.subr.bf16.mxu1 %v8552_v25 }
0x3295   : > { %8555 = vmatpush3.bf16.msra.mxu1 %v8552_v25 }
0x3363   : > { %v7951_v18 = vpop.f32.mrb[38].mxu1 }
0x3364   : > { %v5003_v34 = vadd.f32 %v7951_v18, %v10097_v11  ;;  %v4993_v5 = vpop.f32.mrb[39].mxu1 }
0x3365   : > { %v5002_v36 = vadd.f32 %v4993_v5, %v10099_v4  ;;  %v7106_v5 = vld [vmem:[%s10777_s10 + $0x138] sm:$0xff] }
0x3366   : > { %v10308_v44 = vadd.f32 %v5007_v6, %v5003_v34  ;;  %v7105_v34 = vld [vmem:[%s10777_s10 + $0x130] sm:$0xff] }
0x3367   : > { %v10310_v43 = vadd.f32 %v5007_v6, %v5002_v36  ;;  %v7104_v6 = vld [vmem:[%s10777_s10 + $0x128] sm:$0xff]  ;;  %v8560_v36 = vpack.c.bf16 %v7106_v5, %v7105_v34 }
0x3368   : > { %v5013_v40 = vsel %vm697_vm0, %v10308_v44, 0.0  ;;  %v8556_v18 = vpack.c.bf16 %v7104_v6, %v7103_v31 }
0x3369   : > { %5014 = vadd.xlane.f32.xlu0 %v5013_v40  ;;  %v5010_v26 = vsel %vm697_vm0, %v10310_v43, 0.0  ;;  %v7107_v40 = vld [vmem:[%s10777_s10 + $0x140] sm:$0xff] }
0x336a   : > { %5011 = vadd.xlane.f32.xlu1 %v5010_v26  ;;  %8557 = vmatprep.subr.bf16.mxu1 %v8556_v18  ;;  %v7108_v26 = vld [vmem:[%s10777_s10 + $0x148] sm:$0xff] }
0x336b   : > { %8559 = vmatpush3.bf16.msra.mxu1 %v8556_v18 }
0x336c   : > { %8561 = vmatprep.subr.bf16.mxu1 %v8560_v36 }
0x336f   : > { %8563 = vmatpush3.bf16.msra.mxu1 %v8560_v36 }
0x33f6   : > { %v5015_v47 = vpop.xlane.xlu0 %5014 }
0x33f7   : > { %v5017_v29 = vmul.f32 0.015625, %v5015_v47  ;;  %v5012_v39 = vpop.xlane.xlu1 %5011  ;;  %v8564_v47 = vpack.c.bf16 %v7108_v26, %v7107_v40 }
0x33f8   : > { %v5016_v53 = vmul.f32 0.015625, %v5012_v39  ;;  %v7110_v39 = vld [vmem:[%s10777_s10 + $0x158] sm:$0xff] }
0x33f9   : > { %v5019_v11 = vsub.f32 %v10308_v44, %v5017_v29  ;;  %8565 = vmatprep.subr.bf16.mxu1 %v8564_v47  ;;  %v7109_v29 = vld [vmem:[%s10777_s10 + $0x150] sm:$0xff] }
0x33fa   : > { %v5018_v4 = vsub.f32 %v10310_v43, %v5016_v53  ;;  %8567 = vmatpush3.bf16.msra.mxu1 %v8564_v47  ;;  %v8568_v53 = vpack.c.bf16 %v7110_v39, %v7109_v29 }
0x33fb   : > { %v5021_v35 = vmul.f32 %v5019_v11, %v5019_v11 }
0x33fc   : > { %v5020_v49 = vmul.f32 %v5018_v4, %v5018_v4  ;;  %8569 = vmatprep.subr.bf16.mxu1 %v8568_v53 }
0x33fd   : > { %v5025_v38 = vsel %vm697_vm0, %v5021_v35, 0.0  ;;  %v7114_v35 = vld [vmem:[%s10777_s10 + $0x178] sm:$0xff] }
0x33fe   : > { %v5022_v27 = vsel %vm697_vm0, %v5020_v49, 0.0  ;;  %8571 = vmatpush3.bf16.msra.mxu1 %v8568_v53 }
0x33ff   : > { %5023 = vadd.xlane.f32.xlu0 %v5022_v27  ;;  %v7113_v27 = vld [vmem:[%s10777_s10 + $0x170] sm:$0xff] }
0x3403   : > { %5026 = vadd.xlane.f32.xlu0 %v5025_v38  ;;  %v8576_v38 = vpack.c.bf16 %v7114_v35, %v7113_v27 }
0x348c   : > { %v5024_v12 = vpop.xlane.xlu0 %5023 }
0x348d   : > { %v5028_v13 = vmul.f32 0.015625, %v5024_v12 }
0x348f   : > { %v5030_v17 = vadd.f32 1e-05, %v5028_v13 }
0x3490   : > { %v5027_v60 = vpop.xlane.xlu0 %5026 }
0x3491   : > { %9014 = vrsqrt.f32 %v5030_v17  ;;  %v5029_v19 = vmul.f32 0.015625, %v5027_v60 }
0x3493   : > { %v5031_v16 = vadd.f32 1e-05, %v5029_v19 }
0x3495   : > { %9016 = vrsqrt.f32 %v5031_v16 }
0x349b   : > { %v9015_v62 = vpop.eup %9014 }
0x349c   : > { %v5034_v7 = vmul.f32 %v9015_v62, %v5018_v4  ;;  %v7112_v4 = vld [vmem:[%s10777_s10 + $0x168] sm:$0xff] }
0x349e   : > { %v5040_v46 = vmul.f32 %v5039_v28, %v5034_v7 }
0x349f   : > { %v9017_v9 = vpop.eup %9016 }
0x34a0   : > { %v5035_v10 = vmul.f32 %v9017_v9, %v5019_v11  ;;  %v5046_v45 = vadd.f32 %v5045_v8, %v5040_v46  ;;  %v7111_v11 = vld [vmem:[%s10777_s10 + $0x160] sm:$0xff] }
0x34a1   : > { %v8572_v49 = vpack.c.bf16 %v7112_v4, %v7111_v11 }
0x34a2   : > { %v5041_v41 = vmul.f32 %v5039_v28, %v5035_v10  ;;  %7968 = vmatprep.mubr.msk.f32.mxu0 %vm697_vm0, %v5046_v45 }
0x34a3   : > { %8573 = vmatprep.subr.bf16.mxu1 %v8572_v49 }
0x34a4   : > { %v5047_v0 = vadd.f32 %v5045_v8, %v5041_v41  ;;  %8575 = vmatpush3.bf16.msra.mxu1 %v8572_v49 }
0x34a5   : > { %8577 = vmatprep.subr.bf16.mxu1 %v8576_v38 }
0x34a6   : > { %7969 = vmatmul.mubr.msk.f32.vlgmr.msra.gmra.mrb[44].mxu0 %vm697_vm0, %v5047_v0 }
0x34a7   : > { %5438 = vmatprep.mubr.f32.mxu0 %v9095_v51 }
0x34a8   : > { %8579 = vmatpush3.bf16.msra.mxu1 %v8576_v38 }
0x3579   : > { %v7970_v50 = vpop.f32.mrb[44].mxu0 }
0x357a   : > { %v5143_v2 = vadd.f32 %v7970_v50, %v7096_v58  ;;  %v5137_v52 = vpop.f32.mrb[45].mxu0 }
0x357b   : > { %v5138_v54 = vadd.f32 %v7096_v58, %v5137_v52 }
0x357c   : > { %v5149_v37 = vmul.f32 0.70710677, %v5143_v2  ;;  %v5147_v58 = vmul.f32 0.5, %v5143_v2 }
0x357d   : > { %v5148_v63 = vmul.f32 0.70710677, %v5138_v54  ;;  %v5146_v35 = vmul.f32 0.5, %v5138_v54 }
0x357e   : > { %v5155_v21 = vand.u32 2147483647, %v5149_v37  ;;  %vm5151_vm11 = vcmp.ge.f32.partialorder %v5149_v37, 0.0  ;;  %v5220_v37 = vrot.slane %v10160_v23, %v9601_v42 }
0x357f   : > { %v5154_v57 = vand.u32 2147483647, %v5148_v63  ;;  %vm5150_vm12 = vcmp.ge.f32.partialorder %v5148_v63, 0.0  ;;  %v5153_v39 = vsel %vm5151_vm11, 1.0, %v9103_v30 }
0x3580   : > { %v5157_v32 = vmul.f32 0.3275911, %v5155_v21  ;;  %v5183_v13 = vsub.f32 0.0, %v5155_v21  ;;  %v5152_v4 = vsel %vm5150_vm12, 1.0, %v9103_v30 }
0x3581   : > { %v5156_v22 = vmul.f32 0.3275911, %v5154_v57  ;;  %v5182_v17 = vsub.f32 0.0, %v5154_v57 }
0x3582   : > { %v5159_v59 = vadd.f32 1.0, %v5157_v32  ;;  %v5185_v19 = vmul.f32 %v5183_v13, %v5155_v21 }
0x3583   : > { %v5158_v12 = vadd.f32 1.0, %v5156_v22  ;;  %v5184_v62 = vmul.f32 %v5182_v17, %v5154_v57 }
0x3584   : > { %9018 = vrcp.f32 %v5159_v59  ;;  %v5188_v46 = vmul.f32 1.442695, %v5185_v19 }
0x3585   : > { %9020 = vrcp.f32 %v5158_v12  ;;  %v5186_v45 = vmul.f32 1.442695, %v5184_v62  ;;  %v7117_v62 = vld [vmem:[%s10830_s22 + $0x188] sm:$0xff] }
0x3586   : > { %9022 = vpow2.f32 %v5188_v46  ;;  %v7116_v46 = vld [vmem:[%s10830_s22 + $0x180] sm:$0xff] }
0x3587   : > { %9024 = vpow2.f32 %v5186_v45  ;;  %v7121_v45 = vld [vmem:[%s10830_s22 + $0x1a8] sm:$0xff] }
0x358e   : > { %v9019_v60 = vpop.eup %9018 }
0x358f   : > { %v9021_v16 = vpop.eup %9020  ;;  %v5165_v28 = vmul.f32 1.0614054, %v9019_v60 }
0x3590   : > { %v5164_v7 = vmul.f32 1.0614054, %v9021_v16  ;;  %v9023_v5 = vpop.eup %9022 }
0x3591   : > { %v5167_v8 = vadd.f32 -1.4531521, %v5165_v28  ;;  %v9025_v40 = vpop.eup %9024 }
0x3592   : > { %v5166_v9 = vadd.f32 -1.4531521, %v5164_v7  ;;  %v7119_v7 = vld [vmem:[%s10830_s22 + $0x198] sm:$0xff] }
0x3593   : > { %v5169_v10 = vmul.f32 %v9019_v60, %v5167_v8  ;;  %v8580_v8 = vpack.c.bf16 %v7119_v7, %v7117_v62 }
0x3594   : > { %v5168_v41 = vmul.f32 %v9021_v16, %v5166_v9  ;;  %v7118_v9 = vld [vmem:[%s10830_s22 + $0x190] sm:$0xff] }
0x3595   : > { %v5171_v0 = vadd.f32 1.4214138, %v5169_v10  ;;  %v8582_v10 = vpack.c.bf16 %v7118_v9, %v7116_v46  ;;  %8581 = vmatprep.subr.bf16.mxu0 %v8580_v8 }
0x3596   : > { %v5170_v15 = vadd.f32 1.4214138, %v5168_v41  ;;  %v7123_v41 = vld [vmem:[%s10830_s22 + $0x1b8] sm:$0xff] }
0x3597   : > { %v5173_v20 = vmul.f32 %v9019_v60, %v5171_v0  ;;  %8583 = vmatpush1.bf16.msra.mxu0 %v8582_v10  ;;  %v8584_v0 = vpack.c.bf16 %v7123_v41, %v7121_v45 }
0x3598   : > { %v5172_v24 = vmul.f32 %v9021_v16, %v5170_v15  ;;  %v7120_v15 = vld [vmem:[%s10830_s22 + $0x1a0] sm:$0xff] }
0x3599   : > { %v5175_v48 = vadd.f32 -0.28449672, %v5173_v20  ;;  %v7122_v20 = vld [vmem:[%s10830_s22 + $0x1b0] sm:$0xff]  ;;  %8585 = vmatprep.subr.bf16.mxu0 %v8584_v0 }
0x359a   : > { %v5174_v61 = vadd.f32 -0.28449672, %v5172_v24  ;;  %v8586_v24 = vpack.c.bf16 %v7122_v20, %v7120_v15 }
0x359b   : > { %v5177_v25 = vmul.f32 %v9019_v60, %v5175_v48  ;;  %v7125_v48 = vld [vmem:[%s10830_s22 + $0x1c8] sm:$0xff] }
0x359c   : > { %v5176_v31 = vmul.f32 %v9021_v16, %v5174_v61  ;;  %8587 = vmatpush1.bf16.msra.mxu0 %v8586_v24  ;;  %v7127_v61 = vld [vmem:[%s10830_s22 + $0x1d8] sm:$0xff] }
0x359d   : > { %v5179_v6 = vadd.f32 0.2548296, %v5177_v25  ;;  %v8588_v25 = vpack.c.bf16 %v7127_v61, %v7125_v48 }
0x359e   : > { %v5178_v18 = vadd.f32 0.2548296, %v5176_v31  ;;  %v7124_v31 = vld [vmem:[%s10830_s22 + $0x1c0] sm:$0xff] }
0x359f   : > { %v5181_v34 = vmul.f32 %v9019_v60, %v5179_v6  ;;  %v7126_v6 = vld [vmem:[%s10830_s22 + $0x1d0] sm:$0xff]  ;;  %8589 = vmatprep.subr.bf16.mxu0 %v8588_v25 }
0x35a0   : > { %v5180_v36 = vmul.f32 %v9021_v16, %v5178_v18  ;;  %v8590_v18 = vpack.c.bf16 %v7126_v6, %v7124_v31 }
0x35a1   : > { %v5191_v26 = vmul.f32 %v9023_v5, %v5181_v34  ;;  %v7129_v34 = vld [vmem:[%s10830_s22 + $0x1e8] sm:$0xff]  ;;  %v7131_v5 = vld [vmem:[%s10830_s22 + $0x1f8] sm:$0xff] }
0x35a2   : > { %v5190_v47 = vmul.f32 %v9025_v40, %v5180_v36  ;;  %8591 = vmatpush1.bf16.msra.mxu0 %v8590_v18  ;;  %v8592_v36 = vpack.c.bf16 %v7131_v5, %v7129_v34  ;;  %v7128_v40 = vld [vmem:[%s10830_s22 + $0x1e0] sm:$0xff] }
0x35a3   : > { %v5193_v29 = vsub.f32 1.0, %v5191_v26  ;;  %v7130_v26 = vld [vmem:[%s10830_s22 + $0x1f0] sm:$0xff] }
0x35a4   : > { %v5192_v53 = vsub.f32 1.0, %v5190_v47  ;;  %v8594_v47 = vpack.c.bf16 %v7130_v26, %v7128_v40  ;;  %8593 = vmatprep.subr.bf16.mxu0 %v8592_v36 }
0x35a5   : > { %v5195_v11 = vmul.f32 %v5193_v29, %v5153_v39 }
0x35a6   : > { %v5194_v49 = vmul.f32 %v5192_v53, %v5152_v4  ;;  %8595 = vmatpush1.bf16.msra.mxu0 %v8594_v47 }
0x35a7   : > { %v5197_v27 = vadd.f32 1.0, %v5195_v11 }
0x35a8   : > { %v5196_v38 = vadd.f32 1.0, %v5194_v49 }
0x35a9   : > { %v5199_v52 = vmul.f32 %v5197_v27, %v5147_v58  ;;  %v10471_v27 = vld [vmem:[%s10831_s24 + $0x18] sm:$0xff] }
0x35aa   : > { %v5198_v50 = vmul.f32 %v5196_v38, %v5146_v35  ;;  %v5329_v38 = vrot.slane %v10471_v27, %v9333_v1 }
0x35ac   : > { %8003 = vmatprep.mubr.f32.mxu1 %v5198_v50 }
0x35ad   : > { %8004 = vmatmul.mubr.f32.vlgmr.msra.gmra.mrb[40].mxu1 %v5199_v52  ;;  %v5335_v52 = vrot.slane %v10471_v27, %v9341_v3 }
0x3680   : > { %v8005_v63 = vpop.f32.mrb[40].mxu1 }
0x3681   : > { %v5293_v21 = vadd.f32 %v8005_v63, %v5220_v37  ;;  %v5287_v57 = vpop.f32.mrb[41].mxu1 }
0x3682   : > { %v5288_v32 = vadd.f32 %v5287_v57, %v5220_v37 }
0x3683   : > { %v10407_v22 = vadd.f32 %v5293_v21, %v10308_v44 }
0x3684   : > { %v10410_v59 = vadd.f32 %v5288_v32, %v10310_v43 }
0x3685   : > { %v5303_v2 = vsel %vm697_vm0, %v10407_v22, 0.0 }
0x3686   : > { %5304 = vadd.xlane.f32.xlu0 %v5303_v2  ;;  %v5300_v54 = vsel %vm697_vm0, %v10410_v59, 0.0  ;;  %v7132_v2 = vld [vmem:[%s10773_s6 + $0x6] sm:$0x3] }
0x3687   : > { %5301 = vadd.xlane.f32.xlu1 %v5300_v54  ;;  %v5361_v54 = vrot.slane %v7132_v2, %v9333_v1 }
0x3713   : > { %v5305_v12 = vpop.xlane.xlu0 %5304 }
0x3714   : > { %v5307_v23 = vmul.f32 0.015625, %v5305_v12  ;;  %v5302_v13 = vpop.xlane.xlu1 %5301 }
0x3715   : > { %v5306_v17 = vmul.f32 0.015625, %v5302_v13 }
0x3716   : > { %v5309_v60 = vsub.f32 %v10407_v22, %v5307_v23 }
0x3717   : > { %v5308_v44 = vsub.f32 %v10410_v59, %v5306_v17  ;;  %v5365_v17 = vrot.slane %v7132_v2, %v9341_v3 }
0x3718   : > { %v5311_v19 = vmul.f32 %v5309_v60, %v5309_v60 }
0x3719   : > { %v5310_v16 = vmul.f32 %v5308_v44, %v5308_v44 }
0x371a   : > { %v5315_v43 = vsel %vm697_vm0, %v5311_v19, 0.0 }
0x371b   : > { %5316 = vadd.xlane.f32.xlu0 %v5315_v43  ;;  %v5312_v28 = vsel %vm697_vm0, %v5310_v16, 0.0 }
0x371c   : > { %5313 = vadd.xlane.f32.xlu1 %v5312_v28 }
0x37a8   : > { %v5317_v29 = vpop.xlane.xlu0 %5316 }
0x37a9   : > { %v5319_v39 = vmul.f32 0.015625, %v5317_v29  ;;  %v5314_v53 = vpop.xlane.xlu1 %5313 }
0x37aa   : > { %v5318_v11 = vmul.f32 0.015625, %v5314_v53 }
0x37ab   : > { %v5321_v4 = vadd.f32 1e-05, %v5319_v39 }
0x37ac   : > { %v5320_v49 = vadd.f32 1e-05, %v5318_v11 }
0x37ad   : > { %9026 = vrsqrt.f32 %v5321_v4 }
0x37ae   : > { %9028 = vrsqrt.f32 %v5320_v49 }
0x37b7   : > { %v9027_v35 = vpop.eup %9026 }
0x37b8   : > { %v9029_v58 = vpop.eup %9028  ;;  %v5325_v37 = vmul.f32 %v9027_v35, %v5309_v60 }
0x37b9   : > { %v5324_v50 = vmul.f32 %v9029_v58, %v5308_v44 }
0x37ba   : > { %v5331_v57 = vmul.f32 %v5329_v38, %v5325_v37 }
0x37bb   : > { %v5330_v63 = vmul.f32 %v5329_v38, %v5324_v50 }
0x37bc   : > { %v5337_v32 = vadd.f32 %v5335_v52, %v5331_v57 }
0x37bd   : > { %v5336_v21 = vadd.f32 %v5335_v52, %v5330_v63 }
0x37bf   : > { %7133 = vmatmul.mubr.msk.f32.vlgmr.msra.gmra.mrb[46].mxu0 %vm697_vm0, %v5336_v21 }
0x37c0   : > { %5444 = vmatprep.mubr.f32.mxu0 %v9095_v51 }
0x37c3   : > { %7134 = vmatmul.mubr.msk.f32.gmra.mrb[48].mxu0 %vm697_vm0, %v5337_v32 }
0x3892   : > { %v5440_v12 = vpop.f32.mrb[46].mxu0 }
0x3893   : > { %v10484_v23 = vadd.f32 %v5440_v12, %v5361_v54  ;;  %v5442_v13 = vpop.f32.mrb[47].mxu0 }
0x3894   : > { %v5443_v19 = vadd.f32 %v5442_v13, %v5365_v17 }
0x3895   : > { %8010 = vmatprep.mubr.msk.f32.mxu0 %vm936_vm1, %v10484_v23 }
0x3896   : > { %v5446_v60 = vpop.f32.mrb[48].mxu0 }
0x3897   : > { %v10489_v51 = vadd.f32 %v5446_v60, %v5361_v54  ;;  %v5448_v44 = vpop.f32.mrb[49].mxu0 }
0x3898   : > { %v5449_v16 = vadd.f32 %v5448_v44, %v5365_v17 }
0x3899   : > { %v10493_v43 = vpack.i.bf16 %v10489_v51, %v10484_v23 }
0x389a   : > { %v8602_v1 = vpack.c.bf16 %v5449_v16, %v5443_v19  ;;  %v10495_v28 = vpack.i.bf16 %v5449_v16, %v5443_v19 }
0x389b   : > { %8842 = vrot.lane.b32.xlu1 %v10493_v43, %s10835_s1  ;;  %s10845_s1 = sld [smem:[#allocation11_spill]] }
0x389f   : > { %8847 = vrot.lane.b32.xlu1 %v10493_v43, %s10834_s28 }
0x38a3   : > { %5645 = vrot.lane.b32.xlu1 %v10489_v51, %s10836_s26 }
0x390d   : > { %v8843_v3 = vpop.permute.xlu1 %8842 }
0x390e   : > { %v8845_v62 = vunpack.i.h.bf16 %v8843_v3  ;;  %v8844_v7 = vunpack.i.l.bf16 %v8843_v3 }
0x3910   : > { %v8596_v8 = vpack.c.bf16 %v8845_v62, %v8844_v7 }
0x3911   : > { %v8848_v46 = vpop.permute.xlu1 %8847 }
0x3912   : > { %8598 = vmatprep.subr.msk.bf16.mxu0 %vm9375_vm2, %v8596_v8  ;;  %v8850_v9 = vunpack.i.h.bf16 %v8848_v46  ;;  %v8849_v10 = vunpack.i.l.bf16 %v8848_v46 }
0x3913   : > { %8601 = vmatpush3.bf16.xpose.msk.msra.mxu0 %vm9375_vm2, %v8596_v8 }
0x3914   : > { %8603 = vmatprep.subr.bf16.mxu0 %v8602_v1  ;;  %v8606_v45 = vpack.c.bf16 %v8850_v9, %v8849_v10 }
0x3915   : > { %v5646_v4 = vpop.permute.xlu1 %5645 }
0x391a   : > { %8011 = vmatmul.mubr.msk.f32.vlgmr.msra.gmra.mrb[50].mxu0 %vm936_vm1, %v10489_v51 }
0x391b   : > { %8605 = vmatpush3.bf16.msra.mxu0 %v8602_v1 }
0x391c   : > { %8608 = vmatprep.subr.msk.bf16.mxu0 %vm9375_vm2, %v8606_v45 }
0x39ed   : > { %v8012_v41 = vpop.f32.mrb[50].mxu0 }
0x39ee   : > { %v5531_v0 = vpop.f32.mrb[51].mxu0  ;;  %v5543_v20 = vsel %vm936_vm1, %v8012_v41, -inf }
0x39ef   : > { %v5540_v15 = vsel %vm936_vm1, %v5531_v0, -inf }
0x39f0   : > { %5541 = vmax.xlane.f32.xlu0 %v5540_v15 }
0x39f4   : > { %5544 = vmax.xlane.f32.xlu0 %v5543_v20 }
0x3a7d   : > { %v5542_v24 = vpop.xlane.xlu0 %5541 }
0x3a7e   : > { %v5546_v48 = vsub.f32 %v5531_v0, %v5542_v24 }
0x3a80   : > { %v5548_v61 = vmul.f32 1.442695, %v5546_v48 }
0x3a81   : > { %v5545_v25 = vpop.xlane.xlu0 %5544 }
0x3a82   : > { %9030 = vpow2.f32 %v5548_v61  ;;  %v5547_v31 = vsub.f32 %v8012_v41, %v5545_v25 }
0x3a84   : > { %v5550_v6 = vmul.f32 1.442695, %v5547_v31 }
0x3a86   : > { %9032 = vpow2.f32 %v5550_v6 }
0x3a8c   : > { %v9031_v18 = vpop.eup %9030 }
0x3a8d   : > { %v5552_v34 = vsel %vm936_vm1, %v9031_v18, 0.0 }
0x3a8e   : > { %5553 = vadd.xlane.f32.xlu0 %v5552_v34 }
0x3a90   : > { %v9033_v5 = vpop.eup %9032 }
0x3a91   : > { %v5555_v36 = vsel %vm936_vm1, %v9033_v5, 0.0 }
0x3a92   : > { %5556 = vadd.xlane.f32.xlu0 %v5555_v36 }
0x3aa8   : > { %5643 = vrot.lane.b32.xlu0 %v10484_v23, %s10836_s26 }
0x3b1b   : > { %v5554_v40 = vpop.xlane.xlu0 %5553 }
0x3b1c   : > { %9034 = vrcp.f32 %v5554_v40 }
0x3b1f   : > { %v5557_v26 = vpop.xlane.xlu0 %5556 }
0x3b20   : > { %9036 = vrcp.f32 %v5557_v26 }
0x3b23   : > { %v5644_v11 = vpop.permute.xlu0 %5643 }
0x3b26   : > { %v9035_v47 = vpop.eup %9034 }
0x3b27   : > { %v5560_v29 = vmul.f32 %v9035_v47, %v9031_v18 }
0x3b29   : > { %8017 = vmatprep.mubr.msk.f32.mxu0 %vm936_vm1, %v5560_v29 }
0x3b2a   : > { %v9037_v39 = vpop.eup %9036 }
0x3b2b   : > { %v5561_v53 = vmul.f32 %v9037_v39, %v9033_v5 }
0x3b2d   : > { %8018 = vmatmul.mubr.msk.f32.vlgmr.msra.gmra.mrb[52].mxu0 %vm936_vm1, %v5561_v53 }
0x3b2e   : > { %8611 = vmatpush3.bf16.xpose.msk.msra.mxu0 %vm9375_vm2, %v8606_v45  ;;  %8024 = vmatprep.mubr.msk.f32.mxu0 %vm936_vm1, %v5644_v11 }
0x3b35   : > { %8025 = vmatmul.mubr.msk.f32.vlgmr.msra.gmra.mrb[54].mxu0 %vm936_vm1, %v5646_v4 }
0x3c00   : > { %v10523_v49 = vpop.f32.mrb[52].mxu0 }
0x3c01   : > { %v10525_v35 = vpop.f32.mrb[53].mxu0 }
0x3c08   : > { %v8026_v38 = vpop.f32.mrb[54].mxu0 }
0x3c09   : > { %v5725_v58 = vpop.f32.mrb[55].mxu0  ;;  %v5737_v50 = vsel %vm936_vm1, %v8026_v38, -inf }
0x3c0a   : > { %5738 = vmax.xlane.f32.xlu0 %v5737_v50  ;;  %v5734_v52 = vsel %vm936_vm1, %v5725_v58, -inf }
0x3c0b   : > { %5735 = vmax.xlane.f32.xlu1 %v5734_v52 }
0x3c1c   : > { %8852 = vrot.lane.b32.xlu1 %v10495_v28, %s10836_s26 }
0x3c20   : > { %8857 = vrot.lane.b32.xlu0 %v10493_v43, %s10837_s2  ;;  %5845 = vrot.lane.b32.xlu1 %v10484_v23, %s10838_s29 }
0x3c97   : > { %v5739_v37 = vpop.xlane.xlu0 %5738 }
0x3c98   : > { %v5741_v63 = vsub.f32 %v8026_v38, %v5739_v37  ;;  %v5736_v21 = vpop.xlane.xlu1 %5735 }
0x3c99   : > { %v5740_v57 = vsub.f32 %v5725_v58, %v5736_v21 }
0x3c9a   : > { %v5744_v32 = vmul.f32 1.442695, %v5741_v63 }
0x3c9b   : > { %v5742_v2 = vmul.f32 1.442695, %v5740_v57  ;;  %v8858_v54 = vpop.permute.xlu0 %8857 }
0x3c9c   : > { %9038 = vpow2.f32 %v5744_v32  ;;  %v8853_v12 = vpop.permute.xlu1 %8852  ;;  %v8860_v13 = vunpack.i.h.bf16 %v8858_v54  ;;  %v8859_v17 = vunpack.i.l.bf16 %v8858_v54 }
0x3c9d   : > { %v8855_v60 = vunpack.i.h.bf16 %v8853_v12  ;;  %v8854_v44 = vunpack.i.l.bf16 %v8853_v12  ;;  %9040 = vpow2.f32 %v5742_v2 }
0x3c9e   : > { %v8616_v16 = vpack.c.bf16 %v8860_v13, %v8859_v17 }
0x3c9f   : > { %v8612_v19 = vpack.c.bf16 %v8855_v60, %v8854_v44 }
0x3ca0   : > { %v5846_v8 = vpop.permute.xlu1 %5845 }
0x3ca1   : > { %8613 = vmatprep.subr.bf16.mxu1 %v8612_v19 }
0x3ca2   : > { %8615 = vmatpush3.bf16.msra.mxu1 %v8612_v19 }
0x3ca3   : > { %8618 = vmatprep.subr.msk.bf16.mxu1 %vm9375_vm2, %v8616_v16 }
0x3ca6   : > { %v9039_v1 = vpop.eup %9038 }
0x3ca7   : > { %v5749_v3 = vsel %vm936_vm1, %v9039_v1, 0.0  ;;  %v9041_v62 = vpop.eup %9040 }
0x3ca8   : > { %5750 = vadd.xlane.f32.xlu1 %v5749_v3  ;;  %v5746_v7 = vsel %vm936_vm1, %v9041_v62, 0.0 }
0x3cac   : > { %5747 = vadd.xlane.f32.xlu1 %v5746_v7 }
0x3cbd   : > { %5847 = vrot.lane.b32.xlu1 %v10489_v51, %s10838_s29 }
0x3d35   : > { %v5751_v46 = vpop.xlane.xlu1 %5750 }
0x3d36   : > { %9042 = vrcp.f32 %v5751_v46 }
0x3d39   : > { %v5748_v9 = vpop.xlane.xlu1 %5747 }
0x3d3a   : > { %9044 = vrcp.f32 %v5748_v9 }
0x3d3d   : > { %v5848_v15 = vpop.permute.xlu1 %5847 }
0x3d40   : > { %v9043_v10 = vpop.eup %9042 }
0x3d41   : > { %v5755_v0 = vmul.f32 %v9043_v10, %v9039_v1 }
0x3d44   : > { %v9045_v45 = vpop.eup %9044 }
0x3d45   : > { %v5754_v41 = vmul.f32 %v9045_v45, %v9041_v62 }
0x3d47   : > { %8031 = vmatprep.mubr.msk.f32.mxu1 %vm936_vm1, %v5754_v41 }
0x3d48   : > { %8032 = vmatmul.mubr.msk.f32.vlgmr.msra.gmra.mrb[42].mxu1 %vm936_vm1, %v5755_v0 }
0x3d49   : > { %8621 = vmatpush3.bf16.xpose.msk.msra.mxu1 %vm9375_vm2, %v8616_v16  ;;  %8038 = vmatprep.mubr.msk.f32.mxu1 %vm936_vm1, %v5846_v8 }
0x3d50   : > { %8039 = vmatmul.mubr.msk.f32.vlgmr.msra.gmra.mrb[44].mxu1 %vm936_vm1, %v5848_v15 }
0x3e1b   : > { %v8033_v20 = vpop.f32.mrb[42].mxu1 }
0x3e1c   : > { %v10547_v24 = vpop.f32.mrb[43].mxu1 }
0x3e23   : > { %v8040_v48 = vpop.f32.mrb[44].mxu1 }
0x3e24   : > { %v5927_v61 = vpop.f32.mrb[45].mxu1  ;;  %v5939_v25 = vsel %vm936_vm1, %v8040_v48, -inf }
0x3e25   : > { %5940 = vmax.xlane.f32.xlu0 %v5939_v25  ;;  %v5936_v31 = vsel %vm936_vm1, %v5927_v61, -inf }
0x3e26   : > { %5937 = vmax.xlane.f32.xlu1 %v5936_v31  ;;  %v7159_v31 = vld [vmem:[%s10774_s7 + $0xc0] sm:$0xff] }
0x3e37   : > { %8862 = vrot.lane.b32.xlu1 %v10495_v28, %s10838_s29  ;;  %s10846_s29 = sld [smem:[#allocation12_spill]] }
0x3e3b   : > { %6045 = vrot.lane.b32.xlu1 %v10484_v23, %s10844_s23 }
0x3e3f   : > { %6047 = vrot.lane.b32.xlu1 %v10489_v51, %s10844_s23 }
0x3eb2   : > { %v5941_v6 = vpop.xlane.xlu0 %5940 }
0x3eb3   : > { %v5943_v18 = vsub.f32 %v8040_v48, %v5941_v6  ;;  %v5938_v34 = vpop.xlane.xlu1 %5937  ;;  %v7161_v6 = vld [vmem:[%s10774_s7 + $0xd0] sm:$0xff] }
0x3eb4   : > { %v5942_v5 = vsub.f32 %v5927_v61, %v5938_v34  ;;  %v7162_v34 = vld [vmem:[%s10774_s7 + $0xd8] sm:$0xff] }
0x3eb5   : > { %v5946_v36 = vmul.f32 1.442695, %v5943_v18 }
0x3eb6   : > { %v5944_v40 = vmul.f32 1.442695, %v5942_v5  ;;  %v8640_v5 = vpack.c.bf16 %v7162_v34, %v7161_v6  ;;  %v6402_v34 = vrot.slane %v10471_v27, %v9535_v55 }
0x3eb7   : > { %9046 = vpow2.f32 %v5946_v36  ;;  %v8863_v26 = vpop.permute.xlu1 %8862  ;;  %v7163_v36 = vld [vmem:[%s10774_s7 + $0xe0] sm:$0xff] }
0x3eb8   : > { %v8865_v47 = vunpack.i.h.bf16 %v8863_v26  ;;  %v8864_v29 = vunpack.i.l.bf16 %v8863_v26  ;;  %9048 = vpow2.f32 %v5944_v40  ;;  %v7164_v40 = vld [vmem:[%s10774_s7 + $0xe8] sm:$0xff] }
0x3eb9   : > { %v8644_v26 = vpack.c.bf16 %v7164_v40, %v7163_v36  ;;  %v6408_v40 = vrot.slane %v10471_v27, %v9538_v56 }
0x3eba   : > { %v8622_v39 = vpack.c.bf16 %v8865_v47, %v8864_v29  ;;  %v7165_v47 = vld [vmem:[%s10774_s7 + $0xf0] sm:$0xff]  ;;  %v7166_v29 = vld [vmem:[%s10774_s7 + $0xf8] sm:$0xff] }
0x3ebb   : > { %v6046_v2 = vpop.permute.xlu1 %6045 }
0x3ebc   : > { %8623 = vmatprep.subr.bf16.mxu0 %v8622_v39 }
0x3ebd   : > { %8625 = vmatpush3.bf16.msra.mxu0 %v8622_v39  ;;  %v8648_v39 = vpack.c.bf16 %v7166_v29, %v7165_v47 }
0x3ec1   : > { %v9047_v53 = vpop.eup %9046 }
0x3ec2   : > { %v5951_v23 = vsel %vm936_vm1, %v9047_v53, 0.0  ;;  %v9049_v11 = vpop.eup %9048 }
0x3ec3   : > { %5952 = vadd.xlane.f32.xlu0 %v5951_v23  ;;  %v5948_v51 = vsel %vm936_vm1, %v9049_v11, 0.0 }
0x3ec7   : > { %5949 = vadd.xlane.f32.xlu0 %v5948_v51 }
0x3edd   : > { %8867 = vrot.lane.b32.xlu0 %v10493_v43, %s10843_s0  ;;  %v6048_v43 = vpop.permute.xlu1 %6047 }
0x3f50   : > { %v5953_v4 = vpop.xlane.xlu0 %5952 }
0x3f51   : > { %9050 = vrcp.f32 %v5953_v4 }
0x3f54   : > { %v5950_v38 = vpop.xlane.xlu0 %5949 }
0x3f55   : > { %9052 = vrcp.f32 %v5950_v38 }
0x3f58   : > { %v8868_v58 = vpop.permute.xlu0 %8867 }
0x3f59   : > { %v8870_v50 = vunpack.i.h.bf16 %v8868_v58  ;;  %v8869_v52 = vunpack.i.l.bf16 %v8868_v58 }
0x3f5b   : > { %v8626_v37 = vpack.c.bf16 %v8870_v50, %v8869_v52  ;;  %v9051_v63 = vpop.eup %9050 }
0x3f5c   : > { %v5957_v32 = vmul.f32 %v9051_v63, %v9047_v53 }
0x3f5d   : > { %8628 = vmatprep.subr.msk.bf16.mxu0 %vm9375_vm2, %v8626_v37 }
0x3f5f   : > { %v9053_v21 = vpop.eup %9052 }
0x3f60   : > { %v5956_v57 = vmul.f32 %v9053_v21, %v9049_v11 }
0x3f62   : > { %8045 = vmatprep.mubr.msk.f32.mxu0 %vm936_vm1, %v5956_v57 }
0x3f63   : > { %8046 = vmatmul.mubr.msk.f32.vlgmr.msra.gmra.mrb[56].mxu0 %vm936_vm1, %v5957_v32 }
0x3f64   : > { %8631 = vmatpush3.bf16.xpose.msk.msra.mxu0 %vm9375_vm2, %v8626_v37  ;;  %8052 = vmatprep.mubr.msk.f32.mxu0 %vm936_vm1, %v6046_v2 }
0x3f6b   : > { %8053 = vmatmul.mubr.msk.f32.vlgmr.msra.gmra.mrb[58].mxu0 %vm936_vm1, %v6048_v43 }
0x4036   : > { %v8047_v54 = vpop.f32.mrb[56].mxu0 }
0x4037   : > { %v6036_v12 = vpop.f32.mrb[57].mxu0 }
0x403e   : > { %v8054_v13 = vpop.f32.mrb[58].mxu0 }
0x403f   : > { %v6127_v17 = vpop.f32.mrb[59].mxu0  ;;  %v6139_v60 = vsel %vm936_vm1, %v8054_v13, -inf }
0x4040   : > { %6140 = vmax.xlane.f32.xlu0 %v6139_v60  ;;  %v6136_v44 = vsel %vm936_vm1, %v6127_v17, -inf }
0x4041   : > { %6137 = vmax.xlane.f32.xlu1 %v6136_v44 }
0x4052   : > { %8872 = vrot.lane.b32.xlu1 %v10495_v28, %s10844_s23 }
0x4056   : > { %6249 = vrot.lane.b32.xlu1 %v8033_v20, %s10843_s0 }
0x405a   : > { %6255 = vrot.lane.b32.xlu1 %v6036_v12, %s10837_s2 }
0x405e   : > { %6257 = vrot.lane.b32.xlu1 %v8047_v54, %s10837_s2 }
0x40cd   : > { %v6141_v33 = vpop.xlane.xlu0 %6140 }
0x40ce   : > { %v6143_v19 = vsub.f32 %v8054_v13, %v6141_v33  ;;  %v6138_v16 = vpop.xlane.xlu1 %6137 }
0x40cf   : > { %v6142_v1 = vsub.f32 %v6127_v17, %v6138_v16 }
0x40d0   : > { %v6146_v3 = vmul.f32 1.442695, %v6143_v19 }
0x40d1   : > { %v6144_v62 = vmul.f32 1.442695, %v6142_v1 }
0x40d2   : > { %v8873_v7 = vpop.permute.xlu1 %8872 }
0x40d3   : > { %9054 = vpow2.f32 %v6144_v62  ;;  %v8875_v8 = vunpack.i.h.bf16 %v8873_v7  ;;  %v8874_v46 = vunpack.i.l.bf16 %v8873_v7  ;;  %v7169_v7 = vld [vmem:[%s10775_s8 + $0xc0] sm:$0xff] }
0x40d4   : > { %9056 = vpow2.f32 %v6146_v3 }
0x40d5   : > { %v8632_v9 = vpack.c.bf16 %v8875_v8, %v8874_v46  ;;  %v7170_v8 = vld [vmem:[%s10775_s8 + $0xc8] sm:$0xff] }
0x40d6   : > { %v6250_v11 = vpop.permute.xlu1 %6249  ;;  %v8652_v46 = vpack.c.bf16 %v7170_v8, %v7169_v7 }
0x40d7   : > { %8633 = vmatprep.subr.bf16.mxu1 %v8632_v9  ;;  %v6270_v52 = vsel %vm936_vm1, %v10523_v49, %v6250_v11  ;;  %v7181_v11 = vld [vmem:[%s10777_s10 + $0x180] sm:$0xff] }
0x40d8   : > { %8635 = vmatpush3.bf16.msra.mxu1 %v8632_v9  ;;  %8653 = vmatprep.subr.bf16.mxu0 %v8652_v46  ;;  %v7171_v9 = vld [vmem:[%s10775_s8 + $0xd0] sm:$0xff] }
0x40d9   : > { %8655 = vmatpush3.bf16.msra.mxu0 %v8652_v46 }
0x40da   : > { %v6256_v51 = vpop.permute.xlu1 %6255 }
0x40dd   : > { %v9055_v28 = vpop.eup %9054 }
0x40de   : > { %v6148_v10 = vsel %vm936_vm1, %v9055_v28, 0.0  ;;  %v9057_v45 = vpop.eup %9056  ;;  %v6258_v38 = vpop.permute.xlu1 %6257 }
0x40df   : > { %6149 = vadd.xlane.f32.xlu0 %v6148_v10  ;;  %v6151_v41 = vsel %vm936_vm1, %v9057_v45, 0.0  ;;  %v6272_v21 = vsel %vm1751_vm3, %v6270_v52, %v6258_v38  ;;  %v7183_v38 = vld [vmem:[%s10777_s10 + $0x190] sm:$0xff]  ;;  %v7185_v52 = vld [vmem:[%s10777_s10 + $0x1a0] sm:$0xff] }
0x40e3   : > { %6152 = vadd.xlane.f32.xlu0 %v6151_v41  ;;  %v7174_v41 = vld [vmem:[%s10775_s8 + $0xe8] sm:$0xff] }
0x40f9   : > { %6247 = vrot.lane.b32.xlu0 %v10547_v24, %s10843_s0  ;;  %v7160_v24 = vld [vmem:[%s10774_s7 + $0xc8] sm:$0xff]  ;;  %s10847_s0 = sld [smem:[#allocation3_spill]] }
0x40fa   : > { %v8636_v18 = vpack.c.bf16 %v7160_v24, %v7159_v31 }
0x40fc   : > { %8637 = vmatprep.subr.bf16.mxu1 %v8636_v18 }
0x40ff   : > { %s10848_s23 = sshll.u32 %s10847_s0, 3 }
0x4100   : > { %s679_s19 = scalar_lea.vmem %s10849_s18, %s10848_s23 }
0x416c   : > { %v6150_v0 = vpop.xlane.xlu0 %6149 }
0x416d   : > { %9058 = vrcp.f32 %v6150_v0 }
0x4170   : > { %v6153_v15 = vpop.xlane.xlu0 %6152 }
0x4171   : > { %9060 = vrcp.f32 %v6153_v15  ;;  %v7175_v15 = vld [vmem:[%s10775_s8 + $0xf0] sm:$0xff] }
0x4174   : > { %v6248_v4 = vpop.permute.xlu0 %6247 }
0x4175   : > { %v6269_v58 = vsel %vm936_vm1, %v10525_v35, %v6248_v4  ;;  %v6370_v35 = vrot.slane %v10471_v27, %v9492_v14 }
0x4176   : > { %v6271_v37 = vsel %vm1751_vm3, %v6269_v58, %v6256_v51  ;;  %v7182_v51 = vld [vmem:[%s10777_s10 + $0x188] sm:$0xff]  ;;  %v7184_v58 = vld [vmem:[%s10777_s10 + $0x198] sm:$0xff] }
0x4177   : > { %v9059_v20 = vpop.eup %9058  ;;  %v8668_v4 = vpack.c.bf16 %v7182_v51, %v7181_v11 }
0x4178   : > { %v6156_v48 = vmul.f32 %v9059_v20, %v9055_v28  ;;  %v7172_v28 = vld [vmem:[%s10775_s8 + $0xd8] sm:$0xff] }
0x4179   : > { %v8656_v10 = vpack.c.bf16 %v7172_v28, %v7171_v9  ;;  %v7176_v20 = vld [vmem:[%s10775_s8 + $0xf8] sm:$0xff] }
0x417a   : > { %8059 = vmatprep.mubr.msk.f32.mxu1 %vm936_vm1, %v6156_v48  ;;  %v8664_v48 = vpack.c.bf16 %v7176_v20, %v7175_v15 }
0x417b   : > { %v9061_v61 = vpop.eup %9060  ;;  %8657 = vmatprep.subr.bf16.mxu0 %v8656_v10 }
0x417c   : > { %v6157_v25 = vmul.f32 %v9061_v61, %v9057_v45  ;;  %8659 = vmatpush3.bf16.msra.mxu0 %v8656_v10  ;;  %v7173_v45 = vld [vmem:[%s10775_s8 + $0xe0] sm:$0xff] }
0x417d   : > { %v8660_v0 = vpack.c.bf16 %v7174_v41, %v7173_v45 }
0x417e   : > { %8060 = vmatmul.mubr.msk.f32.vlgmr.msra.gmra.mrb[46].mxu1 %vm936_vm1, %v6157_v25 }
0x417f   : > { %8639 = vmatpush3.bf16.msra.mxu1 %v8636_v18  ;;  %8661 = vmatprep.subr.bf16.mxu0 %v8660_v0 }
0x4180   : > { %8641 = vmatprep.subr.bf16.mxu1 %v8640_v5  ;;  %8663 = vmatpush3.bf16.msra.mxu0 %v8660_v0 }
0x4181   : > { %8665 = vmatprep.subr.bf16.mxu0 %v8664_v48 }
0x4183   : > { %8643 = vmatpush3.bf16.msra.mxu1 %v8640_v5 }
0x4184   : > { %8645 = vmatprep.subr.bf16.mxu1 %v8644_v26  ;;  %8667 = vmatpush3.bf16.msra.mxu0 %v8664_v48 }
0x4187   : > { %8647 = vmatpush3.bf16.msra.mxu1 %v8644_v26 }
0x4188   : > { %8649 = vmatprep.subr.bf16.mxu1 %v8648_v39 }
0x418b   : > { %8651 = vmatpush3.bf16.msra.mxu1 %v8648_v39 }
0x418c   : > { %8669 = vmatprep.subr.bf16.mxu1 %v8668_v4 }
0x4251   : > { %v8061_v53 = vpop.f32.mrb[46].mxu1 }
0x4252   : > { %6265 = vrot.lane.b32.xlu1 %v8061_v53, %s10834_s28  ;;  %v6236_v23 = vpop.f32.mrb[47].mxu1 }
0x4253   : > { %6263 = vrot.lane.b32.xlu0 %v6236_v23, %s10834_s28 }
0x42c4   : > { %v6266_v50 = vpop.permute.xlu1 %6265 }
0x42c5   : > { %v6264_v63 = vpop.permute.xlu0 %6263  ;;  %v6274_v32 = vsel %vm1754_vm4, %v6272_v21, %v6266_v50  ;;  %v8672_v50 = vpack.c.bf16 %v7184_v58, %v7183_v38  ;;  %v7187_v21 = vld [vmem:[%s10777_s10 + $0x1b0] sm:$0xff] }
0x42c6   : > { %v6273_v57 = vsel %vm1754_vm4, %v6271_v37, %v6264_v63  ;;  %v7186_v37 = vld [vmem:[%s10777_s10 + $0x1a8] sm:$0xff] }
0x42c7   : > { %8078 = vmatprep.mubr.msk.f32.mxu1 %vm697_vm0, %v6273_v57  ;;  %v8676_v63 = vpack.c.bf16 %v7186_v37, %v7185_v52  ;;  %v7188_v57 = vld [vmem:[%s10777_s10 + $0x1b8] sm:$0xff] }
0x42c8   : > { %8079 = vmatmul.mubr.msk.f32.vlgmr.msra.gmra.mrb[48].mxu1 %vm697_vm0, %v6274_v32  ;;  %v8680_v32 = vpack.c.bf16 %v7188_v57, %v7187_v21 }
0x42c9   : > { %8671 = vmatpush3.bf16.msra.mxu1 %v8668_v4 }
0x42ca   : > { %8673 = vmatprep.subr.bf16.mxu1 %v8672_v50 }
0x42cd   : > { %8675 = vmatpush3.bf16.msra.mxu1 %v8672_v50 }
0x42ce   : > { %8677 = vmatprep.subr.bf16.mxu1 %v8676_v63 }
0x42d1   : > { %8679 = vmatpush3.bf16.msra.mxu1 %v8676_v63 }
0x42d2   : > { %8681 = vmatprep.subr.bf16.mxu1 %v8680_v32 }
0x42d5   : > { %8683 = vmatpush3.bf16.msra.mxu1 %v8680_v32 }
0x439b   : > { %v8080_v2 = vpop.f32.mrb[48].mxu1 }
0x439c   : > { %v6366_v43 = vadd.f32 %v8080_v2, %v10407_v22  ;;  %v6356_v49 = vpop.f32.mrb[49].mxu1  ;;  %v7190_v2 = vld [vmem:[%s10777_s10 + $0x1c8] sm:$0xff] }
0x439d   : > { %v6365_v54 = vadd.f32 %v6356_v49, %v10410_v59  ;;  %v7191_v49 = vld [vmem:[%s10777_s10 + $0x1d0] sm:$0xff] }
0x439e   : > { %v10622_v12 = vadd.f32 %v6370_v35, %v6366_v43 }
0x439f   : > { %v10624_v13 = vadd.f32 %v6370_v35, %v6365_v54  ;;  %v7189_v35 = vld [vmem:[%s10777_s10 + $0x1c0] sm:$0xff]  ;;  %v7192_v54 = vld [vmem:[%s10777_s10 + $0x1d8] sm:$0xff] }
0x43a0   : > { %v6376_v17 = vsel %vm697_vm0, %v10622_v12, 0.0  ;;  %v8684_v43 = vpack.c.bf16 %v7190_v2, %v7189_v35 }
0x43a1   : > { %6377 = vadd.xlane.f32.xlu1 %v6376_v17  ;;  %v6373_v60 = vsel %vm697_vm0, %v10624_v13, 0.0  ;;  %v8688_v17 = vpack.c.bf16 %v7192_v54, %v7191_v49 }
0x43a2   : > { %6374 = vadd.xlane.f32.xlu0 %v6373_v60  ;;  %8685 = vmatprep.subr.bf16.mxu1 %v8684_v43  ;;  %v7193_v60 = vld [vmem:[%s10777_s10 + $0x1e0] sm:$0xff] }
0x43a3   : > { %8687 = vmatpush3.bf16.msra.mxu1 %v8684_v43 }
0x43a4   : > { %8689 = vmatprep.subr.bf16.mxu1 %v8688_v17 }
0x43a7   : > { %8691 = vmatpush3.bf16.msra.mxu1 %v8688_v17 }
0x442e   : > { %v6378_v44 = vpop.xlane.xlu1 %6377 }
0x442f   : > { %v6380_v14 = vmul.f32 0.015625, %v6378_v44  ;;  %v6375_v33 = vpop.xlane.xlu0 %6374  ;;  %v7194_v44 = vld [vmem:[%s10777_s10 + $0x1e8] sm:$0xff] }
0x4430   : > { %v6379_v19 = vmul.f32 0.015625, %v6375_v33  ;;  %v7195_v33 = vld [vmem:[%s10777_s10 + $0x1f0] sm:$0xff] }
0x4431   : > { %v6382_v22 = vsub.f32 %v10622_v12, %v6380_v14  ;;  %v8692_v14 = vpack.c.bf16 %v7194_v44, %v7193_v60 }
0x4432   : > { %v6381_v59 = vsub.f32 %v10624_v13, %v6379_v19  ;;  %v7196_v19 = vld [vmem:[%s10777_s10 + $0x1f8] sm:$0xff] }
0x4433   : > { %v6384_v3 = vmul.f32 %v6382_v22, %v6382_v22  ;;  %8693 = vmatprep.subr.bf16.mxu1 %v8692_v14 }
0x4434   : > { %v6383_v16 = vmul.f32 %v6381_v59, %v6381_v59  ;;  %8695 = vmatpush3.bf16.msra.mxu1 %v8692_v14 }
0x4435   : > { %v6388_v62 = vsel %vm697_vm0, %v6384_v3, 0.0 }
0x4436   : > { %v6385_v1 = vsel %vm697_vm0, %v6383_v16, 0.0 }
0x4437   : > { %6386 = vadd.xlane.f32.xlu0 %v6385_v1 }
0x443b   : > { %6389 = vadd.xlane.f32.xlu0 %v6388_v62 }
0x44c4   : > { %v6387_v61 = vpop.xlane.xlu0 %6386 }
0x44c5   : > { %v6391_v25 = vmul.f32 0.015625, %v6387_v61 }
0x44c7   : > { %v6393_v31 = vadd.f32 1e-05, %v6391_v25 }
0x44c8   : > { %v6390_v24 = vpop.xlane.xlu0 %6389 }
0x44c9   : > { %9062 = vrsqrt.f32 %v6393_v31  ;;  %v6392_v6 = vmul.f32 0.015625, %v6390_v24 }
0x44cb   : > { %v6394_v18 = vadd.f32 1e-05, %v6392_v6 }
0x44cd   : > { %9064 = vrsqrt.f32 %v6394_v18 }
0x44d3   : > { %v9063_v5 = vpop.eup %9062 }
0x44d4   : > { %v6397_v36 = vmul.f32 %v9063_v5, %v6381_v59  ;;  %v7178_v59 = vld [vmem:[%s10776_s9 + $0x3] ss:$0 sm:$0xff] }
0x44d6   : > { %v6403_v26 = vmul.f32 %v6402_v34, %v6397_v36 }
0x44d7   : > { %v9065_v47 = vpop.eup %9064 }
0x44d8   : > { %v6398_v29 = vmul.f32 %v9065_v47, %v6382_v22  ;;  %v6409_v39 = vadd.f32 %v6408_v40, %v6403_v26  ;;  %v8696_v22 = vpack.c.bf16 %v7196_v19, %v7195_v33  ;;  %v6583_v19 = vrot.slane %v10471_v27, %v9601_v42 }
0x44da   : > { %v6404_v53 = vmul.f32 %v6402_v34, %v6398_v29  ;;  %8097 = vmatprep.mubr.msk.f32.mxu0 %vm697_vm0, %v6409_v39  ;;  %8697 = vmatprep.subr.bf16.mxu1 %v8696_v22 }
0x44db   : > { %8699 = vmatpush3.bf16.msra.mxu1 %v8696_v22 }
0x44dc   : > { %v6410_v23 = vadd.f32 %v6408_v40, %v6404_v53 }
0x44de   : > { %8098 = vmatmul.mubr.msk.f32.vlgmr.msra.gmra.mrb[60].mxu0 %vm697_vm0, %v6410_v23 }
0x45b1   : > { %v8099_v16 = vpop.f32.mrb[60].mxu0 }
0x45b2   : > { %v6506_v1 = vadd.f32 %v8099_v16, %v7178_v59  ;;  %v6500_v3 = vpop.f32.mrb[61].mxu0 }
0x45b3   : > { %v6501_v62 = vadd.f32 %v7178_v59, %v6500_v3 }
0x45b4   : > { %v6512_v7 = vmul.f32 0.70710677, %v6506_v1  ;;  %v6510_v44 = vmul.f32 0.5, %v6506_v1 }
0x45b5   : > { %v6511_v8 = vmul.f32 0.70710677, %v6501_v62  ;;  %v6509_v17 = vmul.f32 0.5, %v6501_v62 }
0x45b6   : > { %v6518_v46 = vand.u32 2147483647, %v6512_v7  ;;  %vm6514_vm13 = vcmp.ge.f32.partialorder %v6512_v7, 0.0 }
0x45b7   : > { %v6517_v9 = vand.u32 2147483647, %v6511_v8  ;;  %vm6513_vm14 = vcmp.ge.f32.partialorder %v6511_v8, 0.0  ;;  %v6516_v32 = vsel %vm6514_vm13, 1.0, %v9103_v30 }
0x45b8   : > { %v6520_v28 = vmul.f32 0.3275911, %v6518_v46  ;;  %v6546_v0 = vsub.f32 0.0, %v6518_v46  ;;  %v6515_v43 = vsel %vm6513_vm14, 1.0, %v9103_v30 }
0x45b9   : > { %v6519_v10 = vmul.f32 0.3275911, %v6517_v9  ;;  %v6545_v15 = vsub.f32 0.0, %v6517_v9 }
0x45ba   : > { %v6522_v45 = vadd.f32 1.0, %v6520_v28  ;;  %v6548_v48 = vmul.f32 %v6546_v0, %v6518_v46  ;;  %v6700_v0 = vld [vmem:[%s10845_s1 + $0x8] sm:$0xff] }
0x45bb   : > { %v6521_v41 = vadd.f32 1.0, %v6519_v10  ;;  %v6547_v31 = vmul.f32 %v6545_v15, %v6517_v9 }
0x45bc   : > { %9066 = vrcp.f32 %v6522_v45  ;;  %v6551_v18 = vmul.f32 1.442695, %v6548_v48  ;;  %v6702_v48 = vld [vmem:[%s10845_s1 + $0x18] sm:$0xff] }
0x45bd   : > { %9068 = vrcp.f32 %v6521_v41  ;;  %v6549_v36 = vmul.f32 1.442695, %v6547_v31  ;;  %v6704_v31 = vld [vmem:[%s10845_s1 + $0x28] sm:$0xff] }
0x45be   : > { %9070 = vpow2.f32 %v6551_v18  ;;  %v6706_v18 = vld [vmem:[%s10845_s1 + $0x38] sm:$0xff] }
0x45bf   : > { %9072 = vpow2.f32 %v6549_v36 }
0x45c6   : > { %v9067_v20 = vpop.eup %9066 }
0x45c7   : > { %v9069_v61 = vpop.eup %9068  ;;  %v6528_v25 = vmul.f32 1.0614054, %v9067_v20 }
0x45c8   : > { %v6527_v24 = vmul.f32 1.0614054, %v9069_v61  ;;  %v9071_v50 = vpop.eup %9070 }
0x45c9   : > { %v6530_v6 = vadd.f32 -1.4531521, %v6528_v25  ;;  %v9073_v37 = vpop.eup %9072  ;;  %v6703_v25 = vld [vmem:[%s10845_s1 + $0x20] sm:$0xff] }
0x45ca   : > { %v6529_v34 = vadd.f32 -1.4531521, %v6527_v24  ;;  %v8708_v24 = vpack.c.bf16 %v6704_v31, %v6703_v25 }
0x45cb   : > { %v6532_v5 = vmul.f32 %v9067_v20, %v6530_v6  ;;  %v6705_v6 = vld [vmem:[%s10845_s1 + $0x30] sm:$0xff] }
0x45cc   : > { %v6531_v40 = vmul.f32 %v9069_v61, %v6529_v34  ;;  %v8712_v34 = vpack.c.bf16 %v6706_v18, %v6705_v6 }
0x45cd   : > { %v6534_v26 = vadd.f32 1.4214138, %v6532_v5 }
0x45ce   : > { %v6533_v47 = vadd.f32 1.4214138, %v6531_v40 }
0x45cf   : > { %v6536_v29 = vmul.f32 %v9067_v20, %v6534_v26 }
0x45d0   : > { %v6535_v39 = vmul.f32 %v9069_v61, %v6533_v47 }
0x45d1   : > { %v6538_v53 = vadd.f32 -0.28449672, %v6536_v29 }
0x45d2   : > { %v6537_v23 = vadd.f32 -0.28449672, %v6535_v39  ;;  %v9086_v39 = vld [vmem:[%s10778_s11] sm:$0xff] }
0x45d3   : > { %v6540_v11 = vmul.f32 %v9067_v20, %v6538_v53  ;;  %v6690_v53 = vrot.slane %v9086_v39, %v9535_v55 }
0x45d4   : > { %v6539_v51 = vmul.f32 %v9069_v61, %v6537_v23 }
0x45d5   : > { %v6542_v4 = vadd.f32 0.2548296, %v6540_v11 }
0x45d6   : > { %v6541_v38 = vadd.f32 0.2548296, %v6539_v51 }
0x45d7   : > { %v6544_v58 = vmul.f32 %v9067_v20, %v6542_v4  ;;  %v6701_v20 = vld [vmem:[%s10845_s1 + $0x10] sm:$0xff] }
0x45d8   : > { %v6543_v52 = vmul.f32 %v9069_v61, %v6541_v38  ;;  %v8704_v61 = vpack.c.bf16 %v6702_v48, %v6701_v20  ;;  %v6696_v38 = vrot.slane %v9086_v39, %v9538_v56 }
0x45d9   : > { %v6554_v63 = vmul.f32 %v9071_v50, %v6544_v58 }
0x45da   : > { %v6553_v21 = vmul.f32 %v9073_v37, %v6543_v52 }
0x45db   : > { %v6556_v57 = vsub.f32 1.0, %v6554_v63  ;;  %v7197_v63 = vld [vmem:[%s10846_s29] ss:$0 sm:$0xff] }
0x45dc   : > { %v6555_v35 = vsub.f32 1.0, %v6553_v21 }
0x45dd   : > { %v6558_v2 = vmul.f32 %v6556_v57, %v6516_v32 }
0x45de   : > { %v6557_v49 = vmul.f32 %v6555_v35, %v6515_v43 }
0x45df   : > { %v6560_v54 = vadd.f32 1.0, %v6558_v2 }
0x45e0   : > { %v6559_v60 = vadd.f32 1.0, %v6557_v49 }
0x45e1   : > { %v6562_v33 = vmul.f32 %v6560_v54, %v6510_v44 }
0x45e2   : > { %v6561_v14 = vmul.f32 %v6559_v60, %v6509_v17 }
0x45e4   : > { %8132 = vmatprep.mubr.f32.mxu1 %v6561_v14 }
0x45e5   : > { %8133 = vmatmul.mubr.f32.vlgmr.msra.gmra.mrb[50].mxu1 %v6562_v33 }
0x46b8   : > { %v8134_v22 = vpop.f32.mrb[50].mxu1 }
0x46b9   : > { %v6656_v59 = vadd.f32 %v8134_v22, %v6583_v19  ;;  %v6650_v16 = vpop.f32.mrb[51].mxu1 }
0x46ba   : > { %v6651_v3 = vadd.f32 %v6650_v16, %v6583_v19 }
0x46bb   : > { %v6660_v7 = vadd.f32 %v6656_v59, %v10622_v12 }
0x46bc   : > { %v6659_v30 = vadd.f32 %v6651_v3, %v10624_v13  ;;  %v6699_v13 = vld [vmem:[%s10845_s1] sm:$0xff] }
0x46bd   : > { %v6664_v8 = vsel %vm697_vm0, %v6660_v7, 0.0  ;;  %v8700_v15 = vpack.c.bf16 %v6700_v0, %v6699_v13 }
0x46be   : > { %6665 = vadd.xlane.f32.xlu1 %v6664_v8  ;;  %v6661_v1 = vsel %vm697_vm0, %v6659_v30, 0.0 }
0x46bf   : > { %6662 = vadd.xlane.f32.xlu0 %v6661_v1  ;;  %8701 = vmatprep.subr.bf16.mxu0 %v8700_v15 }
0x46c0   : > { %8703 = vmatpush3.bf16.msra.mxu0 %v8700_v15 }
0x46c1   : > { %8705 = vmatprep.subr.bf16.mxu0 %v8704_v61 }
0x46c4   : > { %8707 = vmatpush3.bf16.msra.mxu0 %v8704_v61 }
0x46c5   : > { %8709 = vmatprep.subr.bf16.mxu0 %v8708_v24 }
0x46c8   : > { %8711 = vmatpush3.bf16.msra.mxu0 %v8708_v24 }
0x46c9   : > { %8713 = vmatprep.subr.bf16.mxu0 %v8712_v34 }
0x46cc   : > { %8715 = vmatpush3.bf16.msra.mxu0 %v8712_v34 }
0x474b   : > { %v6666_v62 = vpop.xlane.xlu1 %6665 }
0x474c   : > { %v6668_v46 = vmul.f32 0.015625, %v6666_v62  ;;  %v6663_v9 = vpop.xlane.xlu0 %6662 }
0x474d   : > { %v6667_v28 = vmul.f32 0.015625, %v6663_v9 }
0x474e   : > { %v6670_v10 = vsub.f32 %v6660_v7, %v6668_v46 }
0x474f   : > { %v6669_v42 = vsub.f32 %v6659_v30, %v6667_v28 }
0x4750   : > { %v6672_v27 = vmul.f32 %v6670_v10, %v6670_v10 }
0x4751   : > { %v6671_v45 = vmul.f32 %v6669_v42, %v6669_v42 }
0x4752   : > { %v6676_v41 = vsel %vm697_vm0, %v6672_v27, 0.0 }
0x4753   : > { %6677 = vadd.xlane.f32.xlu1 %v6676_v41  ;;  %v6673_v12 = vsel %vm697_vm0, %v6671_v45, 0.0 }
0x4754   : > { %6674 = vadd.xlane.f32.xlu0 %v6673_v12 }
0x47e0   : > { %v6678_v5 = vpop.xlane.xlu1 %6677 }
0x47e1   : > { %v6680_v36 = vmul.f32 0.015625, %v6678_v5  ;;  %v6675_v40 = vpop.xlane.xlu0 %6674 }
0x47e2   : > { %v6679_v26 = vmul.f32 0.015625, %v6675_v40 }
0x47e3   : > { %v6682_v47 = vadd.f32 1e-05, %v6680_v36 }
0x47e4   : > { %v6681_v29 = vadd.f32 1e-05, %v6679_v26 }
0x47e5   : > { %9074 = vrsqrt.f32 %v6682_v47 }
0x47e6   : > { %9076 = vrsqrt.f32 %v6681_v29 }
0x47ef   : > { %v9075_v23 = vpop.eup %9074 }
0x47f0   : > { %v9077_v11 = vpop.eup %9076  ;;  %v6686_v51 = vmul.f32 %v9075_v23, %v6670_v10 }
0x47f1   : > { %v6685_v4 = vmul.f32 %v9077_v11, %v6669_v42 }
0x47f2   : > { %v6692_v58 = vmul.f32 %v6690_v53, %v6686_v51 }
0x47f3   : > { %v6691_v50 = vmul.f32 %v6690_v53, %v6685_v4 }
0x47f4   : > { %v6698_v37 = vadd.f32 %v6696_v38, %v6692_v58 }
0x47f5   : > { %v6697_v52 = vadd.f32 %v6696_v38, %v6691_v50 }
0x47f7   : > { %8151 = vmatprep.mubr.msk.f32.mxu0 %vm697_vm0, %v6697_v52 }
0x47f8   : > { %8152 = vmatmul.mubr.msk.f32.vlgmr.msra.gmra.mrb[62].mxu0 %vm697_vm0, %v6698_v37 }
0x48cb   : > { %v8153_v55 = vpop.f32.mrb[62].mxu0 }
0x48cc   : > { %v6792_v21 = vadd.f32 %v8153_v55, %v7197_v63  ;;  %v6786_v57 = vpop.f32.mrb[63].mxu0 }
0x48cd   : > { %v6787_v32 = vadd.f32 %v7197_v63, %v6786_v57 }
0x48ce   : > { %v7201_v35 = vmul.f32 -1.442695, %v6792_v21 }
0x48cf   : > { %v7200_v2 = vmul.f32 -1.442695, %v6787_v32 }
0x48d0   : > { %9078 = vpow2.f32 %v7201_v35 }
0x48d1   : > { %9080 = vpow2.f32 %v7200_v2 }
0x48da   : > { %v9079_v56 = vpop.eup %9078 }
0x48db   : > { %v9081_v43 = vpop.eup %9080  ;;  %v6802_v49 = vadd.f32 1.0, %v9079_v56 }
0x48dc   : > { %v6801_v54 = vadd.f32 1.0, %v9081_v43 }
0x48de   : > { %9082 = vrcp.f32 %v6801_v54 }
0x48df   : > { %9084 = vrcp.f32 %v6802_v49 }
0x48e8   : > { %v9083_v17 = vpop.eup %9082 }
0x48e9   : > { %v9085_v60 = vpop.eup %9084  ;;  %6807 = vst [vmem:[%s679_s19] sm:$0xff] %v9083_v17 }
0x48ea   : > { %6808 = vst [vmem:[%s679_s19 + $0x8] sm:$0xff] %v9085_v60 }
0x48eb PF: > { %s10850_s12 = sld [smem:[#allocation2_spill]] }
0x48f1   : > { %s32_s2 = sadd.s32 1, %s10850_s12  }
0x48f2   : > { %p29_p5 = scmp.ge.s32.totalorder %s32_s2, 4  }
0x48f4   :  { %31 = sbr.rel (!%p29_p5) target bundleno = 11 (0xb), region = 166 }

</bundles_post_ra>
